<compile_context>
chip_gen: v6e
topology: v6e:2x2x1
jax: 0.10.0
libtpu: 0.0.40
codegen_flags: <defaults>
</compile_context>

<pallas_src>
import functools
import math

import jax
import jax.numpy as jnp
from jax.experimental import pallas as pl
from jax.experimental.pallas import tpu as pltpu


# ---------------------------------------------------------------------------
# Pallas kernel: one full head level (stem -> cls/reg 3x3 conv -> 1x1 predict)
# ---------------------------------------------------------------------------

def _head_level_kernel(mask_ref, xp_ref, w_stem_ref, sc_stem_ref, sh_stem_ref,
                       w33_ref, sc33_ref, sh33_ref, w11_ref, b11_ref,
                       o_ref, *, H, W, K, NC):
    """Grid step = Nb batch elements.

    mask_ref:   (Hp, Wp, 1)          1.0 interior / 0.0 pad ring, f32
    xp_ref:     (Nb, Hp, Wp, Cin)    zero-padded NHWC input, bf16
    w_stem_ref: (Cin, Cm)            1x1 stem conv weight, bf16
    sc/sh_stem: (1, Cm)              folded stem BN scale / shift, f32
    w33_ref:    (K*K, Cm, 2*Cm)      cls_conv | reg_conv 3x3 weights, bf16
    sc/sh33:    (1, 2*Cm)            folded cls|reg BN scale / shift, f32
    w11_ref:    (2*Cm, CO)           block-diag cls|reg predict weights
                                     (lane-padded to CO=128k), bf16
    b11_ref:    (1, CO)              cls|reg predict biases (lane-padded), f32
    o_ref:      (Nb, H*W, CO)        sigmoid(cls) | reg | zero-pad, f32
    """
    Nb, Hp, Wp, Cin = xp_ref.shape
    Cm = w_stem_ref.shape[-1]
    CO = o_ref.shape[-1]

    # ---- stem: 1x1 ConvModule (conv + folded BN + SiLU) on the padded grid --
    xp = xp_ref[...].reshape(Nb * Hp * Wp, Cin)                    # bf16
    s = jnp.dot(xp, w_stem_ref[...], preferred_element_type=jnp.float32)
    s = s * sc_stem_ref[...] + sh_stem_ref[...]                    # BN (eval)
    s = s * jax.nn.sigmoid(s)                                      # SiLU
    s = s.reshape(Nb, Hp, Wp, Cm)
    # Zero the 1-px border (precomputed mask) so it acts as zero padding for
    # the 3x3 convs; cast to bf16 for the MXU.
    s = (s * mask_ref[...]).astype(jnp.bfloat16)

    # ---- cls/reg 3x3 ConvModules: 9 per-tap accumulating MXU dots -----------
    rows = Nb * H * W
    feat = None
    for kh in range(K):
        for kw in range(K):
            tap = s[:, kh:kh + H, kw:kw + W, :].reshape(rows, Cm)   # bf16
            d = jnp.dot(tap, w33_ref[kh * K + kw],
                        preferred_element_type=jnp.float32)
            feat = d if feat is None else feat + d
    feat = feat * sc33_ref[...] + sh33_ref[...]                    # BN (eval)
    feat = feat * jax.nn.sigmoid(feat)                             # SiLU, f32

    # ---- cls/reg 1x1 predict convs (block-diag, lane-padded) + bias ---------
    pred = jnp.dot(feat.astype(jnp.bfloat16), w11_ref[...],
                   preferred_element_type=jnp.float32) + b11_ref[...]
    lane = jax.lax.broadcasted_iota(jnp.int32, pred.shape, 1)
    pred = jnp.where(lane < NC, jax.nn.sigmoid(pred), pred)        # cls sigmoid

    o_ref[...] = pred.reshape(Nb, H * W, CO)


# ---------------------------------------------------------------------------
# Wrapper: parameter folding + pallas_call per pyramid level
# ---------------------------------------------------------------------------

def _fold_conv_bn(w_oihw, gamma, beta, mean, var, eps):
    """PyTorch OIHW conv weight + eval-mode BN -> im2col matrix, scale, shift."""
    Cout, Cin, K, _ = w_oihw.shape
    w_mat = jnp.transpose(w_oihw.astype(jnp.float32), (2, 3, 1, 0))
    w_mat = w_mat.reshape(K * K * Cin, Cout)        # row = (kh*K+kw)*Cin + cin
    inv_std = 1.0 / jnp.sqrt(var.astype(jnp.float32) + eps)
    scale = gamma.astype(jnp.float32) * inv_std
    shift = beta.astype(jnp.float32) - mean.astype(jnp.float32) * scale
    return w_mat, scale[None, :], shift[None, :]


def _head_level_pallas(x_nchw, p, *, num_classes, eps=1e-5):
    """Fused stem + cls/reg branch for one pyramid level.

    Returns (B, H*W, CO) with CO = 128*ceil((NC+4)/128):
    [:NC] = sigmoid(cls scores), [NC:NC+4] = reg distances, rest = padding.
    """
    N, Cin, H, W = x_nchw.shape
    NC = num_classes
    K = p['cls_conv']['w'].shape[-1]                 # 3
    Cm = p['stem']['w'].shape[0]
    Hp, Wp = H + 2, W + 2
    CO = int(pl.cdiv(NC + 4, 128)) * 128             # lane-dense output width

    # NCHW -> NHWC once, +1px zero pad, bf16 for the MXU (only glue per level).
    # TODO(synk): have the producing neck emit NHWC to kill this HBM pass.
    xp = jnp.pad(jnp.transpose(x_nchw, (0, 2, 3, 1)),
                 ((0, 0), (1, 1), (1, 1), (0, 0))).astype(jnp.bfloat16)

    # Precomputed interior mask (zeroes the stem output on the pad ring).
    mask = jnp.zeros((Hp, Wp, 1), jnp.float32).at[1:H + 1, 1:W + 1, :].set(1.0)

    # stem (1x1 ConvModule)
    w_s, sc_s, sh_s = _fold_conv_bn(p['stem']['w'], p['stem']['gamma'],
                                    p['stem']['beta'], p['stem']['mean'],
                                    p['stem']['var'], eps)
    w_s = w_s.astype(jnp.bfloat16)

    # cls_conv | reg_conv concatenated along the output-channel axis,
    # reshaped to (K*K, Cm, 2*Cm) so each tap is an aligned plane.
    w_c, sc_c, sh_c = _fold_conv_bn(p['cls_conv']['w'], p['cls_conv']['gamma'],
                                    p['cls_conv']['beta'], p['cls_conv']['mean'],
                                    p['cls_conv']['var'], eps)
    w_r, sc_r, sh_r = _fold_conv_bn(p['reg_conv']['w'], p['reg_conv']['gamma'],
                                    p['reg_conv']['beta'], p['reg_conv']['mean'],
                                    p['reg_conv']['var'], eps)
    w33 = jnp.concatenate([w_c, w_r], axis=1).reshape(K * K, Cm, 2 * Cm)
    w33 = w33.astype(jnp.bfloat16)
    sc33 = jnp.concatenate([sc_c, sc_r], axis=1)
    sh33 = jnp.concatenate([sh_c, sh_r], axis=1)

    # cls_pred | reg_pred as one block-diagonal 1x1 matmul, lane-padded to CO.
    wc11 = p['cls_pred']['w'].reshape(NC, Cm).astype(jnp.float32).T   # (Cm, NC)
    wr11 = p['reg_pred']['w'].reshape(4, Cm).astype(jnp.float32).T    # (Cm, 4)
    w11 = jnp.zeros((2 * Cm, CO), jnp.float32)
    w11 = w11.at[:Cm, :NC].set(wc11)
    w11 = w11.at[Cm:, NC:NC + 4].set(wr11)
    w11 = w11.astype(jnp.bfloat16)
    b11 = jnp.zeros((1, CO), jnp.float32)
    b11 = b11.at[0, :NC].set(p['cls_pred']['b'].astype(jnp.float32))
    b11 = b11.at[0, NC:NC + 4].set(p['reg_pred']['b'].astype(jnp.float32))

    # Batch grouping: several batch elements per grid step on small levels,
    # but keep >=2 grid steps when N>=2 (v7x has 2 TensorCores).
    ROWS_TARGET = 4096
    Nb = max(1, min(N, ROWS_TARGET // max(1, H * W)))
    if N >= 2:
        Nb = min(Nb, max(1, N // 2))
    while N % Nb:
        Nb -= 1
    grid = (N // Nb,)

    kernel = functools.partial(_head_level_kernel, H=H, W=W, K=K, NC=NC)
    out = pl.pallas_call(
        kernel,
        out_shape=jax.ShapeDtypeStruct((N, H * W, CO), jnp.float32),
        grid=grid,
        in_specs=[
            pl.BlockSpec((Hp, Wp, 1), lambda n: (0, 0, 0)),
            pl.BlockSpec((Nb, Hp, Wp, Cin), lambda n: (n, 0, 0, 0)),
            pl.BlockSpec((Cin, Cm), lambda n: (0, 0)),
            pl.BlockSpec((1, Cm), lambda n: (0, 0)),
            pl.BlockSpec((1, Cm), lambda n: (0, 0)),
            pl.BlockSpec((K * K, Cm, 2 * Cm), lambda n: (0, 0, 0)),
            pl.BlockSpec((1, 2 * Cm), lambda n: (0, 0)),
            pl.BlockSpec((1, 2 * Cm), lambda n: (0, 0)),
            pl.BlockSpec((2 * Cm, CO), lambda n: (0, 0)),
            pl.BlockSpec((1, CO), lambda n: (0, 0)),
        ],
        out_specs=pl.BlockSpec((Nb, H * W, CO), lambda n: (n, 0, 0)),
        compiler_params=pltpu.CompilerParams(
            dimension_semantics=("parallel",),
            vmem_limit_bytes=32 * 1024 * 1024),
    )(mask, xp, w_s, sc_s, sh_s, w33, sc33, sh33, w11, b11)
    return out


# ---------------------------------------------------------------------------
# Anchor generation / bbox decode (cheap elementwise glue, plain JAX)
# ---------------------------------------------------------------------------

def _make_anchors(hw_list, strides, offset=0.5, cell_size=5.0,
                  dtype=jnp.float32):
    anchors, points, nums, stride_ts = [], [], [], []
    for (h, w), s in zip(hw_list, strides):
        half = cell_size * s * 0.5
        sx = (jnp.arange(w, dtype=dtype) + offset) * s
        sy = (jnp.arange(h, dtype=dtype) + offset) * s
        SY, SX = jnp.meshgrid(sy, sx, indexing='ij')
        a = jnp.stack([SX - half, SY - half, SX + half, SY + half],
                      axis=-1).reshape(-1, 4)
        p = jnp.stack([SX, SY], axis=-1).reshape(-1, 2)
        anchors.append(a)
        points.append(p)
        nums.append(int(a.shape[0]))
        stride_ts.append(jnp.full((a.shape[0], 1), float(s), dtype=dtype))
    return (jnp.concatenate(anchors), jnp.concatenate(points), nums,
            jnp.concatenate(stride_ts))


def yolo_v6_head_forward(features, params, *, num_classes, strides=(8, 16, 32),
                         grid_cell_offset=0.5, grid_cell_size=5.0, eps=1e-5):
    """JAX/Pallas equivalent of YoloV6Head.forward (use_dfl=False, eval BN)."""
    cls_list, reg_list, hw_list = [], [], []
    for i, x in enumerate(features):
        _, _, H, W = x.shape
        out = _head_level_pallas(x, params[i], num_classes=num_classes, eps=eps)
        cls_list.append(out[..., :num_classes])
        reg_list.append(out[..., num_classes:num_classes + 4])
        hw_list.append((H, W))

    anchors_xxyy, anchor_points, num_anchors_list, stride_tensor = \
        _make_anchors(hw_list, strides, grid_cell_offset, grid_cell_size)

    cls_score_tensor = jnp.concatenate(cls_list, axis=1)
    reg_distribute_tensor = jnp.concatenate(reg_list, axis=1)

    scale_anchor_points = anchor_points / stride_tensor
    lt = reg_distribute_tensor[..., :2]
    rb = reg_distribute_tensor[..., 2:]
    predict_xy_xy = jnp.concatenate(
        [scale_anchor_points - lt, scale_anchor_points + rb],
        axis=-1) * stride_tensor

    return (anchors_xxyy, anchor_points, num_anchors_list, stride_tensor,
            cls_score_tensor, predict_xy_xy, reg_distribute_tensor)


# ---------------------------------------------------------------------------
# Pure-JAX reference (mirrors the PyTorch module exactly, all f32, NCHW)
# ---------------------------------------------------------------------------

def _conv2d_nchw(x, w, bias=None, pad=0):
    y = jax.lax.conv_general_dilated(
        x, w, window_strides=(1, 1),
        padding=[(pad, pad), (pad, pad)],
        dimension_numbers=('NCHW', 'OIHW', 'NCHW'))
    if bias is not None:
        y = y + bias[None, :, None, None]
    return y


def _conv_module_ref(x, p, eps=1e-5):
    k = p['w'].shape[-1]
    y = _conv2d_nchw(x, p['w'], pad=k // 2)
    inv = 1.0 / jnp.sqrt(p['var'] + eps)
    y = (y - p['mean'][None, :, None, None]) * inv[None, :, None, None]
    y = y * p['gamma'][None, :, None, None] + p['beta'][None, :, None, None]
    return y * jax.nn.sigmoid(y)      # SiLU


def yolo_v6_head_reference(features, params, *, num_classes,
                           strides=(8, 16, 32), grid_cell_offset=0.5,
                           grid_cell_size=5.0, eps=1e-5):
    cls_list, reg_list, hw_list = [], [], []
    for i, x in enumerate(features):
        N, _, H, W = x.shape
        s = _conv_module_ref(x, params[i]['stem'], eps)
        cls_feat = _conv_module_ref(s, params[i]['cls_conv'], eps)
        cls_out = _conv2d_nchw(cls_feat, params[i]['cls_pred']['w'],
                               params[i]['cls_pred']['b'])
        reg_feat = _conv_module_ref(s, params[i]['reg_conv'], eps)
        reg_out = _conv2d_nchw(reg_feat, params[i]['reg_pred']['w'],
                               params[i]['reg_pred']['b'])
        cls_out = jax.nn.sigmoid(cls_out)
        cls_list.append(jnp.transpose(
            cls_out.reshape(N, num_classes, H * W), (0, 2, 1)))
        reg_list.append(jnp.transpose(
            reg_out.reshape(N, 4, H * W), (0, 2, 1)))
        hw_list.append((H, W))
    anchors_xxyy, anchor_points, num_anchors_list, stride_tensor = \
        _make_anchors(hw_list, strides, grid_cell_offset, grid_cell_size)
    cls_t = jnp.concatenate(cls_list, axis=1)
    reg_t = jnp.concatenate(reg_list, axis=1)
    pts = anchor_points / stride_tensor
    boxes = jnp.concatenate([pts - reg_t[..., :2], pts + reg_t[..., 2:]],
                            axis=-1) * stride_tensor
    return (anchors_xxyy, anchor_points, num_anchors_list, stride_tensor,
            cls_t, boxes, reg_t)


# ---------------------------------------------------------------------------
# Self-test
# ---------------------------------------------------------------------------

if __name__ == "__main__":
    key = jax.random.PRNGKey(0)
    num_classes = 6
    N = 2
    strides = (8, 16, 32)
    # (in_channels, head_channels, H, W) per pyramid level (small shapes).
    level_cfg = [(16, 32, 16, 16), (32, 32, 8, 8), (64, 32, 4, 4)]

    def conv_module_params(k, cin, cout, ksz):
        kw, kg, kb, km, kv = jax.random.split(k, 5)
        bound = 1.0 / math.sqrt(cin * ksz * ksz)
        return {
            'w': jax.random.uniform(kw, (cout, cin, ksz, ksz), jnp.float32,
                                    -bound, bound),
            'gamma': jax.random.uniform(kg, (cout,), jnp.float32, 0.8, 1.2),
            'beta': 0.1 * jax.random.normal(kb, (cout,), jnp.float32),
            'mean': 0.1 * jax.random.normal(km, (cout,), jnp.float32),
            'var': jax.random.uniform(kv, (cout,), jnp.float32, 0.5, 1.5),
        }

    prior_prob = 0.01
    cls_bias_init = -math.log((1.0 - prior_prob) / prior_prob)  # initialize_biases

    params, features = [], []
    for (cin, cm, h, w) in level_cfg:
        key, k_x, k_s, k_c, k_r, k_cp, k_rp = jax.random.split(key, 7)
        features.append(jax.random.normal(k_x, (N, cin, h, w), jnp.float32))
        bound = 1.0 / math.sqrt(cm)
        params.append({
            'stem': conv_module_params(k_s, cin, cm, 1),
            'cls_conv': conv_module_params(k_c, cm, cm, 3),
            'reg_conv': conv_module_params(k_r, cm, cm, 3),
            # NOTE: initialize_biases() zeroes the predict weights; random
            # weights are used here so the numerical check is non-trivial.
            # The bias initialization matches the module exactly.
            'cls_pred': {
                'w': jax.random.uniform(k_cp, (num_classes, cm, 1, 1),
                                        jnp.float32, -bound, bound),
                'b': jnp.full((num_classes,), cls_bias_init, jnp.float32)},
            'reg_pred': {
                'w': jax.random.uniform(k_rp, (4, cm, 1, 1),
                                        jnp.float32, -bound, bound),
                'b': jnp.full((4,), 1.0, jnp.float32)},
        })

    (anchors, points, num_list, stride_t,
     cls_t, boxes, reg_t) = yolo_v6_head_forward(
        features, params, num_classes=num_classes, strides=strides)
    jax.block_until_ready((anchors, points, stride_t, cls_t, boxes, reg_t))

    (r_anchors, r_points, r_num, r_stride,
     r_cls, r_boxes, r_reg) = yolo_v6_head_reference(
        features, params, num_classes=num_classes, strides=strides)

    A = sum(h * w for (_, _, h, w) in level_cfg)
    assert cls_t.shape == (N, A, num_classes), cls_t.shape
    assert reg_t.shape == (N, A, 4), reg_t.shape
    assert boxes.shape == (N, A, 4), boxes.shape
    assert num_list == r_num, (num_list, r_num)

    def _check(name, a, b, atol, rtol):
        ok = bool(jnp.allclose(a, b, atol=atol, rtol=rtol))
        assert ok, (name, float(jnp.max(jnp.abs(a - b))))

    _check('anchors_xx_yy', anchors, r_anchors, 1e-5, 1e-5)
    _check('anchor_points_xy', points, r_points, 1e-5, 1e-5)
    _check('stride_tensor', stride_t, r_stride, 1e-5, 1e-5)
    # bf16 MXU inputs (f32 accumulation) -> slightly looser tolerances.
    _check('cls_score_tensor', cls_t, r_cls, 2e-3, 2e-2)
    _check('reg_distribute_tensor', reg_t, r_reg, 2e-2, 2e-2)
    _check('predict_xy_xy', boxes, r_boxes, 2e-1, 2e-2)

    print("KERNEL_OK")
</pallas_src>

<mosaic_0001>
module attributes {stable_mosaic.version = 11 : i64} {
  func.func @_head_level_kernel(%arg0: i32, %arg1: memref<18x18x1xf32, #tpu.memory_space<vmem>>, %arg2: memref<1x18x18x16xbf16, #tpu.memory_space<vmem>>, %arg3: memref<16x32xbf16, #tpu.memory_space<vmem>>, %arg4: memref<1x32xf32, #tpu.memory_space<vmem>>, %arg5: memref<1x32xf32, #tpu.memory_space<vmem>>, %arg6: memref<9x32x64xbf16, #tpu.memory_space<vmem>>, %arg7: memref<1x64xf32, #tpu.memory_space<vmem>>, %arg8: memref<1x64xf32, #tpu.memory_space<vmem>>, %arg9: memref<64x128xbf16, #tpu.memory_space<vmem>>, %arg10: memref<1x128xf32, #tpu.memory_space<vmem>>, %arg11: memref<1x256x128xf32, #tpu.memory_space<vmem>>) attributes {dimension_semantics = [#tpu.dimension_semantics<parallel>], iteration_bounds = array<i64: 2>, scalar_prefetch = 0 : i64, scratch_operands = 0 : i64, tpu.core_type = #tpu.core_type<tc>, window_params = [{pipeline_mode = #tpu.pipeline_mode<synchronous>, transform_indices = @transform_0, window_bounds = array<i64: 18, 18, 1>}, {transform_indices = @transform_1, window_bounds = array<i64: 1, 18, 18, 16>}, {pipeline_mode = #tpu.pipeline_mode<synchronous>, transform_indices = @transform_2, window_bounds = array<i64: 16, 32>}, {pipeline_mode = #tpu.pipeline_mode<synchronous>, transform_indices = @transform_3, window_bounds = array<i64: 1, 32>}, {pipeline_mode = #tpu.pipeline_mode<synchronous>, transform_indices = @transform_4, window_bounds = array<i64: 1, 32>}, {pipeline_mode = #tpu.pipeline_mode<synchronous>, transform_indices = @transform_5, window_bounds = array<i64: 9, 32, 64>}, {pipeline_mode = #tpu.pipeline_mode<synchronous>, transform_indices = @transform_6, window_bounds = array<i64: 1, 64>}, {pipeline_mode = #tpu.pipeline_mode<synchronous>, transform_indices = @transform_7, window_bounds = array<i64: 1, 64>}, {pipeline_mode = #tpu.pipeline_mode<synchronous>, transform_indices = @transform_8, window_bounds = array<i64: 64, 128>}, {pipeline_mode = #tpu.pipeline_mode<synchronous>, transform_indices = @transform_9, window_bounds = array<i64: 1, 128>}, {transform_indices = @transform_10, window_bounds = array<i64: 1, 256, 128>}]} {
    %c0 = arith.constant 0 : index
    %c0_0 = arith.constant 0 : index
    %c0_1 = arith.constant 0 : index
    %c0_2 = arith.constant 0 : index
    %0 = vector.load %arg2[%c0, %c0_0, %c0_1, %c0_2] : memref<1x18x18x16xbf16, #tpu.memory_space<vmem>>, vector<1x18x18x16xbf16>
    %1 = vector.shape_cast %0 : vector<1x18x18x16xbf16> to vector<324x16xbf16>
    %c0_3 = arith.constant 0 : index
    %c0_4 = arith.constant 0 : index
    %2 = vector.load %arg3[%c0_3, %c0_4] : memref<16x32xbf16, #tpu.memory_space<vmem>>, vector<16x32xbf16>
    %cst = arith.constant dense<0.000000e+00> : vector<324x32xf32>
    %3 = tpu.matmul %1, %2, %cst {dimension_numbers = #tpu.dot_dimension_numbers<[1], [0], [0], [1], [0, 0, 1, 1], [], []>} : vector<324x16xbf16>, vector<16x32xbf16>, vector<324x32xf32> -> vector<324x32xf32>
    %c0_5 = arith.constant 0 : index
    %c0_6 = arith.constant 0 : index
    %4 = vector.load %arg4[%c0_5, %c0_6] : memref<1x32xf32, #tpu.memory_space<vmem>>, vector<1x32xf32>
    %5 = vector.broadcast %4 : vector<1x32xf32> to vector<324x32xf32>
    %6 = arith.mulf %3, %5 : vector<324x32xf32>
    %c0_7 = arith.constant 0 : index
    %c0_8 = arith.constant 0 : index
    %7 = vector.load %arg5[%c0_7, %c0_8] : memref<1x32xf32, #tpu.memory_space<vmem>>, vector<1x32xf32>
    %8 = vector.broadcast %7 : vector<1x32xf32> to vector<324x32xf32>
    %9 = arith.addf %6, %8 : vector<324x32xf32>
    %10 = arith.negf %9 : vector<324x32xf32>
    %11 = math.exp %10 : vector<324x32xf32>
    %cst_9 = arith.constant 1.000000e+00 : f32
    %12 = vector.broadcast %cst_9 : f32 to vector<324x32xf32>
    %13 = arith.addf %12, %11 : vector<324x32xf32>
    %14 = arith.divf %12, %13 : vector<324x32xf32>
    %15 = arith.mulf %9, %14 : vector<324x32xf32>
    %16 = vector.shape_cast %15 : vector<324x32xf32> to vector<1x18x18x32xf32>
    %c0_10 = arith.constant 0 : index
    %c0_11 = arith.constant 0 : index
    %c0_12 = arith.constant 0 : index
    %17 = vector.load %arg1[%c0_10, %c0_11, %c0_12] : memref<18x18x1xf32, #tpu.memory_space<vmem>>, vector<18x18x1xf32>
    %18 = vector.shape_cast %17 : vector<18x18x1xf32> to vector<1x18x18x1xf32>
    %19 = vector.broadcast %18 : vector<1x18x18x1xf32> to vector<1x18x18x32xf32>
    %20 = arith.mulf %16, %19 : vector<1x18x18x32xf32>
    %21 = arith.truncf %20 : vector<1x18x18x32xf32> to vector<1x18x18x32xbf16>
    %22 = vector.extract_strided_slice %21 {offsets = [0, 0, 0, 0], sizes = [1, 16, 16, 32], strides = [1, 1, 1, 1]} : vector<1x18x18x32xbf16> to vector<1x16x16x32xbf16>
    %23 = vector.shape_cast %22 : vector<1x16x16x32xbf16> to vector<256x32xbf16>
    %c0_13 = arith.constant 0 : index
    %c0_14 = arith.constant 0 : index
    %c0_15 = arith.constant 0 : index
    %24 = vector.load %arg6[%c0_13, %c0_14, %c0_15] : memref<9x32x64xbf16, #tpu.memory_space<vmem>>, vector<1x32x64xbf16>
    %25 = vector.shape_cast %24 : vector<1x32x64xbf16> to vector<32x64xbf16>
    %cst_16 = arith.constant dense<0.000000e+00> : vector<256x64xf32>
    %26 = tpu.matmul %23, %25, %cst_16 {dimension_numbers = #tpu.dot_dimension_numbers<[1], [0], [0], [1], [0, 0, 1, 1], [], []>} : vector<256x32xbf16>, vector<32x64xbf16>, vector<256x64xf32> -> vector<256x64xf32>
    %27 = vector.extract_strided_slice %21 {offsets = [0, 0, 1, 0], sizes = [1, 16, 16, 32], strides = [1, 1, 1, 1]} : vector<1x18x18x32xbf16> to vector<1x16x16x32xbf16>
    %28 = vector.shape_cast %27 : vector<1x16x16x32xbf16> to vector<256x32xbf16>
    %c1 = arith.constant 1 : index
    %c0_17 = arith.constant 0 : index
    %c0_18 = arith.constant 0 : index
    %29 = vector.load %arg6[%c1, %c0_17, %c0_18] : memref<9x32x64xbf16, #tpu.memory_space<vmem>>, vector<1x32x64xbf16>
    %30 = vector.shape_cast %29 : vector<1x32x64xbf16> to vector<32x64xbf16>
    %cst_19 = arith.constant dense<0.000000e+00> : vector<256x64xf32>
    %31 = tpu.matmul %28, %30, %cst_19 {dimension_numbers = #tpu.dot_dimension_numbers<[1], [0], [0], [1], [0, 0, 1, 1], [], []>} : vector<256x32xbf16>, vector<32x64xbf16>, vector<256x64xf32> -> vector<256x64xf32>
    %32 = arith.addf %26, %31 : vector<256x64xf32>
    %33 = vector.extract_strided_slice %21 {offsets = [0, 0, 2, 0], sizes = [1, 16, 16, 32], strides = [1, 1, 1, 1]} : vector<1x18x18x32xbf16> to vector<1x16x16x32xbf16>
    %34 = vector.shape_cast %33 : vector<1x16x16x32xbf16> to vector<256x32xbf16>
    %c2 = arith.constant 2 : index
    %c0_20 = arith.constant 0 : index
    %c0_21 = arith.constant 0 : index
    %35 = vector.load %arg6[%c2, %c0_20, %c0_21] : memref<9x32x64xbf16, #tpu.memory_space<vmem>>, vector<1x32x64xbf16>
    %36 = vector.shape_cast %35 : vector<1x32x64xbf16> to vector<32x64xbf16>
    %cst_22 = arith.constant dense<0.000000e+00> : vector<256x64xf32>
    %37 = tpu.matmul %34, %36, %cst_22 {dimension_numbers = #tpu.dot_dimension_numbers<[1], [0], [0], [1], [0, 0, 1, 1], [], []>} : vector<256x32xbf16>, vector<32x64xbf16>, vector<256x64xf32> -> vector<256x64xf32>
    %38 = arith.addf %32, %37 : vector<256x64xf32>
    %39 = vector.extract_strided_slice %21 {offsets = [0, 1, 0, 0], sizes = [1, 16, 16, 32], strides = [1, 1, 1, 1]} : vector<1x18x18x32xbf16> to vector<1x16x16x32xbf16>
    %40 = vector.shape_cast %39 : vector<1x16x16x32xbf16> to vector<256x32xbf16>
    %c3 = arith.constant 3 : index
    %c0_23 = arith.constant 0 : index
    %c0_24 = arith.constant 0 : index
    %41 = vector.load %arg6[%c3, %c0_23, %c0_24] : memref<9x32x64xbf16, #tpu.memory_space<vmem>>, vector<1x32x64xbf16>
    %42 = vector.shape_cast %41 : vector<1x32x64xbf16> to vector<32x64xbf16>
    %cst_25 = arith.constant dense<0.000000e+00> : vector<256x64xf32>
    %43 = tpu.matmul %40, %42, %cst_25 {dimension_numbers = #tpu.dot_dimension_numbers<[1], [0], [0], [1], [0, 0, 1, 1], [], []>} : vector<256x32xbf16>, vector<32x64xbf16>, vector<256x64xf32> -> vector<256x64xf32>
    %44 = arith.addf %38, %43 : vector<256x64xf32>
    %45 = vector.extract_strided_slice %21 {offsets = [0, 1, 1, 0], sizes = [1, 16, 16, 32], strides = [1, 1, 1, 1]} : vector<1x18x18x32xbf16> to vector<1x16x16x32xbf16>
    %46 = vector.shape_cast %45 : vector<1x16x16x32xbf16> to vector<256x32xbf16>
    %c4 = arith.constant 4 : index
    %c0_26 = arith.constant 0 : index
    %c0_27 = arith.constant 0 : index
    %47 = vector.load %arg6[%c4, %c0_26, %c0_27] : memref<9x32x64xbf16, #tpu.memory_space<vmem>>, vector<1x32x64xbf16>
    %48 = vector.shape_cast %47 : vector<1x32x64xbf16> to vector<32x64xbf16>
    %cst_28 = arith.constant dense<0.000000e+00> : vector<256x64xf32>
    %49 = tpu.matmul %46, %48, %cst_28 {dimension_numbers = #tpu.dot_dimension_numbers<[1], [0], [0], [1], [0, 0, 1, 1], [], []>} : vector<256x32xbf16>, vector<32x64xbf16>, vector<256x64xf32> -> vector<256x64xf32>
    %50 = arith.addf %44, %49 : vector<256x64xf32>
    %51 = vector.extract_strided_slice %21 {offsets = [0, 1, 2, 0], sizes = [1, 16, 16, 32], strides = [1, 1, 1, 1]} : vector<1x18x18x32xbf16> to vector<1x16x16x32xbf16>
    %52 = vector.shape_cast %51 : vector<1x16x16x32xbf16> to vector<256x32xbf16>
    %c5 = arith.constant 5 : index
    %c0_29 = arith.constant 0 : index
    %c0_30 = arith.constant 0 : index
    %53 = vector.load %arg6[%c5, %c0_29, %c0_30] : memref<9x32x64xbf16, #tpu.memory_space<vmem>>, vector<1x32x64xbf16>
    %54 = vector.shape_cast %53 : vector<1x32x64xbf16> to vector<32x64xbf16>
    %cst_31 = arith.constant dense<0.000000e+00> : vector<256x64xf32>
    %55 = tpu.matmul %52, %54, %cst_31 {dimension_numbers = #tpu.dot_dimension_numbers<[1], [0], [0], [1], [0, 0, 1, 1], [], []>} : vector<256x32xbf16>, vector<32x64xbf16>, vector<256x64xf32> -> vector<256x64xf32>
    %56 = arith.addf %50, %55 : vector<256x64xf32>
    %57 = vector.extract_strided_slice %21 {offsets = [0, 2, 0, 0], sizes = [1, 16, 16, 32], strides = [1, 1, 1, 1]} : vector<1x18x18x32xbf16> to vector<1x16x16x32xbf16>
    %58 = vector.shape_cast %57 : vector<1x16x16x32xbf16> to vector<256x32xbf16>
    %c6 = arith.constant 6 : index
    %c0_32 = arith.constant 0 : index
    %c0_33 = arith.constant 0 : index
    %59 = vector.load %arg6[%c6, %c0_32, %c0_33] : memref<9x32x64xbf16, #tpu.memory_space<vmem>>, vector<1x32x64xbf16>
    %60 = vector.shape_cast %59 : vector<1x32x64xbf16> to vector<32x64xbf16>
    %cst_34 = arith.constant dense<0.000000e+00> : vector<256x64xf32>
    %61 = tpu.matmul %58, %60, %cst_34 {dimension_numbers = #tpu.dot_dimension_numbers<[1], [0], [0], [1], [0, 0, 1, 1], [], []>} : vector<256x32xbf16>, vector<32x64xbf16>, vector<256x64xf32> -> vector<256x64xf32>
    %62 = arith.addf %56, %61 : vector<256x64xf32>
    %63 = vector.extract_strided_slice %21 {offsets = [0, 2, 1, 0], sizes = [1, 16, 16, 32], strides = [1, 1, 1, 1]} : vector<1x18x18x32xbf16> to vector<1x16x16x32xbf16>
    %64 = vector.shape_cast %63 : vector<1x16x16x32xbf16> to vector<256x32xbf16>
    %c7 = arith.constant 7 : index
    %c0_35 = arith.constant 0 : index
    %c0_36 = arith.constant 0 : index
    %65 = vector.load %arg6[%c7, %c0_35, %c0_36] : memref<9x32x64xbf16, #tpu.memory_space<vmem>>, vector<1x32x64xbf16>
    %66 = vector.shape_cast %65 : vector<1x32x64xbf16> to vector<32x64xbf16>
    %cst_37 = arith.constant dense<0.000000e+00> : vector<256x64xf32>
    %67 = tpu.matmul %64, %66, %cst_37 {dimension_numbers = #tpu.dot_dimension_numbers<[1], [0], [0], [1], [0, 0, 1, 1], [], []>} : vector<256x32xbf16>, vector<32x64xbf16>, vector<256x64xf32> -> vector<256x64xf32>
    %68 = arith.addf %62, %67 : vector<256x64xf32>
    %69 = vector.extract_strided_slice %21 {offsets = [0, 2, 2, 0], sizes = [1, 16, 16, 32], strides = [1, 1, 1, 1]} : vector<1x18x18x32xbf16> to vector<1x16x16x32xbf16>
    %70 = vector.shape_cast %69 : vector<1x16x16x32xbf16> to vector<256x32xbf16>
    %c8 = arith.constant 8 : index
    %c0_38 = arith.constant 0 : index
    %c0_39 = arith.constant 0 : index
    %71 = vector.load %arg6[%c8, %c0_38, %c0_39] : memref<9x32x64xbf16, #tpu.memory_space<vmem>>, vector<1x32x64xbf16>
    %72 = vector.shape_cast %71 : vector<1x32x64xbf16> to vector<32x64xbf16>
    %cst_40 = arith.constant dense<0.000000e+00> : vector<256x64xf32>
    %73 = tpu.matmul %70, %72, %cst_40 {dimension_numbers = #tpu.dot_dimension_numbers<[1], [0], [0], [1], [0, 0, 1, 1], [], []>} : vector<256x32xbf16>, vector<32x64xbf16>, vector<256x64xf32> -> vector<256x64xf32>
    %74 = arith.addf %68, %73 : vector<256x64xf32>
    %c0_41 = arith.constant 0 : index
    %c0_42 = arith.constant 0 : index
    %75 = vector.load %arg7[%c0_41, %c0_42] : memref<1x64xf32, #tpu.memory_space<vmem>>, vector<1x64xf32>
    %76 = vector.broadcast %75 : vector<1x64xf32> to vector<256x64xf32>
    %77 = arith.mulf %74, %76 : vector<256x64xf32>
    %c0_43 = arith.constant 0 : index
    %c0_44 = arith.constant 0 : index
    %78 = vector.load %arg8[%c0_43, %c0_44] : memref<1x64xf32, #tpu.memory_space<vmem>>, vector<1x64xf32>
    %79 = vector.broadcast %78 : vector<1x64xf32> to vector<256x64xf32>
    %80 = arith.addf %77, %79 : vector<256x64xf32>
    %81 = arith.negf %80 : vector<256x64xf32>
    %82 = math.exp %81 : vector<256x64xf32>
    %cst_45 = arith.constant 1.000000e+00 : f32
    %83 = vector.broadcast %cst_45 : f32 to vector<256x64xf32>
    %84 = arith.addf %83, %82 : vector<256x64xf32>
    %85 = arith.divf %83, %84 : vector<256x64xf32>
    %86 = arith.mulf %80, %85 : vector<256x64xf32>
    %87 = arith.truncf %86 : vector<256x64xf32> to vector<256x64xbf16>
    %c0_46 = arith.constant 0 : index
    %c0_47 = arith.constant 0 : index
    %88 = vector.load %arg9[%c0_46, %c0_47] : memref<64x128xbf16, #tpu.memory_space<vmem>>, vector<64x128xbf16>
    %cst_48 = arith.constant dense<0.000000e+00> : vector<256x128xf32>
    %89 = tpu.matmul %87, %88, %cst_48 {dimension_numbers = #tpu.dot_dimension_numbers<[1], [0], [0], [1], [0, 0, 1, 1], [], []>} : vector<256x64xbf16>, vector<64x128xbf16>, vector<256x128xf32> -> vector<256x128xf32>
    %c0_49 = arith.constant 0 : index
    %c0_50 = arith.constant 0 : index
    %90 = vector.load %arg10[%c0_49, %c0_50] : memref<1x128xf32, #tpu.memory_space<vmem>>, vector<1x128xf32>
    %91 = vector.broadcast %90 : vector<1x128xf32> to vector<256x128xf32>
    %92 = arith.addf %89, %91 : vector<256x128xf32>
    %93 = tpu.iota {dimensions = array<i32: 1>} : vector<256x128xi32>
    %c6_i32 = arith.constant 6 : i32
    %94 = vector.broadcast %c6_i32 : i32 to vector<256x128xi32>
    %95 = arith.cmpi slt, %93, %94 : vector<256x128xi32>
    %96 = arith.negf %92 : vector<256x128xf32>
    %97 = math.exp %96 : vector<256x128xf32>
    %cst_51 = arith.constant 1.000000e+00 : f32
    %98 = vector.broadcast %cst_51 : f32 to vector<256x128xf32>
    %99 = arith.addf %98, %97 : vector<256x128xf32>
    %100 = arith.divf %98, %99 : vector<256x128xf32>
    %101 = arith.select %95, %100, %92 : vector<256x128xi1>, vector<256x128xf32>
    %102 = vector.shape_cast %101 : vector<256x128xf32> to vector<1x256x128xf32>
    %c0_52 = arith.constant 0 : index
    %c0_53 = arith.constant 0 : index
    %c0_54 = arith.constant 0 : index
    %103 = vector.load %arg11[%c0_52, %c0_53, %c0_54] : memref<1x256x128xf32, #tpu.memory_space<vmem>>, vector<1x256x128xf32>
    tpu.vector_store %arg11[%c0_52, %c0_53, %c0_54], %102 {strides = array<i32>} : memref<1x256x128xf32, #tpu.memory_space<vmem>>, vector<1x256x128xf32>,
    return
  }
  func.func @transform_0(%arg0: i32) -> (i32, i32, i32) {
    %c0_i32 = arith.constant 0 : i32
    %c0_i32_0 = arith.constant 0 : i32
    %c0_i32_1 = arith.constant 0 : i32
    %c0_i32_2 = arith.constant 0 : i32
    return %c0_i32, %c0_i32_0, %c0_i32_1 : i32, i32, i32
  }
  func.func @transform_1(%arg0: i32) -> (i32, i32, i32, i32) {
    %c0_i32 = arith.constant 0 : i32
    %c0_i32_0 = arith.constant 0 : i32
    %c0_i32_1 = arith.constant 0 : i32
    %c0_i32_2 = arith.constant 0 : i32
    return %arg0, %c0_i32, %c0_i32_0, %c0_i32_1 : i32, i32, i32, i32
  }
  func.func @transform_2(%arg0: i32) -> (i32, i32) {
    %c0_i32 = arith.constant 0 : i32
    %c0_i32_0 = arith.constant 0 : i32
    %c0_i32_1 = arith.constant 0 : i32
    return %c0_i32, %c0_i32_0 : i32, i32
  }
  func.func @transform_3(%arg0: i32) -> (i32, i32) {
    %c0_i32 = arith.constant 0 : i32
    %c0_i32_0 = arith.constant 0 : i32
    %c0_i32_1 = arith.constant 0 : i32
    return %c0_i32, %c0_i32_0 : i32, i32
  }
  func.func @transform_4(%arg0: i32) -> (i32, i32) {
    %c0_i32 = arith.constant 0 : i32
    %c0_i32_0 = arith.constant 0 : i32
    %c0_i32_1 = arith.constant 0 : i32
    return %c0_i32, %c0_i32_0 : i32, i32
  }
  func.func @transform_5(%arg0: i32) -> (i32, i32, i32) {
    %c0_i32 = arith.constant 0 : i32
    %c0_i32_0 = arith.constant 0 : i32
    %c0_i32_1 = arith.constant 0 : i32
    %c0_i32_2 = arith.constant 0 : i32
    return %c0_i32, %c0_i32_0, %c0_i32_1 : i32, i32, i32
  }
  func.func @transform_6(%arg0: i32) -> (i32, i32) {
    %c0_i32 = arith.constant 0 : i32
    %c0_i32_0 = arith.constant 0 : i32
    %c0_i32_1 = arith.constant 0 : i32
    return %c0_i32, %c0_i32_0 : i32, i32
  }
  func.func @transform_7(%arg0: i32) -> (i32, i32) {
    %c0_i32 = arith.constant 0 : i32
    %c0_i32_0 = arith.constant 0 : i32
    %c0_i32_1 = arith.constant 0 : i32
    return %c0_i32, %c0_i32_0 : i32, i32
  }
  func.func @transform_8(%arg0: i32) -> (i32, i32) {
    %c0_i32 = arith.constant 0 : i32
    %c0_i32_0 = arith.constant 0 : i32
    %c0_i32_1 = arith.constant 0 : i32
    return %c0_i32, %c0_i32_0 : i32, i32
  }
  func.func @transform_9(%arg0: i32) -> (i32, i32) {
    %c0_i32 = arith.constant 0 : i32
    %c0_i32_0 = arith.constant 0 : i32
    %c0_i32_1 = arith.constant 0 : i32
    return %c0_i32, %c0_i32_0 : i32, i32
  }
  func.func @transform_10(%arg0: i32) -> (i32, i32, i32) {
    %c0_i32 = arith.constant 0 : i32
    %c0_i32_0 = arith.constant 0 : i32
    %c0_i32_1 = arith.constant 0 : i32
    return %arg0, %c0_i32, %c0_i32_0 : i32, i32, i32
  }
}

</mosaic_0001>

<bundles_post_ra>
// kernel: tpu_custom_call.1
= control target key start
LH: loop header
LB: loop body
LE: loop exit
PB: predicated region body
PF: predicated region fallthrough
CT: control target
= control target key end

     0   :  { %15 = vsyncpa [#allocation3], 0  ;;  %s15946_s0 = inlined_call_operand.vmem [shape: f32[18,18,1], index: 0, kind: input, shape index: {}]   ;;  %s15947_s1 = inlined_call_operand.vmem [shape: bf16[2,18,18,16], index: 1, kind: input, shape index: {}]   ;;  %s15948_s2 = inlined_call_operand.vmem [shape: bf16[16,32], index: 2, kind: input, shape index: {}]   ;;  %s15949_s3 = inlined_call_operand.vmem [shape: f32[1,32], index: 3, kind: input, shape index: {}]   ;;  %s15950_s4 = inlined_call_operand.vmem [shape: f32[1,32], index: 4, kind: input, shape index: {}]   ;;  %s15951_s5 = inlined_call_operand.vmem [shape: bf16[9,32,64], index: 5, kind: input, shape index: {}]   ;;  %s15952_s6 = inlined_call_operand.vmem [shape: f32[1,64], index: 6, kind: input, shape index: {}]   ;;  %s15953_s7 = inlined_call_operand.vmem [shape: f32[1,64], index: 7, kind: input, shape index: {}]   ;;  %s15954_s8 = inlined_call_operand.vmem [shape: bf16[64,128], index: 8, kind: input, shape index: {}]   ;;  %s15955_s9 = inlined_call_operand.vmem [shape: f32[1,128], index: 9, kind: input, shape index: {}]   ;;  %s15956_s10 = inlined_call_operand.hbm [shape: f32[2,256,128], index: 10, kind: output, shape index: {}]  }
   0x1   :  { %17 = vsyncpa [#allocation3 + $0x1], 0  ;;  %s11738_s13 = smov 0   ;;  %s11740_s14 = smov 0  }
   0x2   :  { %s11742_s15 = smov 0   ;;  %s11744_s16 = smov 0  }
   0x3 LB: > { %s11759_s17 = sadd.s32 4294967295, %s11669_s16   ;;  %s10022_s18 = sadd.s32 4294967294, %s11669_s16   ;;  %s11669_s16 = sphi %s11744_s16, %s16501_s16   ;;  %s11665_s15 = sphi %s11742_s15, %s16500_s15   ;;  %s11661_s14 = sphi %s11740_s14, %s16499_s14   ;;  %s11657_s13 = sphi %s11738_s13, %s16498_s13  }
   0x4   : > { %s11763_s19 = sadd.s32 1, %s11669_s16   ;;  %s245_s20 = sadd.s32 1, %s11665_s15 }
   0x5   : > { %s242_s21 = ssub.s32 %s11669_s16, %s11763_s19  ;;  %p255_p0 = scmp.ne.s32.totalorder %s11665_s15, %s11661_s14 }
   0x6   : > { %p243_p1 = scmp.eq.s32.totalorder %s242_s21, 0  ;;  %p256_p2 = scmp.eq.s32.totalorder %s11759_s17, 1 }
   0x7   : > { %p261_p3 = scmp.ne.s32.totalorder %s11661_s14, %s11657_s13  ;;  %p262_p4 = scmp.eq.s32.totalorder %s10022_s18, 1 }
   0x8   : > { %s11774_s22 = scalar_select %p243_p1, %s11665_s15, %s245_s20  }
   0x9   : > { %p11776_p5 = por %p256_p2, %p255_p0  ;;  %p11780_p6 = por %p262_p4, %p261_p3 }
   0xa   : > { %p10025_p7 = scmp.ge.s32.totalorder %s11669_s16, 1  ;;  %p315_p8 = scmp.lt.s32.totalorder %s11669_s16, 3 }
   0xc   : > { %p316_p9 = pnand %p10025_p7, %p315_p8 }
   0xe   : > { %319 = sbr.rel (%p316_p9) target bundleno = 1373 (0x55d), region = 60 }
  0x13   : > { %v11161_v0 = vld [vmem:[%s15948_s2] sm:$0xff]   ;;  %v15957_v1 = vlaneseq  ;;  %v11671_v2 = vmov 0.0   ;;  %p353_p10 = scmp.lt.s32.totalorder %s11759_s17, 1  ;;  %vm11672_vm0 = vmmov 0   ;;  %v11673_v3 = vmov 1966171168  }
  0x14   : > { %10656 = vmatprep.subr.bf16.mxu0 %v11671_v2  ;;  %11106 = vmatprep.subr.bf16.mxu1 %v11671_v2  ;;  %v476_v4 = vunpack.c.l.s4 %v11673_v3  ;;  %v4124_v6 = vld [vmem:[%s15946_s0] sm:$0xff]  ;;  %v4127_v7 = vld [vmem:[%s15946_s0 + $0x18] sm:$0xff]  ;;  %v11674_v9 = vmov 0   ;;  %v4125_v11 = vld [vmem:[%s15946_s0 + $0x8] sm:$0xff]  ;;  %vm2586_vm1 = vcmask 130048   ;;  %vm7056_vm3 = vcmask 261120  }
  0x15   : > { %10657 = vmatpush3.bf16.msra.mxu0 %v11161_v0  ;;  %10658 = vmatprep.mubr.msk.bf16.mxu0 %vm11672_vm0, %v11671_v2  ;;  %v11795_v5 = vshrl.u32 %v15957_v1, 7  ;;  %s354_s11 = scalar_select %p353_p10, %s11759_s17, 1  ;;  %v4128_v12 = vld [vmem:[%s15946_s0 + $0x20] sm:$0xff]  ;;  %v4126_v20 = vld [vmem:[%s15946_s0 + $0x10] sm:$0x3]  ;;  %v4131_v43 = vld [vmem:[%s15946_s0 + $0x38] sm:$0xff] }
  0x16   : > { %11107 = vmatpush3.bf16.msra.mxu1 %v11161_v0  ;;  %10734 = vmatprep.mubr.msk.bf16.mxu1 %vm11672_vm0, %v11671_v2  ;;  %v477_v8 = vunpack.c.0.s8 %v476_v4  ;;  %v4129_v23 = vld [vmem:[%s15946_s0 + $0x28] sm:$0x3]  ;;  %v4130_v37 = vld [vmem:[%s15946_s0 + $0x30] sm:$0xff]  ;;  %vm6846_vm2 = vsmask.f32 7424  ;;  %vm7503_vm4 = vcmask 1046528  }
  0x17   : > { %11159 = vset.pattern.permute.xlu0 %v11674_v9  ;;  %11160 = vset.pattern.permute.xlu1 %v11674_v9  ;;  %s11108_s12 = smul.u32 216, %s354_s11  ;;  %v4133_v58 = vld [vmem:[%s15946_s0 + $0x48] sm:$0xff]  ;;  %v4134_v0 = vld [vmem:[%s15946_s0 + $0x50] sm:$0xff]  ;;  %vm9477_vm5 = vcmask 523264   ;;  %s350_s26 = sand.u32 1, %s11661_s14  }
  0x18   : > { %4180 = vperm.xlu0 %11159, %v4124_v6   ;;  %4192 = vperm.xlu1 %11160, %v4127_v7   ;;  %v11807_v10 = vsub.s32 %v477_v8, %v11795_v5  ;;  %s10026_s27 = sshll.u32 %s350_s26, 8  ;;  %s10451_s29 = sshll.u32 %s11759_s17, 12 }
  0x19   : > { %s11818_s28 = scalar_lea.vmem %s15947_s1, %s11108_s12  ;;  %s15895_s18 = scalar_lea.hbm %s15956_s10, %s10451_s29 }
  0x1a   : > { %v10028_v13 = vld.sshfl [vmem:[%s11818_s28] sm:$0x33 pattern:$0x75316420]  ;;  %s15906_s17 = scalar_lea.sflag [#allocation3], %s350_s26  ;;  %s11680_s21 = smov [#allocation2]  }
  0x1b   : > { %v10029_v14 = vld.sshfl [vmem:[%s11818_s28 + $0x4] sm:$0x33 pattern:$0x75316420]  ;;  %v474_v15 = vcombine.high %v10028_v13, %v10028_v13  ;;  %v481_v16 = vrot.slane %v10028_v13, %v11807_v10  ;;  %s11613_s25 = sshll.u32 %s11680_s21, 4  ;;  %s11614_s25 = int_to_ptr.vmem [resolvable:$false] %s11613_s25 }
  0x1c   : > { %4184 = vperm.xlu0 %11159, %v4125_v11   ;;  %4196 = vperm.xlu1 %11160, %v4128_v12   ;;  %v498_v17 = vcombine.high %v10029_v14, %v10029_v14  ;;  %v505_v18 = vrot.slane %v10029_v14, %v11807_v10  ;;  %v10030_v19 = vld.sshfl [vmem:[%s11818_s28 + $0x8] sm:$0x1 pattern:$0x75316420] }
  0x1d   : > { %v488_v21 = vrot.slane %v474_v15, %v11807_v10  ;;  %v10031_v22 = vld.sshfl [vmem:[%s11818_s28 + $0xc] sm:$0x33 pattern:$0x75316420]  ;;  %v528_v26 = vrot.slane %v10030_v19, %v11807_v10 }
  0x1e   : > { %v512_v24 = vrot.slane %v498_v17, %v11807_v10  ;;  %v10032_v25 = vld.sshfl [vmem:[%s11818_s28 + $0x10] sm:$0x33 pattern:$0x75316420]  ;;  %v536_v27 = vcombine.high %v10031_v22, %v10031_v22  ;;  %v543_v28 = vrot.slane %v10031_v22, %v11807_v10 }
  0x1f   : > { %v1585_v29 = vcombine.low %v481_v16, %v488_v21  ;;  %v10082_v30 = vcombine.high %v481_v16, %v488_v21  ;;  %v560_v31 = vcombine.high %v10032_v25, %v10032_v25  ;;  %v567_v32 = vrot.slane %v10032_v25, %v11807_v10  ;;  %v10033_v42 = vld.sshfl [vmem:[%s11818_s28 + $0x14] sm:$0x1 pattern:$0x75316420] }
  0x20   : > { %4188 = vperm.xlu0 %11159, %v4126_v20   ;;  %v1587_v33 = vcombine.low %v505_v18, %v512_v24  ;;  %v10083_v34 = vcombine.high %v505_v18, %v512_v24  ;;  %v550_v35 = vrot.slane %v536_v27, %v11807_v10  ;;  %v551_v36 = vcombine.high %v543_v28, %v543_v28  ;;  %v10034_v48 = vld.sshfl [vmem:[%s11818_s28 + $0x18] sm:$0x33 pattern:$0x75316420] }
  0x21   : > { %4200 = vperm.xlu1 %11160, %v4129_v23   ;;  %v1595_v38 = vrot.slane %v1585_v29, %v11807_v10  ;;  %v1602_v39 = vrot.slane %v10082_v30, %v11807_v10  ;;  %v574_v40 = vrot.slane %v560_v31, %v11807_v10  ;;  %v575_v41 = vcombine.high %v567_v32, %v567_v32  ;;  %v10035_v52 = vld.sshfl [vmem:[%s11818_s28 + $0x1c] sm:$0x33 pattern:$0x75316420]  ;;  %v4132_v23 = vld [vmem:[%s15946_s0 + $0x40] sm:$0x3] }
  0x22   : > { %v1609_v44 = vrot.slane %v1587_v33, %v11807_v10  ;;  %v1616_v45 = vrot.slane %v10083_v34, %v11807_v10  ;;  %v552_v46 = vcombine.high %v550_v35, %v550_v35  ;;  %v1634_v47 = vcombine.low %v528_v26, %v543_v28  ;;  %v10036_v63 = vld.sshfl [vmem:[%s11818_s28 + $0x20] sm:$0x1 pattern:$0x75316420]  ;;  %v4135_v28 = vld [vmem:[%s15946_s0 + $0x58] sm:$0x3] }
  0x23   : > { %v1617_v49 = vcombine.low %v1595_v38, %v1602_v39  ;;  %v1635_v50 = vcombine.low %v550_v35, %v551_v36  ;;  %v1637_v51 = vcombine.low %v574_v40, %v575_v41  ;;  %v576_v53 = vcombine.high %v574_v40, %v574_v40  ;;  %v10037_v13 = vld.sshfl [vmem:[%s11818_s28 + $0x24] sm:$0x33 pattern:$0x75316420] }
  0x24   : > { %4204 = vperm.xlu0 %11159, %v4130_v37   ;;  %v1618_v54 = vcombine.low %v1609_v44, %v1616_v45  ;;  %v1636_v55 = vcombine.low %v552_v46, %v567_v32  ;;  %v1644_v56 = vrot.slane %v1634_v47, %v11807_v10  ;;  %v590_v57 = vrot.slane %v10033_v42, %v11807_v10  ;;  %v10038_v17 = vld.sshfl [vmem:[%s11818_s28 + $0x28] sm:$0x33 pattern:$0x75316420]  ;;  %v4136_v38 = vld [vmem:[%s15946_s0 + $0x60] sm:$0xff] }
  0x25   : > { %4208 = vperm.xlu1 %11160, %v4131_v43   ;;  %v1625_v59 = vrot.slane %v1617_v49, %v11807_v10  ;;  %v1651_v60 = vrot.slane %v1635_v50, %v11807_v10  ;;  %v1665_v61 = vrot.slane %v1637_v51, %v11807_v10  ;;  %v598_v62 = vcombine.high %v10034_v48, %v10034_v48  ;;  %v10039_v37 = vld.sshfl [vmem:[%s11818_s28 + $0x2c] sm:$0x1 pattern:$0x75316420] }
  0x26   : > { %v1632_v3 = vrot.slane %v1618_v54, %v11807_v10  ;;  %v1658_v4 = vrot.slane %v1636_v55, %v11807_v10  ;;  %v605_v6 = vrot.slane %v10034_v48, %v11807_v10  ;;  %v622_v7 = vcombine.high %v10035_v52, %v10035_v52  ;;  %v10040_v42 = vld.sshfl [vmem:[%s11818_s28 + $0x30] sm:$0x33 pattern:$0x75316420]  ;;  %v4137_v48 = vld [vmem:[%s15946_s0 + $0x68] sm:$0xff] }
  0x27   : > { %v1666_v8 = vcombine.low %v1644_v56, %v1651_v60  ;;  %v612_v9 = vrot.slane %v598_v62, %v11807_v10  ;;  %v629_v11 = vrot.slane %v10035_v52, %v11807_v10  ;;  %v1683_v12 = vcombine.low %v576_v53, %v590_v57  ;;  %v10041_v53 = vld.sshfl [vmem:[%s11818_s28 + $0x34] sm:$0x33 pattern:$0x75316420]  ;;  %v4139_v62 = vld [vmem:[%s15946_s0 + $0x78] sm:$0xff] }
  0x28   : > { %4216 = vperm.xlu0 %11159, %v4133_v58   ;;  %v1633_v14 = vcombine.low %v1625_v59, %v1632_v3  ;;  %v1667_v15 = vcombine.low %v1658_v4, %v1665_v61  ;;  %v636_v16 = vrot.slane %v622_v7, %v11807_v10  ;;  %v652_v18 = vrot.slane %v10036_v63, %v11807_v10  ;;  %v10043_v3 = vld.sshfl [vmem:[%s11818_s28 + $0x3c] sm:$0x33 pattern:$0x75316420] }
  0x29   : > { %4220 = vperm.xlu1 %11160, %v4134_v0   ;;  %v1674_v19 = vrot.slane %v1666_v8, %v11807_v10  ;;  %v1684_v20 = vcombine.low %v605_v6, %v612_v9  ;;  %v10084_v21 = vcombine.high %v605_v6, %v612_v9  ;;  %v1693_v22 = vrot.slane %v1683_v12, %v11807_v10  ;;  %v4140_v6 = vld [vmem:[%s15946_s0 + $0x80] sm:$0xff] }
  0x2a   : > { %10659 = vmatmul.mubr.msk.bf16.vlgmr.msra.gmra.mxu0 %vm2586_vm1, %v1633_v14  ;;  %v1681_v24 = vrot.slane %v1667_v15, %v11807_v10  ;;  %v1686_v25 = vcombine.low %v629_v11, %v636_v16  ;;  %v660_v26 = vcombine.high %v10037_v13, %v10037_v13  ;;  %v667_v27 = vrot.slane %v10037_v13, %v11807_v10 }
  0x2b   : > { %10662 = vmatprep.mubr.msk.bf16.mxu0 %vm11672_vm0, %v11671_v2  ;;  %v1700_v29 = vrot.slane %v1684_v20, %v11807_v10  ;;  %v1707_v30 = vrot.slane %v10084_v21, %v11807_v10  ;;  %v691_v31 = vrot.slane %v10038_v17, %v11807_v10  ;;  %v10085_v32 = vcombine.high %v629_v11, %v636_v16  ;;  %v10042_v11 = vld.sshfl [vmem:[%s11818_s28 + $0x38] sm:$0x1 pattern:$0x75316420]  ;;  %v4138_v21 = vld [vmem:[%s15946_s0 + $0x70] sm:$0x3] }
  0x2c   : > { %v1682_v33 = vcombine.low %v1674_v19, %v1681_v24  ;;  %v1714_v34 = vrot.slane %v1686_v25, %v11807_v10  ;;  %v674_v35 = vrot.slane %v660_v26, %v11807_v10  ;;  %v675_v36 = vcombine.high %v667_v27, %v667_v27  ;;  %4212 = vperm.xlu0 %11159, %v4132_v23  }
  0x2d   : > { %v1715_v39 = vcombine.low %v1693_v22, %v1700_v29  ;;  %v1733_v40 = vcombine.low %v652_v18, %v667_v27  ;;  %v1742_v41 = vrot.slane %v10085_v32, %v11807_v10  ;;  %v684_v43 = vcombine.high %v10038_v17, %v10038_v17  ;;  %4224 = vperm.xlu1 %11160, %v4135_v28   ;;  %v4141_v22 = vld [vmem:[%s15946_s0 + $0x88] sm:$0x3] }
  0x2e   : > { %v1716_v44 = vcombine.low %v1707_v30, %v1714_v34  ;;  %v676_v45 = vcombine.high %v674_v35, %v674_v35  ;;  %v1734_v46 = vcombine.low %v674_v35, %v675_v36  ;;  %v699_v47 = vcombine.high %v691_v31, %v691_v31  ;;  %v10078_v27 = vld.sshfl [vmem:[%s11818_s28 + $0xc8] sm:$0x1 pattern:$0x75316420] }
  0x2f   : > { %v1723_v49 = vrot.slane %v1715_v39, %v11807_v10  ;;  %v1749_v50 = vrot.slane %v1733_v40, %v11807_v10  ;;  %v698_v51 = vrot.slane %v684_v43, %v11807_v10  ;;  %v714_v52 = vrot.slane %v10039_v37, %v11807_v10  ;;  %v10079_v30 = vld.sshfl [vmem:[%s11818_s28 + $0xcc] sm:$0x33 pattern:$0x75316420]  ;;  %v4142_v37 = vld [vmem:[%s15946_s0 + $0x90] sm:$0xff] }
  0x30   : > { %v1730_v54 = vrot.slane %v1716_v44, %v11807_v10  ;;  %v1735_v55 = vcombine.low %v676_v45, %v691_v31  ;;  %v1756_v56 = vrot.slane %v1734_v46, %v11807_v10  ;;  %v722_v57 = vcombine.high %v10040_v42, %v10040_v42  ;;  %4228 = vperm.xlu0 %11159, %v4136_v38  }
  0x31   : > { %v1764_v58 = vcombine.low %v1742_v41, %v1749_v50  ;;  %v700_v59 = vcombine.high %v698_v51, %v698_v51  ;;  %v729_v60 = vrot.slane %v10040_v42, %v11807_v10  ;;  %v1781_v61 = vcombine.low %v698_v51, %v699_v47  ;;  %4232 = vperm.xlu1 %11160, %v4137_v48   ;;  %v4143_v42 = vld [vmem:[%s15946_s0 + $0x98] sm:$0xff]  ;;  %v10044_v51 = vld.sshfl [vmem:[%s11818_s28 + $0x40] sm:$0x33 pattern:$0x75316420] }
  0x32   : > { %10663 = vmatmul.mubr.msk.bf16.gmra.mxu0 %vm2586_vm1, %v1682_v33  ;;  %v1763_v63 = vrot.slane %v1735_v55, %v11807_v10  ;;  %v736_v0 = vrot.slane %v722_v57, %v11807_v10  ;;  %v746_v4 = vcombine.high %v10041_v53, %v10041_v53  ;;  %v1731_v7 = vcombine.low %v1723_v49, %v1730_v54  ;;  %v10080_v33 = vld.sshfl [vmem:[%s11818_s28 + $0xd0] sm:$0x33 pattern:$0x75316420]  ;;  %v4145_v57 = vld [vmem:[%s15946_s0 + $0xa8] sm:$0xff] }
  0x33   : > { %10666 = vmatprep.mubr.msk.bf16.mxu0 %vm11672_vm0, %v11671_v2  ;;  %v1782_v8 = vcombine.low %v700_v59, %v714_v52  ;;  %v1791_v9 = vrot.slane %v1781_v61, %v11807_v10  ;;  %v753_v12 = vrot.slane %v10041_v53, %v11807_v10  ;;  %v1772_v17 = vrot.slane %v1764_v58, %v11807_v10 }
  0x34   : > { %v1765_v13 = vcombine.low %v1756_v56, %v1763_v63  ;;  %v1783_v14 = vcombine.low %v729_v60, %v736_v0  ;;  %v10086_v15 = vcombine.high %v729_v60, %v736_v0  ;;  %v760_v16 = vrot.slane %v746_v4, %v11807_v10  ;;  %4240 = vperm.xlu0 %11159, %v4139_v62   ;;  %v10046_v56 = vld.sshfl [vmem:[%s11818_s28 + $0x48] sm:$0x33 pattern:$0x75316420]  ;;  %v4146_v63 = vld [vmem:[%s15946_s0 + $0xb0] sm:$0xff] }
  0x35   : > { %v1798_v18 = vrot.slane %v1782_v8, %v11807_v10  ;;  %v784_v19 = vcombine.high %v10043_v3, %v10043_v3  ;;  %v791_v20 = vrot.slane %v10043_v3, %v11807_v10  ;;  %4244 = vperm.xlu1 %11160, %v4140_v6   ;;  %v776_v26 = vrot.slane %v10042_v11, %v11807_v10  ;;  %v10045_v62 = vld.sshfl [vmem:[%s11818_s28 + $0x44] sm:$0x1 pattern:$0x75316420] }
  0x36   : > { %v1779_v23 = vrot.slane %v1765_v13, %v11807_v10  ;;  %v1805_v24 = vrot.slane %v1783_v14, %v11807_v10  ;;  %v1812_v25 = vrot.slane %v10086_v15, %v11807_v10  ;;  %v1830_v29 = vcombine.low %v753_v12, %v760_v16  ;;  %v4147_v13 = vld [vmem:[%s15946_s0 + $0xb8] sm:$0x3] }
  0x37   : > { %v11939_v28 = vcombine.low %v1791_v9, %v1798_v18  ;;  %v11943_v31 = vrot.slane %v784_v19, %v11807_v10  ;;  %v799_v32 = vcombine.high %v791_v20, %v791_v20  ;;  %v10087_v35 = vcombine.high %v753_v12, %v760_v16  ;;  %v4144_v12 = vld [vmem:[%s15946_s0 + $0xa0] sm:$0x3]  ;;  %v10081_v18 = vld.sshfl [vmem:[%s11818_s28 + $0xd4] sm:$0x1 pattern:$0x75316420] }
  0x38   : > { %4236 = vperm.xlu0 %11159, %v4138_v21   ;;  %v1814_v34 = vcombine.low %v1805_v24, %v1812_v25  ;;  %v1520_v36 = vrot.slane %v10078_v27, %v11807_v10  ;;  %v1780_v38 = vcombine.low %v1772_v17, %v1779_v23  ;;  %v11951_v39 = vcombine.low %v776_v26, %v791_v20  ;;  %v10047_v23 = vld.sshfl [vmem:[%s11818_s28 + $0x4c] sm:$0x33 pattern:$0x75316420] }
  0x39   : > { %4248 = vperm.xlu1 %11160, %v4141_v22   ;;  %v1528_v40 = vcombine.high %v10079_v30, %v10079_v30  ;;  %v1535_v41 = vrot.slane %v10079_v30, %v11807_v10  ;;  %v1821_v43 = vrot.slane %v11939_v28, %v11807_v10  ;;  %v11962_v44 = vrot.slane %v1830_v29, %v11807_v10  ;;  %v4151_v28 = vld [vmem:[%s15946_s0 + $0xd8] sm:$0xff] }
  0x3a   : > { %10667 = vmatmul.mubr.msk.bf16.gmra.mxu0 %vm2586_vm1, %v1731_v7  ;;  %v1552_v45 = vcombine.high %v10080_v33, %v10080_v33  ;;  %v1559_v46 = vrot.slane %v10080_v33, %v11807_v10  ;;  %v1833_v47 = vcombine.low %v11943_v31, %v799_v32  ;;  %v1828_v52 = vrot.slane %v1814_v34, %v11807_v10  ;;  %v4148_v33 = vld [vmem:[%s15946_s0 + $0xc0] sm:$0xff]  ;;  %v4149_v34 = vld [vmem:[%s15946_s0 + $0xc8] sm:$0xff] }
  0x3b   : > { %10670 = vmatprep.mubr.msk.bf16.mxu0 %vm11672_vm0, %v11671_v2  ;;  %v1542_v48 = vrot.slane %v1528_v40, %v11807_v10  ;;  %v1543_v49 = vcombine.high %v1535_v41, %v1535_v41  ;;  %v2516_v50 = vcombine.low %v1520_v36, %v1535_v41  ;;  %v11970_v53 = vrot.slane %v10087_v35, %v11807_v10 }
  0x3c   : > { %4252 = vperm.xlu0 %11159, %v4142_v37   ;;  %v1566_v54 = vrot.slane %v1552_v45, %v11807_v10  ;;  %v1567_v55 = vcombine.high %v1559_v46, %v1559_v46  ;;  %v1854_v58 = vrot.slane %v11951_v39, %v11807_v10  ;;  %v800_v3 = vcombine.high %v11943_v31, %v11943_v31  ;;  %v10049_v45 = vld.sshfl [vmem:[%s11818_s28 + $0x54] sm:$0x33 pattern:$0x75316420] }
  0x3d   : > { %4256 = vperm.xlu1 %11160, %v4143_v42   ;;  %v1544_v59 = vcombine.high %v1542_v48, %v1542_v48  ;;  %v2517_v60 = vcombine.low %v1542_v48, %v1543_v49  ;;  %v2526_v61 = vrot.slane %v2516_v50, %v11807_v10  ;;  %v808_v4 = vcombine.high %v10044_v51, %v10044_v51 }
  0x3e   : > { %v2519_v0 = vcombine.low %v1566_v54, %v1567_v55  ;;  %v815_v6 = vrot.slane %v10044_v51, %v11807_v10  ;;  %v1861_v7 = vrot.slane %v1833_v47, %v11807_v10  ;;  %v846_v11 = vcombine.high %v10046_v56, %v10046_v56  ;;  %v10050_v55 = vld.sshfl [vmem:[%s11818_s28 + $0x58] sm:$0x33 pattern:$0x75316420] }
  0x3f   : > { %v2518_v8 = vcombine.low %v1544_v59, %v1559_v46  ;;  %v2533_v9 = vrot.slane %v2517_v60, %v11807_v10  ;;  %v822_v15 = vrot.slane %v808_v4, %v11807_v10  ;;  %v838_v17 = vrot.slane %v10045_v62, %v11807_v10 }
  0x40   : > { %4264 = vperm.xlu0 %11159, %v4145_v57   ;;  %v2547_v14 = vrot.slane %v2519_v0, %v11807_v10  ;;  %v823_v16 = vcombine.high %v815_v6, %v815_v6  ;;  %v12002_v21 = vrot.slane %v10046_v56, %v11807_v10  ;;  %v12005_v22 = vrot.slane %v846_v11, %v11807_v10  ;;  %v4152_v57 = vld [vmem:[%s15946_s0 + $0xe0] sm:$0xff] }
  0x41   : > { %4268 = vperm.xlu1 %11160, %v4146_v63   ;;  %v2540_v19 = vrot.slane %v2518_v8, %v11807_v10  ;;  %v2548_v20 = vcombine.low %v2526_v61, %v2533_v9  ;;  %v824_v24 = vcombine.high %v822_v15, %v822_v15  ;;  %v1879_v25 = vcombine.low %v800_v3, %v815_v6  ;;  %v4150_v6 = vld [vmem:[%s15946_s0 + $0xd0] sm:$0x3]  ;;  %v10051_v9 = vld.sshfl [vmem:[%s11818_s28 + $0x5c] sm:$0x1 pattern:$0x75316420] }
  0x42   : > { %10671 = vmatmul.mubr.msk.bf16.gmra.mxu0 %vm2586_vm1, %v1780_v38  ;;  %v1880_v26 = vcombine.low %v822_v15, %v823_v16  ;;  %v1568_v27 = vcombine.high %v1566_v54, %v1566_v54  ;;  %v1882_v31 = vcombine.low %v12002_v21, %v12005_v22  ;;  %v1582_v32 = vrot.slane %v10081_v18, %v11807_v10  ;;  %v10048_v38 = vld.sshfl [vmem:[%s11818_s28 + $0x50] sm:$0x1 pattern:$0x75316420] }
  0x43   : > { %10674 = vmatprep.mubr.msk.bf16.mxu0 %vm11672_vm0, %v11671_v2  ;;  %v2549_v29 = vcombine.low %v2540_v19, %v2547_v14  ;;  %v2556_v30 = vrot.slane %v2548_v20, %v11807_v10  ;;  %v1862_v35 = vcombine.low %v11962_v44, %v11970_v53  ;;  %v1863_v36 = vcombine.low %v1854_v58, %v1861_v7  ;;  %v4153_v7 = vld [vmem:[%s15946_s0 + $0xe8] sm:$0x3]  ;;  %v10052_v14 = vld.sshfl [vmem:[%s11818_s28 + $0x60] sm:$0x33 pattern:$0x75316420] }
  0x44   : > { %4260 = vperm.xlu0 %11159, %v4144_v12   ;;  %v1881_v37 = vcombine.low %v824_v24, %v838_v17  ;;  %v870_v39 = vcombine.high %v10047_v23, %v10047_v23  ;;  %v1829_v40 = vcombine.low %v1821_v43, %v1828_v52  ;;  %v2565_v42 = vcombine.low %v1568_v27, %v1582_v32  ;;  %v4154_v15 = vld [vmem:[%s15946_s0 + $0xf0] sm:$0xff]  ;;  %v10053_v20 = vld.sshfl [vmem:[%s11818_s28 + $0x64] sm:$0x33 pattern:$0x75316420] }
  0x45   : > { %4272 = vperm.xlu1 %11160, %v4147_v13   ;;  %v2563_v41 = vrot.slane %v2549_v29, %v11807_v10  ;;  %v1889_v46 = vrot.slane %v1879_v25, %v11807_v10  ;;  %v1896_v47 = vrot.slane %v1880_v26, %v11807_v10  ;;  %v1910_v44 = vrot.slane %v1882_v31, %v11807_v10 }
  0x46   : > { %v1903_v49 = vrot.slane %v1881_v37, %v11807_v10  ;;  %v877_v50 = vrot.slane %v10047_v23, %v11807_v10  ;;  %v884_v51 = vrot.slane %v870_v39, %v11807_v10  ;;  %v1870_v43 = vrot.slane %v1862_v35, %v11807_v10  ;;  %v4157_v35 = vld [vmem:[%s15946_s0 + $0x108] sm:$0xff] }
  0x47   : > { %v2564_v48 = vcombine.low %v2556_v30, %v2563_v41  ;;  %v1877_v52 = vrot.slane %v1863_v36, %v11807_v10  ;;  %v900_v53 = vrot.slane %v10048_v38, %v11807_v10  ;;  %v915_v54 = vrot.slane %v10049_v45, %v11807_v10  ;;  %v4158_v41 = vld [vmem:[%s15946_s0 + $0x110] sm:$0xff] }
  0x48   : > { %4276 = vperm.xlu0 %11159, %v4148_v33   ;;  %v2572_v56 = vrot.slane %v2565_v42, %v11807_v10  ;;  %v1911_v58 = vcombine.low %v1889_v46, %v1896_v47  ;;  %v10088_v59 = vcombine.high %v12002_v21, %v12005_v22  ;;  %v1912_v60 = vcombine.low %v1903_v49, %v1910_v44  ;;  %v4155_v21 = vld [vmem:[%s15946_s0 + $0xf8] sm:$0xff] }
  0x49   : > { %4280 = vperm.xlu1 %11160, %v4149_v34   ;;  %10735 = vmatmul.mubr.msk.bf16.vlgmr.msra.gmra.mxu1 %vm2586_vm1, %v2564_v48  ;;  %v1929_v61 = vcombine.low %v877_v50, %v884_v51  ;;  %v908_v62 = vcombine.high %v10049_v45, %v10049_v45  ;;  %v932_v63 = vcombine.high %v10050_v55, %v10050_v55 }
  0x4a   : > { %10675 = vmatmul.mubr.msk.bf16.gmra.mxu0 %vm2586_vm1, %v1829_v40  ;;  %10738 = vmatprep.mubr.msk.bf16.mxu1 %vm11672_vm0, %v11671_v2  ;;  %v1878_v0 = vcombine.low %v1870_v43, %v1877_v52  ;;  %v10089_v3 = vcombine.high %v877_v50, %v884_v51  ;;  %v1931_v4 = vcombine.low %v900_v53, %v915_v54  ;;  %v10055_v40 = vld.sshfl [vmem:[%s11818_s28 + $0x6c] sm:$0x33 pattern:$0x75316420]  ;;  %v4156_v50 = vld [vmem:[%s15946_s0 + $0x100] sm:$0x3] }
  0x4b   : > { %10678 = vmatprep.mubr.msk.bf16.mxu0 %vm11672_vm0, %v11671_v2  ;;  %v2579_v8 = vrot.slane %v2572_v56, %v11807_v10  ;;  %v922_v11 = vrot.slane %v908_v62, %v11807_v10  ;;  %v939_v12 = vrot.slane %v10050_v55, %v11807_v10  ;;  %v946_v13 = vrot.slane %v932_v63, %v11807_v10  ;;  %v10056_v53 = vld.sshfl [vmem:[%s11818_s28 + $0x70] sm:$0x33 pattern:$0x75316420]  ;;  %v4160_v63 = vld [vmem:[%s15946_s0 + $0x120] sm:$0xff] }
  0x4c   : > { %4288 = vperm.xlu0 %11159, %v4151_v28   ;;  %v1919_v16 = vrot.slane %v1911_v58, %v11807_v10  ;;  %v1926_v17 = vrot.slane %v1912_v60, %v11807_v10  ;;  %v1938_v18 = vrot.slane %v10088_v59, %v11807_v10  ;;  %v1945_v19 = vrot.slane %v1929_v61, %v11807_v10  ;;  %v10054_v59 = vld.sshfl [vmem:[%s11818_s28 + $0x68] sm:$0x1 pattern:$0x75316420] }
  0x4d   : > { %4292 = vperm.xlu1 %11160, %v4152_v57   ;;  %v1952_v22 = vrot.slane %v10089_v3, %v11807_v10  ;;  %v1959_v23 = vrot.slane %v1931_v4, %v11807_v10  ;;  %v923_v24 = vcombine.high %v915_v54, %v915_v54  ;;  %v962_v25 = vrot.slane %v10051_v9, %v11807_v10  ;;  %v4159_v54 = vld [vmem:[%s15946_s0 + $0x118] sm:$0x3] }
  0x4e   : > { %v924_v26 = vcombine.high %v922_v11, %v922_v11  ;;  %v947_v27 = vcombine.high %v939_v12, %v939_v12  ;;  %v948_v29 = vcombine.high %v946_v13, %v946_v13  ;;  %v970_v30 = vcombine.high %v10052_v14, %v10052_v14 }
  0x4f   : > { %v1960_v31 = vcombine.low %v1938_v18, %v1945_v19  ;;  %v1927_v32 = vcombine.low %v1919_v16, %v1926_v17  ;;  %v1961_v33 = vcombine.low %v1952_v22, %v1959_v23  ;;  %v994_v34 = vcombine.high %v10053_v20, %v10053_v20  ;;  %v4163_v16 = vld [vmem:[%s15946_s0 + $0x138] sm:$0xff]  ;;  %v4164_v22 = vld [vmem:[%s15946_s0 + $0x140] sm:$0xff] }
  0x50   : > { %4284 = vperm.xlu0 %11159, %v4150_v6   ;;  %v1977_v36 = vcombine.low %v922_v11, %v923_v24  ;;  %v1978_v37 = vcombine.low %v924_v26, %v939_v12  ;;  %v1979_v38 = vcombine.low %v946_v13, %v947_v27  ;;  %v1980_v39 = vcombine.low %v948_v29, %v962_v25  ;;  %v10059_v24 = vld.sshfl [vmem:[%s11818_s28 + $0x7c] sm:$0x33 pattern:$0x75316420] }
  0x51   : > { %4296 = vperm.xlu1 %11160, %v4153_v7   ;;  %10739 = vmatmul.mubr.msk.bf16.gmra.mxu1 %vm2586_vm1, %v2579_v8  ;;  %v977_v42 = vrot.slane %v10052_v14, %v11807_v10  ;;  %v984_v45 = vrot.slane %v970_v30, %v11807_v10  ;;  %v1968_v46 = vrot.slane %v1960_v31, %v11807_v10  ;;  %v4161_v7 = vld [vmem:[%s15946_s0 + $0x128] sm:$0xff]  ;;  %v10057_v30 = vld.sshfl [vmem:[%s11818_s28 + $0x74] sm:$0x1 pattern:$0x75316420] }
  0x52   : > { %10679 = vmatmul.mubr.msk.bf16.gmra.mxu0 %vm2586_vm1, %v1878_v0  ;;  %v1975_v47 = vrot.slane %v1961_v33, %v11807_v10  ;;  %v1001_v44 = vrot.slane %v10053_v20, %v11807_v10  ;;  %v1008_v48 = vrot.slane %v994_v34, %v11807_v10  ;;  %v1032_v49 = vcombine.high %v10055_v40, %v10055_v40 }
  0x53   : > { %10682 = vmatprep.mubr.msk.bf16.mxu0 %vm11672_vm0, %v11671_v2  ;;  %v1987_v51 = vrot.slane %v1977_v36, %v11807_v10  ;;  %v1994_v28 = vrot.slane %v1978_v37, %v11807_v10  ;;  %v2001_v43 = vrot.slane %v1979_v38, %v11807_v10  ;;  %v2008_v52 = vrot.slane %v1980_v39, %v11807_v10  ;;  %v4165_v36 = vld [vmem:[%s15946_s0 + $0x148] sm:$0x3]  ;;  %v10061_v38 = vld.sshfl [vmem:[%s11818_s28 + $0x84] sm:$0x33 pattern:$0x75316420] }
  0x54   : > { %4300 = vperm.xlu0 %11159, %v4154_v15   ;;  %v2026_v55 = vcombine.low %v977_v42, %v984_v45  ;;  %v10090_v56 = vcombine.high %v977_v42, %v984_v45  ;;  %v1039_v57 = vrot.slane %v10055_v40, %v11807_v10  ;;  %v1976_v58 = vcombine.low %v1968_v46, %v1975_v47 }
  0x55   : > { %4304 = vperm.xlu1 %11160, %v4155_v21   ;;  %v1046_v60 = vrot.slane %v1032_v49, %v11807_v10  ;;  %v1056_v61 = vcombine.high %v10056_v53, %v10056_v53  ;;  %v1063_v62 = vrot.slane %v10056_v53, %v11807_v10  ;;  %v2009_v0 = vcombine.low %v1987_v51, %v1994_v28  ;;  %v10058_v21 = vld.sshfl [vmem:[%s11818_s28 + $0x78] sm:$0x33 pattern:$0x75316420] }
  0x56   : > { %v2010_v3 = vcombine.low %v2001_v43, %v2008_v52  ;;  %v2028_v4 = vcombine.low %v1001_v44, %v1008_v48  ;;  %v10091_v6 = vcombine.high %v1001_v44, %v1008_v48  ;;  %v2036_v8 = vrot.slane %v2026_v55, %v11807_v10  ;;  %v4166_v48 = vld [vmem:[%s15946_s0 + $0x150] sm:$0xff]  ;;  %v4167_v43 = vld [vmem:[%s15946_s0 + $0x158] sm:$0xff] }
  0x57   : > { %v2043_v9 = vrot.slane %v10090_v56, %v11807_v10  ;;  %v1024_v11 = vrot.slane %v10054_v59, %v11807_v10  ;;  %v1047_v12 = vcombine.high %v1039_v57, %v1039_v57  ;;  %v1048_v13 = vcombine.high %v1046_v60, %v1046_v60 }
  0x58   : > { %4312 = vperm.xlu0 %11159, %v4157_v35   ;;  %v1070_v14 = vrot.slane %v1056_v61, %v11807_v10  ;;  %v1071_v15 = vcombine.high %v1063_v62, %v1063_v62  ;;  %v2017_v17 = vrot.slane %v2009_v0, %v11807_v10  ;;  %v2024_v18 = vrot.slane %v2010_v3, %v11807_v10  ;;  %v10062_v0 = vld.sshfl [vmem:[%s11818_s28 + $0x88] sm:$0x33 pattern:$0x75316420] }
  0x59   : > { %4316 = vperm.xlu1 %11160, %v4158_v41   ;;  %v2050_v19 = vrot.slane %v2028_v4, %v11807_v10  ;;  %v2057_v20 = vrot.slane %v10091_v6, %v11807_v10  ;;  %v2058_v23 = vcombine.low %v2036_v8, %v2043_v9  ;;  %v2075_v25 = vcombine.low %v1024_v11, %v1039_v57  ;;  %v10060_v57 = vld.sshfl [vmem:[%s11818_s28 + $0x80] sm:$0x1 pattern:$0x75316420] }
  0x5a   : > { %10683 = vmatmul.mubr.msk.bf16.gmra.mxu0 %vm2586_vm1, %v1927_v32  ;;  %v2076_v26 = vcombine.low %v1046_v60, %v1047_v12  ;;  %v2077_v27 = vcombine.low %v1048_v13, %v1063_v62  ;;  %v2078_v29 = vcombine.low %v1070_v14, %v1071_v15  ;;  %v1094_v31 = vcombine.high %v10058_v21, %v10058_v21  ;;  %v4162_v32 = vld [vmem:[%s15946_s0 + $0x130] sm:$0x3]  ;;  %v4168_v12 = vld [vmem:[%s15946_s0 + $0x160] sm:$0x3] }
  0x5b   : > { %10686 = vmatprep.mubr.msk.bf16.mxu0 %vm11672_vm0, %v11671_v2  ;;  %v2025_v33 = vcombine.low %v2017_v17, %v2024_v18  ;;  %v2059_v34 = vcombine.low %v2050_v19, %v2057_v20  ;;  %v1118_v35 = vcombine.high %v10059_v24, %v10059_v24  ;;  %v2066_v37 = vrot.slane %v2058_v23, %v11807_v10  ;;  %v10064_v17 = vld.sshfl [vmem:[%s11818_s28 + $0x90] sm:$0x33 pattern:$0x75316420]  ;;  %v4171_v18 = vld [vmem:[%s15946_s0 + $0x178] sm:$0x3] }
  0x5c   : > { %4308 = vperm.xlu0 %11159, %v4156_v50   ;;  %v2085_v39 = vrot.slane %v2075_v25, %v11807_v10  ;;  %v2092_v40 = vrot.slane %v2076_v26, %v11807_v10  ;;  %v1072_v41 = vcombine.high %v1070_v14, %v1070_v14  ;;  %v1086_v42 = vrot.slane %v10057_v30, %v11807_v10  ;;  %v10063_v23 = vld.sshfl [vmem:[%s11818_s28 + $0x8c] sm:$0x1 pattern:$0x75316420]  ;;  %v4172_v25 = vld [vmem:[%s15946_s0 + $0x180] sm:$0xff] }
  0x5d   : > { %4320 = vperm.xlu1 %11160, %v4159_v54   ;;  %v2099_v45 = vrot.slane %v2077_v27, %v11807_v10  ;;  %v2106_v46 = vrot.slane %v2078_v29, %v11807_v10  ;;  %v1101_v47 = vrot.slane %v10058_v21, %v11807_v10  ;;  %v1108_v44 = vrot.slane %v1094_v31, %v11807_v10  ;;  %v4173_v31 = vld [vmem:[%s15946_s0 + $0x188] sm:$0xff] }
  0x5e   : > { %v2073_v49 = vrot.slane %v2059_v34, %v11807_v10  ;;  %v1125_v50 = vrot.slane %v10059_v24, %v11807_v10  ;;  %v1132_v51 = vrot.slane %v1118_v35, %v11807_v10  ;;  %v1156_v28 = vcombine.high %v10061_v38, %v10061_v38 }
  0x5f   : > { %v2124_v52 = vcombine.low %v1072_v41, %v1086_v42  ;;  %v2107_v53 = vcombine.low %v2085_v39, %v2092_v40  ;;  %v2108_v54 = vcombine.low %v2099_v45, %v2106_v46  ;;  %v2125_v55 = vcombine.low %v1101_v47, %v1108_v44  ;;  %v10065_v39 = vld.sshfl [vmem:[%s11818_s28 + $0x94] sm:$0x33 pattern:$0x75316420]  ;;  %v4174_v40 = vld [vmem:[%s15946_s0 + $0x190] sm:$0x3] }
  0x60   : > { %4324 = vperm.xlu0 %11159, %v4160_v63   ;;  %v10092_v56 = vcombine.high %v1101_v47, %v1108_v44  ;;  %v2074_v59 = vcombine.low %v2066_v37, %v2073_v49  ;;  %v2127_v60 = vcombine.low %v1125_v50, %v1132_v51  ;;  %v1163_v61 = vrot.slane %v10061_v38, %v11807_v10  ;;  %v4170_v63 = vld [vmem:[%s15946_s0 + $0x170] sm:$0xff]  ;;  %v4175_v47 = vld [vmem:[%s15946_s0 + $0x198] sm:$0xff] }
  0x61   : > { %4328 = vperm.xlu1 %11160, %v4161_v7   ;;  %v1170_v62 = vrot.slane %v1156_v28, %v11807_v10  ;;  %v2134_v3 = vrot.slane %v2124_v52, %v11807_v10  ;;  %v1148_v4 = vrot.slane %v10060_v57, %v11807_v10  ;;  %v1180_v6 = vcombine.high %v10062_v0, %v10062_v0  ;;  %v10067_v44 = vld.sshfl [vmem:[%s11818_s28 + $0x9c] sm:$0x33 pattern:$0x75316420]  ;;  %v4176_v52 = vld [vmem:[%s15946_s0 + $0x1a0] sm:$0xff] }
  0x62   : > { %10687 = vmatmul.mubr.msk.bf16.gmra.mxu0 %vm2586_vm1, %v1976_v58  ;;  %v4169_v58 = vld [vmem:[%s15946_s0 + $0x168] sm:$0xff]  ;;  %v2115_v7 = vrot.slane %v2107_v53, %v11807_v10  ;;  %v2122_v8 = vrot.slane %v2108_v54, %v11807_v10  ;;  %v2141_v9 = vrot.slane %v2125_v55, %v11807_v10  ;;  %v2148_v11 = vrot.slane %v10092_v56, %v11807_v10  ;;  %v10066_v55 = vld.sshfl [vmem:[%s11818_s28 + $0x98] sm:$0x1 pattern:$0x75316420] }
  0x63   : > { %10690 = vmatprep.mubr.msk.bf16.mxu0 %vm11672_vm0, %v11671_v2  ;;  %v2155_v13 = vrot.slane %v2127_v60, %v11807_v10  ;;  %v1171_v14 = vcombine.high %v1163_v61, %v1163_v61  ;;  %v1172_v15 = vcombine.high %v1170_v62, %v1170_v62  ;;  %v1194_v19 = vrot.slane %v1180_v6, %v11807_v10 }
  0x64   : > { %4336 = vperm.xlu0 %11159, %v4163_v16   ;;  %v1187_v16 = vrot.slane %v10062_v0, %v11807_v10  ;;  %v2123_v20 = vcombine.low %v2115_v7, %v2122_v8  ;;  %v10093_v21 = vcombine.high %v1125_v50, %v1132_v51  ;;  %v1218_v24 = vcombine.high %v10064_v17, %v10064_v17 }
  0x65   : > { %4340 = vperm.xlu1 %11160, %v4164_v22   ;;  %v2174_v22 = vcombine.low %v1148_v4, %v1163_v61  ;;  %v2156_v26 = vcombine.low %v2134_v3, %v2141_v9  ;;  %v2157_v27 = vcombine.low %v2148_v11, %v2155_v13  ;;  %v2175_v29 = vcombine.low %v1170_v62, %v1171_v14 }
  0x66   : > { %v2176_v30 = vcombine.low %v1172_v15, %v1187_v16  ;;  %v1210_v34 = vrot.slane %v10063_v23, %v11807_v10  ;;  %v2183_v35 = vrot.slane %v10093_v21, %v11807_v10  ;;  %v1225_v37 = vrot.slane %v10064_v17, %v11807_v10  ;;  %v10069_v21 = vld.sshfl [vmem:[%s11818_s28 + $0xa4] sm:$0x1 pattern:$0x75316420] }
  0x67   : > { %v1232_v38 = vrot.slane %v1218_v24, %v11807_v10  ;;  %v2164_v41 = vrot.slane %v2156_v26, %v11807_v10  ;;  %v2171_v42 = vrot.slane %v2157_v27, %v11807_v10  ;;  %v2197_v45 = vrot.slane %v2175_v29, %v11807_v10 }
  0x68   : > { %4332 = vperm.xlu0 %11159, %v4162_v32   ;;  %v1195_v32 = vcombine.high %v1187_v16, %v1187_v16  ;;  %v2204_v46 = vrot.slane %v2176_v30, %v11807_v10  ;;  %v1242_v50 = vcombine.high %v10065_v39, %v10065_v39  ;;  %v1280_v56 = vcombine.high %v10067_v44, %v10067_v44 }
  0x69   : > { %4344 = vperm.xlu1 %11160, %v4165_v36   ;;  %v2190_v36 = vrot.slane %v2174_v22, %v11807_v10  ;;  %v2224_v28 = vcombine.low %v1225_v37, %v1232_v38  ;;  %v2172_v53 = vcombine.low %v2164_v41, %v2171_v42  ;;  %v1287_v57 = vrot.slane %v10067_v44, %v11807_v10  ;;  %v10072_v42 = vld.sshfl [vmem:[%s11818_s28 + $0xb0] sm:$0x1 pattern:$0x75316420] }
  0x6a   : > { %10691 = vmatmul.mubr.msk.bf16.gmra.mxu0 %vm2586_vm1, %v2025_v33  ;;  %v1196_v33 = vcombine.high %v1194_v19, %v1194_v19  ;;  %v2206_v54 = vcombine.low %v2197_v45, %v2204_v46  ;;  %v1249_v62 = vrot.slane %v10065_v39, %v11807_v10  ;;  %v1272_v6 = vrot.slane %v10066_v55, %v11807_v10 }
  0x6b   : > { %10694 = vmatprep.mubr.msk.bf16.mxu0 %vm11672_vm0, %v11671_v2  ;;  %v2205_v51 = vcombine.low %v2183_v35, %v2190_v36  ;;  %v2246_v3 = vrot.slane %v2224_v28, %v11807_v10  ;;  %v1294_v8 = vrot.slane %v1280_v56, %v11807_v10  ;;  %v1295_v9 = vcombine.high %v1287_v57, %v1287_v57 }
  0x6c   : > { %4348 = vperm.xlu0 %11159, %v4166_v48   ;;  %v2222_v48 = vcombine.low %v1194_v19, %v1195_v32  ;;  %v2223_v49 = vcombine.low %v1196_v33, %v1210_v34  ;;  %v2220_v7 = vrot.slane %v2206_v54, %v11807_v10  ;;  %v2273_v17 = vcombine.low %v1272_v6, %v1287_v57  ;;  %v10071_v33 = vld.sshfl [vmem:[%s11818_s28 + $0xac] sm:$0x33 pattern:$0x75316420] }
  0x6d   : > { %4352 = vperm.xlu1 %11160, %v4167_v43   ;;  %v10094_v43 = vcombine.high %v1225_v37, %v1232_v38  ;;  %v2213_v0 = vrot.slane %v2205_v51, %v11807_v10  ;;  %v1296_v27 = vcombine.high %v1294_v8, %v1294_v8  ;;  %v1334_v32 = vrot.slane %v10069_v21, %v11807_v10 }
  0x6e   : > { %v2232_v60 = vrot.slane %v2222_v48, %v11807_v10  ;;  %v2239_v61 = vrot.slane %v2223_v49, %v11807_v10  ;;  %v2295_v30 = vrot.slane %v2273_v17, %v11807_v10  ;;  %v10073_v48 = vld.sshfl [vmem:[%s11818_s28 + $0xb4] sm:$0x33 pattern:$0x75316420]  ;;  %v1373_v28 = vrot.slane %v10071_v33, %v11807_v10 }
  0x6f   : > { %v2253_v4 = vrot.slane %v10094_v43, %v11807_v10  ;;  %v2221_v19 = vcombine.low %v2213_v0, %v2220_v7  ;;  %v10074_v49 = vld.sshfl [vmem:[%s11818_s28 + $0xb8] sm:$0x33 pattern:$0x75316420]  ;;  %v1411_v54 = vrot.slane %v10073_v48, %v11807_v10  ;;  %v1404_v55 = vcombine.high %v10073_v48, %v10073_v48 }
  0x70   : > { %4360 = vperm.xlu0 %11159, %v4169_v58   ;;  %v4177_v58 = vld [vmem:[%s15946_s0 + $0x1a8] sm:$0x3]  ;;  %v2254_v13 = vcombine.low %v2232_v60, %v2239_v61 }
  0x71   : > { %4364 = vperm.xlu1 %11160, %v4170_v63   ;;  %v1256_v63 = vrot.slane %v1242_v50, %v11807_v10  ;;  %v2255_v16 = vcombine.low %v2246_v3, %v2253_v4  ;;  %v1418_v6 = vrot.slane %v1404_v55, %v11807_v10  ;;  %v1419_v17 = vcombine.high %v1411_v54, %v1411_v54 }
  0x72   : > { %10695 = vmatmul.mubr.msk.bf16.gmra.mxu0 %vm2586_vm1, %v2074_v59  ;;  %v10068_v59 = vld.sshfl [vmem:[%s11818_s28 + $0xa0] sm:$0x33 pattern:$0x75316420]  ;;  %v2262_v24 = vrot.slane %v2254_v13, %v11807_v10 }
  0x73   : > { %10698 = vmatprep.mubr.msk.bf16.mxu0 %vm11672_vm0, %v11671_v2  ;;  %v1304_v11 = vcombine.high %v10068_v59, %v10068_v59  ;;  %v2271_v14 = vcombine.low %v1249_v62, %v1256_v63  ;;  %v10095_v15 = vcombine.high %v1249_v62, %v1256_v63  ;;  %v2269_v29 = vrot.slane %v2255_v16, %v11807_v10 }
  0x74   : > { %4356 = vperm.xlu0 %11159, %v4168_v12   ;;  %v10070_v12 = vld.sshfl [vmem:[%s11818_s28 + $0xa8] sm:$0x33 pattern:$0x75316420]  ;;  %v1420_v21 = vcombine.high %v1418_v6, %v1418_v6 }
  0x75   : > { %4368 = vperm.xlu1 %11160, %v4171_v18   ;;  %v1311_v18 = vrot.slane %v10068_v59, %v11807_v10  ;;  %v1318_v22 = vrot.slane %v1304_v11, %v11807_v10  ;;  %v1342_v23 = vcombine.high %v10070_v12, %v10070_v12  ;;  %v2288_v26 = vrot.slane %v10095_v15, %v11807_v10 }
  0x76   : > { %v1349_v36 = vrot.slane %v10070_v12, %v11807_v10  ;;  %v2270_v45 = vcombine.low %v2262_v24, %v2269_v29  ;;  %v1428_v59 = vcombine.high %v10074_v49, %v10074_v49  ;;  %v10077_v29 = vld.sshfl [vmem:[%s11818_s28 + $0xc4] sm:$0x33 pattern:$0x75316420] }
  0x77   : > { %v1320_v35 = vcombine.high %v1318_v22, %v1318_v22  ;;  %v1356_v37 = vrot.slane %v1342_v23, %v11807_v10  ;;  %v2320_v39 = vcombine.low %v1296_v27, %v1311_v18 }
  0x78   : > { %4372 = vperm.xlu0 %11159, %v4172_v25   ;;  %v2281_v25 = vrot.slane %v2271_v14, %v11807_v10  ;;  %v1442_v11 = vrot.slane %v1428_v59, %v11807_v10  ;;  %v10075_v14 = vld.sshfl [vmem:[%s11818_s28 + $0xbc] sm:$0x1 pattern:$0x75316420] }
  0x79   : > { %4376 = vperm.xlu1 %11160, %v4173_v31   ;;  %v1319_v31 = vcombine.high %v1311_v18, %v1311_v18  ;;  %v2323_v44 = vcombine.low %v1349_v36, %v1356_v37  ;;  %v2330_v51 = vrot.slane %v2320_v39, %v11807_v10  ;;  %v10096_v62 = vcombine.high %v1349_v36, %v1356_v37 }
  0x7a   : > { %10699 = vmatmul.mubr.msk.bf16.gmra.mxu0 %vm2586_vm1, %v2123_v20  ;;  %v2274_v20 = vcombine.low %v1294_v8, %v1295_v9  ;;  %v2303_v38 = vcombine.low %v2281_v25, %v2288_v26  ;;  %v1435_v9 = vrot.slane %v10074_v49, %v11807_v10  ;;  %v1444_v24 = vcombine.high %v1442_v11, %v1442_v11  ;;  %v10076_v26 = vld.sshfl [vmem:[%s11818_s28 + $0xc0] sm:$0x33 pattern:$0x75316420]  ;;  %s15711_s28 = scalar_lea.vmem [#allocation2], %s10026_s27  ;;  %s11615_s27 = scalar_lea.vmem %s11614_s25, 8192 }
  0x7b   : > { %10702 = vmatprep.mubr.msk.bf16.mxu0 %vm11672_vm0, %v11671_v2  ;;  %v2321_v41 = vcombine.low %v1318_v22, %v1319_v31  ;;  %v2379_v15 = vrot.slane %v10096_v62, %v11807_v10  ;;  %v1458_v25 = vrot.slane %v10075_v14, %v11807_v10  ;;  %v1490_v39 = vcombine.high %v10077_v29, %v10077_v29  ;;  %s9960_s30 = sshll.u32 %s15711_s28, 4  ;;  %s15897_s30 = int_to_ptr.vmem [resolvable:$true] %s9960_s30 }
  0x7c   : > { %4380 = vperm.xlu0 %11159, %v4174_v40   ;;  %v2302_v34 = vrot.slane %v2274_v20, %v11807_v10  ;;  %v1366_v40 = vcombine.high %v10071_v33, %v10071_v33  ;;  %v2311_v50 = vrot.slane %v2303_v38, %v11807_v10  ;;  %v1443_v23 = vcombine.high %v1435_v9, %v1435_v9  ;;  %s11609_s20 = scalar_lea.vmem %s15897_s30, 4096  ;;  %p11616_p0 = scmp.lt.s32.totalorder %s15897_s30, %s11614_s25 }
  0x7d   : > { %4384 = vperm.xlu1 %11160, %v4175_v47   ;;  %v2322_v47 = vcombine.low %v1320_v35, %v1334_v32  ;;  %v2418_v32 = vcombine.low %v1418_v6, %v1419_v17  ;;  %v1466_v35 = vcombine.high %v10076_v26, %v10076_v26  ;;  %v2421_v38 = vcombine.low %v1444_v24, %v1458_v25  ;;  %p11610_p11 = scmp.ne.s32.totalorder %s15897_s30, %s11609_s20  ;;  %p11617_p1 = scmp.lt.s32.totalorder %s11615_s27, %s11609_s20 }
  0x7e   : > { %v2304_v46 = vcombine.low %v2295_v30, %v2302_v34  ;;  %v1380_v43 = vrot.slane %v1366_v40, %v11807_v10  ;;  %v2419_v34 = vcombine.low %v1420_v21, %v1435_v9  ;;  %v2420_v37 = vcombine.low %v1442_v11, %v1443_v23 }
  0x7f   : > { %v2344_v57 = vrot.slane %v2322_v47, %v11807_v10  ;;  %v1480_v48 = vrot.slane %v1466_v35, %v11807_v10  ;;  %p11611_p12 = pnand %p11610_p11, %p11776_p5  ;;  %p11618_p2 = por %p11617_p1, %p11616_p0 }
  0x80   : > { %4388 = vperm.xlu0 %11159, %v4176_v52   ;;  %v2337_v52 = vrot.slane %v2321_v41, %v11807_v10  ;;  %v2318_v56 = vrot.slane %v2304_v46, %v11807_v10  ;;  %v2370_v63 = vcombine.low %v1373_v28, %v1380_v43  ;;  %v10097_v3 = vcombine.high %v1373_v28, %v1380_v43 }
  0x81   : > { %4392 = vperm.xlu1 %11160, %v4177_v58   ;;  %v2351_v58 = vrot.slane %v2323_v44, %v11807_v10  ;;  %v2435_v47 = vrot.slane %v2419_v34, %v11807_v10  ;;  %v1473_v44 = vrot.slane %v10076_v26, %v11807_v10  ;;  %v2442_v49 = vrot.slane %v2420_v37, %v11807_v10  ;;  %v11162_v37 = vld [vmem:[%s15951_s5 + $0x18] sm:$0xff]   ;;  %p11612_p13 = pneg %p11611_p12 }
  0x82   : > { %10703 = vmatmul.mubr.msk.bf16.gmra.mxu0 %vm2586_vm1, %v2172_v53  ;;  %v1396_v53 = vrot.slane %v10072_v42, %v11807_v10  ;;  %v2352_v0 = vcombine.low %v2330_v51, %v2337_v52  ;;  %v2319_v7 = vcombine.low %v2311_v50, %v2318_v56  ;;  %v2386_v16 = vrot.slane %v2370_v63, %v11807_v10 }
  0x83   : > { %10706 = vmatprep.mubr.msk.bf16.mxu0 %vm11672_vm0, %v11671_v2  ;;  %v2353_v8 = vcombine.low %v2344_v57, %v2351_v58  ;;  %v2449_v50 = vrot.slane %v2421_v38, %v11807_v10  ;;  %v1497_v51 = vrot.slane %v10077_v29, %v11807_v10  ;;  %v1504_v28 = vrot.slane %v1490_v39, %v11807_v10  ;;  %v11163_v39 = vld [vmem:[%s15951_s5 + $0x38] sm:$0xff]   ;;  %p11619_p3 = pnand %p11618_p2, %p11612_p13 }
  0x84   : > { %v2372_v4 = vcombine.low %v1396_v53, %v1411_v54  ;;  %v2360_v18 = vrot.slane %v2352_v0, %v11807_v10  ;;  %v2401_v31 = vcombine.low %v2379_v15, %v2386_v16  ;;  %v2467_v54 = vcombine.low %v1473_v44, %v1480_v48  ;;  %10742 = vmatprep.subr.bf16.mxu1 %v11162_v37 }
  0x85   : > { %v2367_v22 = vrot.slane %v2353_v8, %v11807_v10  ;;  %v10098_v55 = vcombine.high %v1473_v44, %v1480_v48  ;;  %v2451_v57 = vcombine.low %v2442_v49, %v2449_v50  ;;  %v2469_v58 = vcombine.low %v1497_v51, %v1504_v28  ;;  %10743 = vmatpush3.bf16.msra.mxu1 %v11162_v37 }
  0x86   : > { %v2400_v20 = vrot.slane %v2372_v4, %v11807_v10  ;;  %v2409_v42 = vrot.slane %v2401_v31, %v11807_v10  ;;  %v10099_v59 = vcombine.high %v1497_v51, %v1504_v28  ;;  %v2477_v0 = vrot.slane %v2467_v54, %v11807_v10  ;;  %10850 = vmatprep.subr.bf16.mxu0 %v11163_v39 }
  0x87   : > { %v2368_v36 = vcombine.low %v2360_v18, %v2367_v22  ;;  %v2465_v6 = vrot.slane %v2451_v57, %v11807_v10  ;;  %10851 = vmatpush3.bf16.msra.mxu0 %v11163_v39  ;;  %v11676_v48 = vmov 842150450   ;;  %v11677_v50 = vmov 1414812756  }
  0x88   : > { %v2498_v8 = vrot.slane %v10099_v59, %v11807_v10  ;;  %v4402_v49 = vunpack.c.l.s4 %v11676_v48  ;;  %v4409_v51 = vunpack.c.l.s4 %v11677_v50  ;;  %v11678_v28 = vmov 1987475062  }
  0x8a   : > { %10707 = vmatmul.mubr.msk.bf16.gmra.mxu0 %vm2586_vm1, %v2221_v19  ;;  %v2393_v19 = vrot.slane %v10097_v3, %v11807_v10  ;;  %v2484_v3 = vrot.slane %v10098_v55, %v11807_v10  ;;  %v4403_v57 = vunpack.c.0.s8 %v4402_v49 }
  0x8b   : > { %10710 = vmatprep.mubr.msk.bf16.mxu0 %vm11672_vm0, %v11671_v2 }
  0x8c   : > { %v2402_v33 = vcombine.low %v2393_v19, %v2400_v20  ;;  %v2499_v15 = vcombine.low %v2477_v0, %v2484_v3  ;;  %v4410_v0 = vunpack.c.0.s8 %v4409_v51 }
  0x8e   : > { %v2416_v46 = vrot.slane %v2402_v33, %v11807_v10  ;;  %v2507_v19 = vrot.slane %v2499_v15, %v11807_v10 }
  0x90   : > { %v2417_v53 = vcombine.low %v2409_v42, %v2416_v46  ;;  %v11164_v42 = vld [vmem:[%s15951_s5 + $0x10] sm:$0xff]  }
  0x91   : > { %10744 = vmatprep.subr.bf16.mxu1 %v11164_v42  ;;  %v11165_v46 = vld [vmem:[%s15951_s5 + $0x30] sm:$0xff]  }
  0x92   : > { %10711 = vmatmul.mubr.msk.bf16.gmra.mxu0 %vm2586_vm1, %v2270_v45  ;;  %v2428_v45 = vrot.slane %v2418_v32, %v11807_v10  ;;  %10745 = vmatpush3.bf16.msra.mxu1 %v11164_v42 }
  0x93   : > { %v12277_v60 = vpop.permute.xlu0 %4180  ;;  %v12279_v61 = vpop.permute.xlu1 %4192  ;;  %10714 = vmatprep.mubr.msk.bf16.mxu0 %vm11672_vm0, %v11671_v2  ;;  %10852 = vmatprep.subr.bf16.mxu0 %v11165_v46 }
  0x94   : > { %v2450_v56 = vcombine.low %v2428_v45, %v2435_v47  ;;  %v11675_v47 = vmov 269488144   ;;  %10853 = vmatpush3.bf16.msra.mxu0 %v11165_v46 }
  0x95   : > { %v4395_v44 = vunpack.c.l.s4 %v11675_v47 }
  0x96   : > { %v2458_v4 = vrot.slane %v2450_v56, %v11807_v10 }
  0x97   : > { %v12286_v12 = vpop.permute.xlu0 %4184  ;;  %v12288_v13 = vpop.permute.xlu1 %4196  ;;  %v4396_v56 = vunpack.c.0.s8 %v4395_v44 }
  0x98   : > { %v2466_v14 = vcombine.low %v2458_v4, %v2465_v6 }
  0x99   : > { %v12406_v6 = vsub.s32 %v4396_v56, %v11795_v5 }
  0x9a   : > { %10715 = vmatmul.mubr.msk.bf16.gmra.mxu0 %vm2586_vm1, %v2319_v7  ;;  %v2491_v7 = vrot.slane %v2469_v58, %v11807_v10  ;;  %v11679_v58 = vmov 1983009808  }
  0x9b   : > { %v12300_v27 = vpop.permute.xlu0 %4188  ;;  %10718 = vmatprep.mubr.msk.bf16.mxu0 %vm11672_vm0, %v11671_v2  ;;  %v3276_v59 = vunpack.c.l.s4 %v11679_v58  ;;  %v12486_v58 = vld [vmem:[%s15950_s4] ss:$0 sm:$0xff] }
  0x9c   : > { %v12305_v30 = vpop.permute.xlu1 %4200  ;;  %v2500_v16 = vcombine.low %v2491_v7, %v2498_v8  ;;  %v12409_v7 = vsub.s32 %v4403_v57, %v11795_v5 }
  0x9d   : > { %v3277_v8 = vunpack.c.0.s8 %v3276_v59 }
  0x9e   : > { %v2514_v20 = vrot.slane %v2500_v16, %v11807_v10 }
  0x9f   : > { %v12307_v40 = vpop.permute.xlu0 %4204 }
  0xa0   : > { %v12309_v41 = vpop.permute.xlu1 %4208  ;;  %v2515_v23 = vcombine.low %v2507_v19, %v2514_v20 }
  0xa2   : > { %10719 = vmatmul.mubr.msk.bf16.gmra.mxu0 %vm2586_vm1, %v2368_v36 }
  0xa3   : > { %v12322_v43 = vpop.permute.xlu0 %4216  ;;  %10722 = vmatprep.mubr.msk.bf16.mxu0 %vm11672_vm0, %v11671_v2 }
  0xa4   : > { %v12326_v52 = vpop.permute.xlu1 %4220 }
  0xa7   : > { %v12328_v62 = vpop.permute.xlu0 %4212 }
  0xa8   : > { %v12330_v63 = vpop.permute.xlu1 %4224 }
  0xaa   : > { %10723 = vmatmul.mubr.msk.bf16.gmra.mxu0 %vm2586_vm1, %v2417_v53  ;;  %v4416_v53 = vunpack.c.l.s4 %v11678_v28 }
  0xab   : > { %10726 = vmatprep.mubr.msk.bf16.mxu0 %vm11672_vm0, %v11671_v2  ;;  %v12341_v9 = vpop.permute.xlu0 %4228 }
  0xac   : > { %v12343_v11 = vpop.permute.xlu1 %4232  ;;  %v4417_v3 = vunpack.c.0.s8 %v4416_v53 }
  0xae   : > { %v12415_v15 = vsub.s32 %v4417_v3, %v11795_v5  ;;  %v12465_v3 = vld [vmem:[%s15949_s3] ss:$0 sm:$0xff] }
  0xaf   : > { %v12345_v17 = vpop.permute.xlu0 %4240 }
  0xb0   : > { %v12347_v18 = vpop.permute.xlu1 %4244 }
  0xb1   : > { %16068 = vst [vmem:[#allocation5_spill] sm:$0xff] %v12347_v18 }
  0xb2   : > { %10727 = vmatmul.mubr.msk.bf16.gmra.mxu0 %vm2586_vm1, %v2466_v14  ;;  %v12412_v14 = vsub.s32 %v4410_v0, %v11795_v5 }
  0xb3   : > { %10730 = vmatprep.mubr.msk.bf16.mxu0 %vm11672_vm0, %v11671_v2  ;;  %v12354_v21 = vpop.permute.xlu0 %4236 }
  0xb4   : > { %16069 = vst [vmem:[#allocation6_spill] sm:$0xff] %v12354_v21  ;;  %v12356_v22 = vpop.permute.xlu1 %4248 }
  0xb5   : > { %16070 = vst [vmem:[#allocation7_spill] sm:$0xff] %v12356_v22 }
  0xb7   : > { %v12358_v24 = vpop.permute.xlu0 %4252 }
  0xb8   : > { %16071 = vst [vmem:[#allocation8_spill] sm:$0xff] %v12358_v24  ;;  %v12360_v25 = vpop.permute.xlu1 %4256 }
  0xb9   : > { %16072 = vst [vmem:[#allocation9_spill] sm:$0xff] %v12360_v25 }
  0xba   : > { %10731 = vmatmul.mubr.msk.bf16.gmra.mxu0 %vm2586_vm1, %v2515_v23  ;;  %v12424_v23 = vsub.s32 %v3277_v8, %v11795_v5 }
  0xbb   : > { %v12363_v26 = vpop.permute.xlu0 %4264 }
  0xbc   : > { %16073 = vst [vmem:[#allocation10_spill] sm:$0xff] %v12363_v26  ;;  %v12365_v29 = vpop.permute.xlu1 %4268 }
  0xbd   : > { %16074 = vst [vmem:[#allocation11_spill] sm:$0xff] %v12365_v29 }
  0xbf   : > { %v12367_v31 = vpop.permute.xlu0 %4260 }
  0xc0   : > { %16075 = vst [vmem:[#allocation12_spill] sm:$0xff] %v12367_v31  ;;  %v12369_v10 = vpop.permute.xlu1 %4272 }
  0xc1   : > { %16076 = vst [vmem:[#allocation13_spill] sm:$0xff] %v12369_v10 }
  0xc3   : > { %v12371_v2 = vpop.permute.xlu0 %4276 }
  0xc4   : > { %16077 = vst [vmem:[#allocation14_spill] sm:$0xff] %v12371_v2  ;;  %v12373_v32 = vpop.permute.xlu1 %4280 }
  0xc5   : > { %16078 = vst [vmem:[#allocation15_spill] sm:$0xff] %v12373_v32 }
  0xc7   : > { %v12375_v33 = vpop.permute.xlu0 %4288 }
  0xc8   : > { %16079 = vst [vmem:[#allocation16_spill] sm:$0xff] %v12375_v33  ;;  %v12377_v34 = vpop.permute.xlu1 %4292 }
  0xc9   : > { %16080 = vst [vmem:[#allocation17_spill] sm:$0xff] %v12377_v34 }
  0xcb   : > { %v12379_v35 = vpop.permute.xlu0 %4284 }
  0xcc   : > { %16081 = vst [vmem:[#allocation18_spill] sm:$0xff] %v12379_v35  ;;  %v12381_v36 = vpop.permute.xlu1 %4296 }
  0xcd   : > { %16082 = vst [vmem:[#allocation19_spill] sm:$0xff] %v12381_v36 }
  0xcf   : > { %v12386_v38 = vpop.permute.xlu0 %4300 }
  0xd0   : > { %16083 = vst [vmem:[#allocation20_spill] sm:$0xff] %v12386_v38  ;;  %v12394_v45 = vpop.permute.xlu1 %4304 }
  0xd1   : > { %16084 = vst [vmem:[#allocation21_spill] sm:$0xff] %v12394_v45 }
  0xd3   : > { %v12399_v54 = vpop.permute.xlu0 %4312 }
  0xd4   : > { %16085 = vst [vmem:[#allocation22_spill] sm:$0xff] %v12399_v54  ;;  %v12401_v55 = vpop.permute.xlu1 %4316 }
  0xd5   : > { %16086 = vst [vmem:[#allocation23_spill] sm:$0xff] %v12401_v55 }
  0xd7   : > { %v12403_v4 = vpop.permute.xlu0 %4308 }
  0xd8   : > { %16087 = vst [vmem:[#allocation24_spill] sm:$0xff] %v12403_v4  ;;  %v12417_v16 = vpop.permute.xlu1 %4320 }
  0xd9   : > { %16088 = vst [vmem:[#allocation25_spill] sm:$0xff] %v12417_v16 }
  0xdb   : > { %v12434_v47 = vpop.permute.xlu0 %4324 }
  0xdc   : > { %16089 = vst [vmem:[#allocation26_spill] sm:$0xff] %v12434_v47  ;;  %v12452_v56 = vpop.permute.xlu1 %4328 }
  0xdd   : > { %16090 = vst [vmem:[#allocation27_spill] sm:$0xff] %v12452_v56 }
  0xdf   : > { %v12495_v1 = vpop.permute.xlu0 %4336 }
  0xe0   : > { %16091 = vst [vmem:[#allocation28_spill] sm:$0xff] %v12495_v1  ;;  %v12514_v44 = vpop.permute.xlu1 %4340 }
  0xe1   : > { %16092 = vst [vmem:[#allocation29_spill] sm:$0xff] %v12514_v44 }
  0xea   : > { %v2684_v5 = vpop.f32.mrf.mxu0 }
  0xeb   : > { %v2857_v28 = vmul.f32 %v12465_v3, %v2684_v5 }
  0xec   : > { %v10660_v0 = vpop.f32.mrf.mxu0 }
  0xed   : > { %v12506_v46 = vadd.f32 %v12486_v58, %v2857_v28  ;;  %v12545_v0 = vpop.permute.xlu0 %4332  ;;  %v12561_v28 = vpop.permute.xlu1 %4344 }
  0xee   : > { %v2687_v42 = vpop.f32.mrf.mxu0  ;;  %16093 = vst [vmem:[#allocation30_spill] sm:$0xff] %v12545_v0  ;;  %16094 = vst [vmem:[#allocation31_spill] sm:$0xff] %v12561_v28 }
  0xef   : > { %v10124_v53 = vmul.f32 -1.442695, %v12506_v46  ;;  %v2858_v57 = vmul.f32 %v12465_v3, %v2687_v42 }
  0xf0   : > { %v10661_v59 = vpop.f32.mrf.mxu0 }
  0xf1   : > { %11184 = vpow2.f32 %v10124_v53  ;;  %v12539_v42 = vadd.f32 %v12486_v58, %v2858_v57  ;;  %v12592_v53 = vpop.permute.xlu0 %4348  ;;  %v12609_v57 = vpop.permute.xlu1 %4352 }
  0xf2   : > { %v2692_v8 = vpop.f32.mrf.mxu0  ;;  %16095 = vst [vmem:[#allocation32_spill] sm:$0xff] %v12592_v53  ;;  %16096 = vst [vmem:[#allocation33_spill] sm:$0xff] %v12609_v57 }
  0xf3   : > { %v10125_v50 = vmul.f32 -1.442695, %v12539_v42  ;;  %v2859_v48 = vmul.f32 %v12465_v3, %v2692_v8 }
  0xf4   : > { %v10664_v51 = vpop.f32.mrf.mxu0 }
  0xf5   : > { %11186 = vpow2.f32 %v10125_v50  ;;  %v12572_v59 = vadd.f32 %v12486_v58, %v2859_v48  ;;  %v12640_v48 = vpop.permute.xlu0 %4360  ;;  %v12654_v22 = vpop.permute.xlu1 %4364 }
  0xf6   : > { %v2695_v5 = vpop.f32.mrf.mxu0  ;;  %16097 = vst [vmem:[#allocation34_spill] sm:$0xff] %v12640_v48  ;;  %16098 = vst [vmem:[#allocation35_spill] sm:$0xff] %v12654_v22 }
  0xf7   : > { %v10126_v50 = vmul.f32 -1.442695, %v12572_v59  ;;  %v2860_v37 = vmul.f32 %v12465_v3, %v2695_v5 }
  0xf8   : > { %v10665_v49 = vpop.f32.mrf.mxu0 }
  0xf9   : > { %11188 = vpow2.f32 %v10126_v50  ;;  %v12603_v51 = vadd.f32 %v12486_v58, %v2860_v37  ;;  %v12681_v36 = vpop.permute.xlu0 %4356 }
  0xfa   : > { %v2700_v39 = vpop.f32.mrf.mxu0  ;;  %16099 = vst [vmem:[#allocation36_spill] sm:$0xff] %v12681_v36 }
  0xfb   : > { %v10127_v19 = vmul.f32 -1.442695, %v12603_v51  ;;  %v2861_v5 = vmul.f32 %v12465_v3, %v2700_v39 }
  0xfc   : > { %v10668_v8 = vpop.f32.mrf.mxu0 }
  0xfd   : > { %11190 = vpow2.f32 %v10127_v19  ;;  %v12634_v39 = vadd.f32 %v12486_v58, %v2861_v5  ;;  %v12698_v19 = vpop.permute.xlu1 %4368 }
  0xfe   : > { %v11185_v49 = vpop.eup %11184  ;;  %v2703_v50 = vpop.f32.mrf.mxu0  ;;  %16100 = vst [vmem:[#allocation37_spill] sm:$0xff] %v12698_v19 }
  0xff   : > { %v3069_v20 = vadd.f32 1.0, %v11185_v49  ;;  %v10128_v31 = vmul.f32 -1.442695, %v12634_v39  ;;  %v2862_v8 = vmul.f32 %v12465_v3, %v2703_v50 }
 0x100   : > { %v10669_v37 = vpop.f32.mrf.mxu0 }
 0x101   : > { %11192 = vrcp.f32 %v3069_v20  ;;  %v12665_v50 = vadd.f32 %v12486_v58, %v2862_v8 }
 0x102   : > { %v11187_v10 = vpop.eup %11186  ;;  %11194 = vpow2.f32 %v10128_v31  ;;  %v2708_v22 = vpop.f32.mrf.mxu0 }
 0x103   : > { %v3070_v8 = vadd.f32 1.0, %v11187_v10  ;;  %v10129_v49 = vmul.f32 -1.442695, %v12665_v50  ;;  %v2863_v33 = vmul.f32 %v12465_v3, %v2708_v22 }
 0x104   : > { %v10672_v31 = vpop.f32.mrf.mxu0 }
 0x105   : > { %11196 = vrcp.f32 %v3070_v8  ;;  %v12692_v22 = vadd.f32 %v12486_v58, %v2863_v33 }
 0x106   : > { %v11189_v45 = vpop.eup %11188  ;;  %11198 = vpow2.f32 %v10129_v49  ;;  %v2711_v5 = vpop.f32.mrf.mxu0 }
 0x107   : > { %v3071_v10 = vadd.f32 1.0, %v11189_v45  ;;  %v10130_v37 = vmul.f32 -1.442695, %v12692_v22  ;;  %v2864_v54 = vmul.f32 %v12465_v3, %v2711_v5  ;;  %v12724_v49 = vpop.permute.xlu0 %4372 }
 0x108   : > { %v10673_v19 = vpop.f32.mrf.mxu0  ;;  %16101 = vst [vmem:[#allocation38_spill] sm:$0xff] %v12724_v49  ;;  %v12738_v49 = vpop.permute.xlu1 %4376 }
 0x109   : > { %11200 = vrcp.f32 %v3071_v10  ;;  %v2836_v16 = vpop.f32.mrf.mxu1  ;;  %v12733_v33 = vadd.f32 %v12486_v58, %v2864_v54  ;;  %16102 = vst [vmem:[#allocation39_spill] sm:$0xff] %v12738_v49 }
 0x10a   : > { %v11191_v31 = vpop.eup %11190  ;;  %11202 = vpow2.f32 %v10130_v37  ;;  %v2716_v20 = vpop.f32.mrf.mxu0  ;;  %v2895_v1 = vmul.f32 %v12465_v3, %v2836_v16 }
 0x10b   : > { %v3072_v45 = vadd.f32 1.0, %v11191_v31  ;;  %v2865_v19 = vmul.f32 %v12465_v3, %v2716_v20  ;;  %v10736_v47 = vpop.f32.mrf.mxu1  ;;  %v12768_v10 = vpop.permute.xlu0 %4380 }
 0x10c   : > { %v10676_v56 = vpop.f32.mrf.mxu0  ;;  %v10131_v47 = vmul.f32 -1.442695, %v12733_v33  ;;  %16103 = vst [vmem:[#allocation40_spill] sm:$0xff] %v12768_v10 }
 0x10d   : > { %11204 = vrcp.f32 %v3072_v45  ;;  %v12749_v20 = vadd.f32 %v12486_v58, %v2865_v19  ;;  %v2839_v5 = vpop.f32.mrf.mxu1 }
 0x10e   : > { %v11193_v8 = vpop.eup %11192  ;;  %v2719_v37 = vpop.f32.mrf.mxu0 }
 0x10f   : > { %v11195_v54 = vpop.eup %11194  ;;  %v3192_v56 = vmul.f32 %v11193_v8, %v12506_v46  ;;  %v2866_v49 = vmul.f32 %v12465_v3, %v2719_v37  ;;  %v10737_v0 = vpop.f32.mrf.mxu1  ;;  %v10132_v37 = vmul.f32 -1.442695, %v12749_v20 }
 0x110   : > { %v3073_v44 = vadd.f32 1.0, %v11195_v54  ;;  %v10677_v31 = vpop.f32.mrf.mxu0  ;;  %v12803_v16 = vpop.permute.xlu0 %4388 }
 0x111   : > { %v3274_v8 = vcombine.high %v3192_v56, %v3192_v56  ;;  %v12778_v53 = vadd.f32 %v12486_v58, %v2866_v49  ;;  %v12782_v31 = vpop.permute.xlu1 %4384  ;;  %v3281_v45 = vrot.slane %v3192_v56, %v12424_v23  ;;  %v12785_v19 = vpop.f32.mrf.mxu1  ;;  %16105 = vst [vmem:[#allocation42_spill] sm:$0xff] %v12803_v16 }
 0x112   : > { %16104 = vst [vmem:[#allocation41_spill] sm:$0xff] %v12782_v31  ;;  %v11197_v0 = vpop.eup %11196  ;;  %11206 = vrcp.f32 %v3073_v44  ;;  %v2724_v28 = vpop.f32.mrf.mxu0 }
 0x113   : > { %v11199_v49 = vpop.eup %11198  ;;  %v3288_v57 = vrot.slane %v3274_v8, %v12424_v23  ;;  %v3193_v54 = vmul.f32 %v11197_v0, %v12539_v42  ;;  %11208 = vpow2.f32 %v10131_v47  ;;  %v10133_v44 = vmul.f32 -1.442695, %v12778_v53  ;;  %v10740_v38 = vpop.f32.mrf.mxu1 }
 0x114   : > { %v3074_v4 = vadd.f32 1.0, %v11199_v49  ;;  %v10680_v56 = vpop.f32.mrf.mxu0  ;;  %11210 = vpow2.f32 %v10132_v37  ;;  %v3289_v0 = vcombine.high %v3281_v45, %v3281_v45  ;;  %v12813_v42 = vadd.f32 %v12486_v58, %v2895_v1 }
 0x115   : > { %v3291_v10 = vcombine.high %v3193_v54, %v3193_v54  ;;  %v3298_v49 = vrot.slane %v3193_v54, %v12424_v23  ;;  %v2847_v46 = vpop.f32.mrf.mxu1  ;;  %v3290_v55 = vcombine.high %v3288_v57, %v3288_v57  ;;  %v16106_v1 = vrot.slane %v12277_v60, %v12409_v7 }
 0x116   : > { %v11201_v47 = vpop.eup %11200  ;;  %11212 = vrcp.f32 %v3074_v4  ;;  %v12806_v56 = vpop.f32.mrf.mxu0  ;;  %v2896_v4 = vmul.f32 %v12465_v3, %v2839_v5  ;;  %v16108_v38 = vrot.slane %v12286_v12, %v12409_v7  ;;  %v10162_v2 = vmul.f32 -1.442695, %v12813_v42 }
 0x117   : > { %v11203_v37 = vpop.eup %11202  ;;  %v3305_v8 = vrot.slane %v3291_v10, %v12424_v23  ;;  %v3194_v36 = vmul.f32 %v11201_v47, %v12572_v59  ;;  %v3306_v48 = vcombine.high %v3298_v49, %v3298_v49  ;;  %11214 = vpow2.f32 %v10133_v44  ;;  %v10741_v35 = vpop.f32.mrf.mxu1 }
 0x118   : > { %v3075_v34 = vadd.f32 1.0, %v11203_v37  ;;  %v10681_v54 = vpop.f32.mrf.mxu0  ;;  %v5691_v47 = vmul.f32 %v16106_v1, %v3289_v0  ;;  %v16107_v37 = vrot.slane %v12277_v60, %v12415_v15  ;;  %v16109_v0 = vrot.slane %v12277_v60, %v12406_v6 }
 0x119   : > { %v3307_v32 = vcombine.high %v3305_v8, %v3305_v8  ;;  %v3308_v44 = vcombine.high %v3194_v36, %v3194_v36  ;;  %v3315_v5 = vrot.slane %v3194_v36, %v12424_v23  ;;  %v5695_v46 = vmul.f32 %v16108_v38, %v3306_v48 }
 0x11a   : > { %v11205_v10 = vpop.eup %11204  ;;  %11216 = vrcp.f32 %v3075_v34  ;;  %v12826_v35 = vpop.f32.mrf.mxu0  ;;  %v5693_v54 = vmul.f32 %v16107_v37, %v3290_v55  ;;  %v5690_v1 = vmul.f32 %v16109_v0, %v3281_v45  ;;  %v16110_v34 = vrot.slane %v12286_v12, %v12415_v15 }
 0x11b   : > { %v3195_v59 = vmul.f32 %v11205_v10, %v12603_v51  ;;  %v3322_v29 = vrot.slane %v3308_v44, %v12424_v23  ;;  %v12844_v55 = vadd.f32 %v12486_v58, %v2896_v4  ;;  %v16112_v48 = vrot.slane %v12277_v60, %v12412_v14 }
 0x11c   : > { %v5697_v36 = vmul.f32 %v16110_v34, %v3307_v32  ;;  %v10684_v37 = vpop.f32.mrf.mxu0  ;;  %v16113_v38 = vrot.slane %v12286_v12, %v12406_v6  ;;  %v3323_v26 = vcombine.high %v3315_v5, %v3315_v5  ;;  %v2867_v45 = vmul.f32 %v12465_v3, %v2724_v28 }
 0x11d   : > { %16111 = vst [vmem:[#allocation43_spill] sm:$0xff] %v12844_v55  ;;  %v5692_v51 = vmul.f32 %v16112_v48, %v3288_v57  ;;  %v6014_v0 = vcombine.low %v5690_v1, %v5691_v47  ;;  %v16114_v32 = vrot.slane %v12286_v12, %v12412_v14  ;;  %v3325_v34 = vcombine.high %v3195_v59, %v3195_v59 }
 0x11e   : > { %v5694_v10 = vmul.f32 %v16113_v38, %v3298_v49  ;;  %v3332_v4 = vrot.slane %v3195_v59, %v12424_v23  ;;  %v12857_v37 = vpop.f32.mrf.mxu0  ;;  %v3324_v1 = vcombine.high %v3322_v29, %v3322_v29  ;;  %11218 = vpow2.f32 %v10162_v2 }
 0x11f   : > { %v5696_v44 = vmul.f32 %v16114_v32, %v3305_v8  ;;  %v11207_v25 = vpop.eup %11206  ;;  %v6015_v60 = vcombine.low %v5692_v51, %v5693_v54  ;;  %v16115_v59 = vrot.slane %v12279_v61, %v12406_v6  ;;  %v12871_v51 = vadd.f32 %v12486_v58, %v2867_v45 }
 0x120   : > { %v6031_v57 = vcombine.low %v5694_v10, %v5695_v46  ;;  %v11209_v28 = vpop.eup %11208  ;;  %v3196_v12 = vmul.f32 %v11207_v25, %v12634_v39  ;;  %v10685_v8 = vpop.f32.mrf.mxu0  ;;  %v16116_v46 = vrot.slane %v12279_v61, %v12409_v7  ;;  %v12874_v10 = vmul.f32 -1.442695, %v12844_v55 }
 0x121   : > { %v6032_v47 = vcombine.low %v5696_v44, %v5697_v36  ;;  %v5699_v38 = vmul.f32 %v16115_v59, %v3323_v26  ;;  %v11211_v36 = vpop.eup %11210  ;;  %v6022_v32 = vrot.slane %v6014_v0, %v12424_v23  ;;  %v3339_v25 = vrot.slane %v3325_v34, %v12424_v23 }
 0x122   : > { %v5700_v54 = vmul.f32 %v16116_v46, %v3322_v29  ;;  %v3340_v2 = vcombine.high %v3332_v4, %v3332_v4  ;;  %v3342_v39 = vcombine.high %v3196_v12, %v3196_v12  ;;  %v12878_v44 = vpop.f32.mrf.mxu0  ;;  %v6029_v8 = vrot.slane %v6015_v60, %v12424_v23 }
 0x123   : > { %v11213_v26 = vpop.eup %11212  ;;  %v6039_v29 = vrot.slane %v6031_v57, %v12424_v23  ;;  %v16117_v45 = vrot.slane %v12300_v27, %v12406_v6  ;;  %v3076_v46 = vadd.f32 1.0, %v11209_v28  ;;  %v6046_v48 = vrot.slane %v6032_v47, %v12424_v23 }
 0x124   : > { %v16118_v0 = vrot.slane %v12279_v61, %v12412_v14  ;;  %v16119_v49 = vrot.slane %v12279_v61, %v12415_v15  ;;  %v3356_v16 = vrot.slane %v3342_v39, %v12424_v23  ;;  %v10688_v60 = vpop.f32.mrf.mxu0  ;;  %v11215_v31 = vpop.eup %11214  ;;  %v6055_v57 = vcombine.low %v5699_v38, %v5700_v54 }
 0x125   : > { %v5698_v59 = vmul.f32 %v16117_v45, %v3315_v5  ;;  %v3197_v21 = vmul.f32 %v11213_v26, %v12665_v50  ;;  %11220 = vrcp.f32 %v3076_v46  ;;  %v3077_v27 = vadd.f32 1.0, %v11211_v36 }
 0x126   : > { %v5701_v34 = vmul.f32 %v16118_v0, %v3324_v1  ;;  %v5702_v24 = vmul.f32 %v16119_v49, %v3332_v4  ;;  %v16120_v5 = vrot.slane %v12288_v13, %v12406_v6  ;;  %v16121_v47 = vrot.slane %v12288_v13, %v12409_v7  ;;  %v12901_v49 = vpop.f32.mrf.mxu0 }
 0x127   : > { %v3349_v61 = vrot.slane %v3196_v12, %v12424_v23  ;;  %v3358_v4 = vcombine.high %v3356_v16, %v3356_v16  ;;  %v11217_v39 = vpop.eup %11216  ;;  %v3359_v45 = vcombine.high %v3197_v21, %v3197_v21  ;;  %v3366_v38 = vrot.slane %v3197_v21, %v12424_v23 }
 0x128   : > { %v5703_v28 = vmul.f32 %v16120_v5, %v3340_v2  ;;  %v5704_v1 = vmul.f32 %v16121_v47, %v3339_v25  ;;  %11222 = vrcp.f32 %v3077_v27  ;;  %v3078_v50 = vadd.f32 1.0, %v11215_v31  ;;  %v10689_v46 = vpop.f32.mrf.mxu0 }
 0x129   : > { %v6047_v54 = vcombine.low %v6039_v29, %v6046_v48  ;;  %v3341_v36 = vcombine.high %v3339_v25, %v3339_v25  ;;  %v6056_v26 = vcombine.low %v5701_v34, %v5702_v24  ;;  %v3198_v2 = vmul.f32 %v11217_v39, %v12692_v22 }
 0x12a   : > { %v6030_v0 = vcombine.low %v6022_v32, %v6029_v8  ;;  %v3373_v60 = vrot.slane %v3359_v45, %v12424_v23  ;;  %11224 = vrcp.f32 %v3078_v50  ;;  %v10134_v12 = vmul.f32 -1.442695, %v12871_v51  ;;  %v12908_v21 = vpop.f32.mrf.mxu0 }
 0x12b   : > { %v6072_v5 = vcombine.low %v5703_v28, %v5704_v1  ;;  %v3357_v47 = vcombine.high %v3349_v61, %v3349_v61  ;;  %v3374_v18 = vcombine.high %v3366_v38, %v3366_v38  ;;  %v3383_v55 = vrot.slane %v3198_v2, %v12424_v23  ;;  %v11219_v28 = vpop.eup %11218 }
 0x12c   : > { %v12911_v31 = vrot.slane %v5698_v59, %v12424_v23  ;;  %v12914_v24 = vrot.slane %v6055_v57, %v12424_v23  ;;  %v16122_v22 = vrot.slane %v12307_v40, %v12409_v7  ;;  %v3375_v32 = vcombine.high %v3373_v60, %v3373_v60  ;;  %v10692_v27 = vpop.f32.mrf.mxu0 }
 0x12d   : > { %v12919_v25 = vpack.c.bf16 %v6047_v54, %v6030_v0  ;;  %v12922_v8 = vrot.slane %v6056_v26, %v12424_v23  ;;  %v16124_v29 = vrot.slane %v12288_v13, %v12412_v14  ;;  %v3391_v59 = vcombine.high %v3383_v55, %v3383_v55 }
 0x12e   : > { %v5709_v48 = vmul.f32 %v16122_v22, %v3358_v4  ;;  %v16125_v57 = vrot.slane %v12288_v13, %v12415_v15  ;;  %v16126_v4 = vrot.slane %v12307_v40, %v12406_v6  ;;  %v3376_v45 = vcombine.high %v3198_v2, %v3198_v2 }
 0x12f   : > { %16123 = vst [vmem:[#allocation44_spill] sm:$0xff] %v12919_v25  ;;  %v12927_v34 = vmul.f32 %v16124_v29, %v3341_v36  ;;  %v2868_v50 = vmul.f32 %v12465_v3, %v12806_v56  ;;  %v12940_v54 = vrot.slane %v6072_v5, %v12424_v23  ;;  %v16127_v36 = vrot.slane %v12305_v30, %v12406_v6 }
 0x130   : > { %v12932_v1 = vmul.f32 %v16125_v57, %v3349_v61  ;;  %v5708_v39 = vmul.f32 %v16126_v4, %v3356_v16  ;;  %v16128_v13 = vrot.slane %v12307_v40, %v12415_v15  ;;  %v16129_v46 = vrot.slane %v12309_v41, %v12409_v7  ;;  %v12951_v16 = vpop.f32.mrf.mxu0 }
 0x131   : > { %v5707_v26 = vmul.f32 %v16127_v36, %v3357_v47  ;;  %v16130_v56 = vrot.slane %v12307_v40, %v12412_v14  ;;  %11226 = vpow2.f32 %v10134_v12  ;;  %v12957_v22 = vadd.f32 %v12486_v58, %v2868_v50 }
 0x132   : > { %v5711_v61 = vmul.f32 %v16128_v13, %v3374_v18  ;;  %v5713_v0 = vmul.f32 %v16129_v46, %v3375_v32  ;;  %v6096_v2 = vcombine.low %v5708_v39, %v5709_v48  ;;  %v16131_v30 = vrot.slane %v12309_v41, %v12406_v6  ;;  %v10693_v40 = vpop.f32.mrf.mxu0 }
 0x133   : > { %v5710_v5 = vmul.f32 %v16130_v56, %v3366_v38  ;;  %v16132_v18 = vrot.slane %v12309_v41, %v12415_v15  ;;  %v2869_v32 = vmul.f32 %v12465_v3, %v12826_v35  ;;  %v2897_v48 = vmul.f32 %v12465_v3, %v12785_v19 }
 0x134   : > { %v5712_v47 = vmul.f32 %v16131_v30, %v3373_v60  ;;  %v6073_v38 = vcombine.low %v12927_v34, %v12932_v1  ;;  %v12972_v12 = vrot.slane %v3376_v45, %v12424_v23  ;;  %v16133_v60 = vrot.slane %v12309_v41, %v12412_v14  ;;  %v12984_v50 = vpop.f32.mrf.mxu0 }
 0x135   : > { %v5715_v29 = vmul.f32 %v16132_v18, %v3391_v59  ;;  %v10135_v57 = vmul.f32 -1.442695, %v12957_v22  ;;  %v11221_v59 = vpop.eup %11220  ;;  %v6097_v4 = vcombine.low %v5710_v5, %v5711_v61  ;;  %v12979_v35 = vadd.f32 %v12486_v58, %v2869_v32 }
 0x136   : > { %v5714_v27 = vmul.f32 %v16133_v60, %v3383_v55  ;;  %v6113_v39 = vcombine.low %v5712_v47, %v5713_v0  ;;  %v12982_v19 = vadd.f32 %v12486_v58, %v2897_v48  ;;  %v6095_v34 = vrot.slane %v5707_v26, %v12424_v23  ;;  %v11223_v55 = vpop.eup %11222  ;;  %v10696_v61 = vpop.f32.mrf.mxu0 }
 0x137   : > { %v12988_v1 = vrot.slane %v6096_v2, %v12424_v23  ;;  %v3199_v41 = vmul.f32 %v11221_v59, %v12733_v33  ;;  %11228 = vpow2.f32 %v10135_v57  ;;  %v10136_v36 = vmul.f32 -1.442695, %v12979_v35  ;;  %v11225_v2 = vpop.eup %11224 }
 0x138   : > { %v6114_v45 = vcombine.low %v5714_v27, %v5715_v29  ;;  %11230 = vpow2.f32 %v12874_v10  ;;  %v10164_v13 = vmul.f32 -1.442695, %v12982_v19  ;;  %v3200_v26 = vmul.f32 %v11223_v55, %v12749_v20  ;;  %v13000_v10 = vpop.f32.mrf.mxu0 }
 0x139   : > { %v3393_v46 = vcombine.high %v3199_v41, %v3199_v41  ;;  %v3400_v0 = vrot.slane %v3199_v41, %v12424_v23  ;;  %v3107_v56 = vadd.f32 1.0, %v11219_v28  ;;  %v6111_v5 = vrot.slane %v6097_v4, %v12424_v23 }
 0x13a   : > { %v6121_v33 = vrot.slane %v6113_v39, %v12424_v23  ;;  %v3392_v30 = vcombine.high %v12972_v12, %v12972_v12  ;;  %11232 = vpow2.f32 %v10136_v36  ;;  %v3410_v29 = vcombine.high %v3200_v26, %v3200_v26  ;;  %v10697_v40 = vpop.f32.mrf.mxu0 }
 0x13b   : > { %v3407_v47 = vrot.slane %v3393_v46, %v12424_v23  ;;  %v3408_v18 = vcombine.high %v3400_v0, %v3400_v0  ;;  %v2870_v32 = vmul.f32 %v12465_v3, %v12857_v37  ;;  %v6128_v20 = vrot.slane %v6114_v45, %v12424_v23 }
 0x13c   : > { %v3417_v28 = vrot.slane %v3200_v26, %v12424_v23  ;;  %v3201_v48 = vmul.f32 %v11225_v2, %v12778_v53  ;;  %11234 = vpow2.f32 %v10164_v13  ;;  %v16134_v27 = vrot.slane %v12322_v43, %v12412_v14  ;;  %v13021_v45 = vpop.f32.mrf.mxu0 }
 0x13d   : > { %v3409_v60 = vcombine.high %v3407_v47, %v3407_v47  ;;  %v16135_v59 = vrot.slane %v12322_v43, %v12415_v15  ;;  %v2871_v37 = vmul.f32 %v12465_v3, %v12878_v44  ;;  %v13017_v39 = vrot.slane %v3410_v29, %v12424_v23 }
 0x13e   : > { %v5719_v57 = vmul.f32 %v16134_v27, %v3408_v18  ;;  %v3425_v41 = vcombine.high %v3417_v28, %v3417_v28  ;;  %v3427_v55 = vcombine.high %v3201_v48, %v3201_v48  ;;  %v2872_v53 = vmul.f32 %v12465_v3, %v12901_v49  ;;  %v11227_v18 = vpop.eup %11226  ;;  %v10700_v27 = vpop.f32.mrf.mxu0 }
 0x13f   : > { %v5720_v4 = vmul.f32 %v16135_v59, %v3407_v47  ;;  %v16136_v36 = vrot.slane %v12322_v43, %v12406_v6  ;;  %v16137_v61 = vrot.slane %v12322_v43, %v12409_v7  ;;  %v16138_v44 = vrot.slane %v12326_v52, %v12406_v6 }
 0x140   : > { %v16139_v2 = vrot.slane %v12326_v52, %v12409_v7  ;;  %v6129_v49 = vcombine.low %v6121_v33, %v6128_v20  ;;  %v16140_v29 = vrot.slane %v12326_v52, %v12412_v14  ;;  %11236 = vrcp.f32 %v3107_v56 }
 0x141   : > { %v5717_v13 = vmul.f32 %v16136_v36, %v3392_v30  ;;  %v5718_v46 = vmul.f32 %v16137_v61, %v3400_v0  ;;  %v5721_v26 = vmul.f32 %v16138_v44, %v3409_v60  ;;  %v16141_v30 = vrot.slane %v12326_v52, %v12415_v15  ;;  %v13056_v36 = vpop.f32.mrf.mxu0 }
 0x142   : > { %v5722_v47 = vmul.f32 %v16139_v2, %v3417_v28  ;;  %v5723_v40 = vmul.f32 %v16140_v29, %v3425_v41  ;;  %v13043_v0 = vadd.f32 %v12486_v58, %v2870_v32  ;;  %v13046_v60 = vrot.slane %v6073_v38, %v12424_v23 }
 0x143   : > { %v5724_v43 = vmul.f32 %v16141_v30, %v13017_v39  ;;  %v6112_v28 = vcombine.low %v12988_v1, %v6111_v5  ;;  %v6138_v59 = vcombine.low %v5719_v57, %v5720_v4  ;;  %v3441_v20 = vrot.slane %v3427_v55, %v12424_v23 }
 0x144   : > { %v13051_v41 = vadd.f32 %v12486_v58, %v2871_v37  ;;  %v13054_v52 = vadd.f32 %v12486_v58, %v2872_v53  ;;  %v13058_v32 = vpack.c.bf16 %v6095_v34, %v6095_v34  ;;  %v6137_v61 = vcombine.low %v5717_v13, %v5718_v46  ;;  %v11229_v2 = vpop.eup %11228  ;;  %v10701_v34 = vpop.f32.mrf.mxu0 }
 0x145   : > { %v6155_v33 = vcombine.low %v5723_v40, %v5724_v43  ;;  %v6154_v38 = vcombine.low %v5721_v26, %v5722_v47  ;;  %v3079_v44 = vadd.f32 1.0, %v11227_v18  ;;  %v16143_v1 = vrot.slane %v12328_v62, %v12406_v6  ;;  %v11231_v37 = vpop.eup %11230 }
 0x146   : > { %16142 = vst [vmem:[#allocation45_spill] sm:$0xff] %v13058_v32  ;;  %v13066_v5 = vpack.c.bf16 %v6129_v49, %v6112_v28  ;;  %v13069_v57 = vrot.slane %v3201_v48, %v12424_v23  ;;  %v10137_v4 = vmul.f32 -1.442695, %v13043_v0  ;;  %v6152_v55 = vrot.slane %v6138_v59, %v12424_v23  ;;  %v13078_v26 = vpop.f32.mrf.mxu0 }
 0x147   : > { %v13064_v56 = vmul.f32 %v16143_v1, %v12972_v12  ;;  %v6169_v53 = vrot.slane %v6155_v33, %v12424_v23  ;;  %11238 = vrcp.f32 %v3079_v44  ;;  %v3080_v13 = vadd.f32 1.0, %v11229_v2  ;;  %v11233_v47 = vpop.eup %11232 }
 0x148   : > { %16144 = vst [vmem:[#allocation46_spill] sm:$0xff] %v13066_v5  ;;  %v3443_v62 = vcombine.high %v3441_v20, %v3441_v20  ;;  %v10138_v12 = vmul.f32 -1.442695, %v13051_v41  ;;  %v10139_v46 = vmul.f32 -1.442695, %v13054_v52  ;;  %v2873_v48 = vmul.f32 %v12465_v3, %v12908_v21  ;;  %v10704_v28 = vpop.f32.mrf.mxu0 }
 0x149   : > { %v6145_v18 = vrot.slane %v6137_v61, %v12424_v23  ;;  %v6162_v49 = vrot.slane %v6154_v38, %v12424_v23  ;;  %11240 = vrcp.f32 %v3080_v13  ;;  %v13084_v29 = vpack.c.bf16 %v12911_v31, %v12911_v31  ;;  %v11235_v59 = vpop.eup %11234 }
 0x14a   : > { %v3442_v40 = vcombine.high %v13069_v57, %v13069_v57  ;;  %v16146_v30 = vrot.slane %v12341_v9, %v12412_v14  ;;  %v3108_v21 = vadd.f32 1.0, %v11231_v37  ;;  %v3081_v27 = vadd.f32 1.0, %v11233_v47  ;;  %v13103_v1 = vpop.f32.mrf.mxu0 }
 0x14b   : > { %16145 = vst [vmem:[#allocation47_spill] sm:$0xff] %v13084_v29  ;;  %v6153_v33 = vcombine.low %v6145_v18, %v6152_v55  ;;  %v6170_v61 = vcombine.low %v6162_v49, %v6169_v53  ;;  %11242 = vpow2.f32 %v10137_v4  ;;  %v6850_v38 = vshll.u32 %v12919_v25, 16 }
 0x14c   : > { %v13091_v43 = vmul.f32 %v16146_v30, %v3441_v20  ;;  %v16147_v31 = vrot.slane %v12341_v9, %v12415_v15  ;;  %11244 = vrcp.f32 %v3081_v27  ;;  %v13100_v2 = vadd.f32 %v12486_v58, %v2873_v48  ;;  %v10705_v48 = vpop.f32.mrf.mxu0 }
 0x14d   : > { %v6855_v20 = vshll.u32 %v13084_v29, 16  ;;  %v6848_v34 = vshrl.u32 %v12919_v25, 16  ;;  %v6852_v37 = vrot.slane %v6850_v38, 1  ;;  %v6071_v4 = vcombine.low %v12914_v24, %v12922_v8  ;;  %v11237_v27 = vpop.eup %11236 }
 0x14e   : > { %v13097_v44 = vmul.f32 %v16147_v31, %v3443_v62  ;;  %v6088_v55 = vcombine.low %v12940_v54, %v13046_v60  ;;  %11246 = vrcp.f32 %v3108_v21  ;;  %v3109_v53 = vadd.f32 1.0, %v11235_v59 }
 0x14f   : > { %v2874_v13 = vmul.f32 %v12465_v3, %v12951_v16  ;;  %v2875_v62 = vmul.f32 %v12465_v3, %v12984_v50  ;;  %v13114_v47 = vpack.c.bf16 %v6170_v61, %v6153_v33  ;;  %v6853_v18 = vor.u32 %v6852_v37, %v6848_v34  ;;  %v13127_v50 = vpop.f32.mrf.mxu0 }
 0x150   : > { %v6857_v49 = vrot.slane %v6855_v20, 1  ;;  %v13116_v30 = vpack.c.bf16 %v6088_v55, %v6071_v4  ;;  %v10140_v24 = vmul.f32 -1.442695, %v13100_v2  ;;  %v2876_v16 = vmul.f32 %v12465_v3, %v13000_v10 }
 0x151   : > { %v13120_v8 = vadd.f32 %v12486_v58, %v2874_v13  ;;  %v13123_v54 = vadd.f32 %v12486_v58, %v2875_v62  ;;  %11248 = vpow2.f32 %v10138_v12  ;;  %v6867_v28 = vshll.u32 %v13058_v32, 16  ;;  %v10708_v12 = vpop.f32.mrf.mxu0 }
 0x152   : > { %16148 = vst [vmem:[#allocation48_spill] sm:$0xff] %v13116_v30  ;;  %v6858_v60 = vsel %vm6846_vm2, %v6853_v18, %v6857_v49  ;;  %10854 = vmatprep.mubr.msk.bf16.mxu0 %vm7056_vm3, %v13116_v30  ;;  %v6862_v21 = vshll.u32 %v13116_v30, 16  ;;  %11250 = vrcp.f32 %v3109_v53  ;;  %v13137_v33 = vadd.f32 %v12486_v58, %v2876_v16 }
 0x153   : > { %10746 = vmatprep.mubr.msk.bf16.mxu1 %vm7056_vm3, %v6858_v60  ;;  %v10141_v59 = vmul.f32 -1.442695, %v13120_v8  ;;  %10855 = vmatmul.mubr.msk.bf16.vlgmr.msra.gmra.mxu0 %vm7056_vm3, %v13066_v5  ;;  %v2877_v10 = vmul.f32 %v12465_v3, %v13021_v45  ;;  %v16149_v61 = vrot.slane %v12341_v9, %v12409_v7  ;;  %11252 = vpow2.f32 %v10139_v46  ;;  %v13156_v45 = vpop.f32.mrf.mxu0 }
 0x154   : > { %v6860_v31 = vshrl.u32 %v13116_v30, 16  ;;  %v6864_v20 = vrot.slane %v6862_v21, 1  ;;  %10858 = vmatprep.mubr.msk.bf16.mxu0 %vm7056_vm3, %v13114_v47  ;;  %v11239_v34 = vpop.eup %11238  ;;  %v13150_v37 = vmul.f32 %v11237_v27, %v12813_v42  ;;  %11254 = vpow2.f32 %v10140_v24 }
 0x155   : > { %v5727_v38 = vmul.f32 %v16149_v61, %v3442_v40  ;;  %v10142_v4 = vmul.f32 -1.442695, %v13123_v54  ;;  %v13154_v3 = vadd.f32 %v12486_v58, %v2877_v10  ;;  %v3202_v46 = vmul.f32 %v11239_v34, %v12871_v51  ;;  %v10709_v18 = vpop.f32.mrf.mxu0 }
 0x156   : > { %v6865_v40 = vor.u32 %v6864_v20, %v6860_v31  ;;  %v6869_v55 = vrot.slane %v6867_v28, 1  ;;  %v10143_v53 = vmul.f32 -1.442695, %v13137_v33  ;;  %v11241_v13 = vpop.eup %11240  ;;  %v16150_v42 = vrot.slane %v12341_v9, %v12406_v6 }
 0x157   : > { %v6179_v48 = vcombine.low %v13091_v43, %v13097_v44  ;;  %11256 = vpow2.f32 %v10141_v59  ;;  %v10144_v58 = vmul.f32 -1.442695, %v13154_v3  ;;  %v3444_v49 = vcombine.high %v3202_v46, %v3202_v46  ;;  %v13178_v44 = vpop.f32.mrf.mxu0 }
 0x158   : > { %v5726_v62 = vmul.f32 %v16150_v42, %v13069_v57  ;;  %v3451_v51 = vrot.slane %v3202_v46, %v12424_v23  ;;  %v3203_v27 = vmul.f32 %v11241_v13, %v12957_v22  ;;  %v13170_v24 = vsel %vm6846_vm2, %v6865_v40, %v6869_v55  ;;  %v11243_v16 = vpop.eup %11242 }
 0x159   : > { %16151 = vst [vmem:[#allocation49_spill] sm:$0xff] %v13170_v24  ;;  %v3426_v9 = vcombine.high %v13017_v39, %v13017_v39  ;;  %v3920_v43 = vcombine.high %v13150_v37, %v13150_v37  ;;  %11258 = vpow2.f32 %v10142_v4  ;;  %10747 = vmatmul.mubr.msk.bf16.vlgmr.msra.gmra.mxu1 %vm7056_vm3, %v13170_v24  ;;  %v11245_v60 = vpop.eup %11244  ;;  %v3458_v22 = vrot.slane %v3444_v49, %v12424_v23  ;;  %v10712_v12 = vpop.f32.mrf.mxu0 }
 0x15a   : > { %v6178_v57 = vcombine.low %v5726_v62, %v5727_v38  ;;  %v3459_v21 = vcombine.high %v3451_v51, %v3451_v51  ;;  %v3461_v28 = vcombine.high %v3203_v27, %v3203_v27  ;;  %11260 = vpow2.f32 %v10143_v53 }
 0x15b   : > { %v6193_v59 = vrot.slane %v6179_v48, %v12424_v23  ;;  %v13183_v39 = vrot.slane %v3203_v27, %v12424_v23  ;;  %v3204_v10 = vmul.f32 %v11245_v60, %v12979_v35  ;;  %11262 = vpow2.f32 %v10144_v58  ;;  %v11247_v61 = vpop.eup %11246  ;;  %v13196_v13 = vpop.f32.mrf.mxu0 }
 0x15c   : > { %v3460_v38 = vcombine.high %v3458_v22, %v3458_v22  ;;  %v16152_v31 = vrot.slane %v12343_v11, %v12406_v6  ;;  %v16153_v34 = vrot.slane %v12343_v11, %v12409_v7  ;;  %v3475_v46 = vrot.slane %v3461_v28, %v12424_v23 }
 0x15d   : > { %v3476_v40 = vcombine.high %v13183_v39, %v13183_v39  ;;  %v3478_v55 = vcombine.high %v3204_v10, %v3204_v10  ;;  %v3485_v35 = vrot.slane %v3204_v10, %v12424_v23  ;;  %v3082_v53 = vadd.f32 1.0, %v11243_v16 }
 0x15e   : > { %v5730_v20 = vmul.f32 %v16152_v31, %v3451_v51  ;;  %v5731_v4 = vmul.f32 %v16153_v34, %v3459_v21  ;;  %v16154_v42 = vrot.slane %v12343_v11, %v12412_v14  ;;  %v16155_v48 = vrot.slane %v12343_v11, %v12415_v15  ;;  %v11249_v51 = vpop.eup %11248  ;;  %v10713_v11 = vpop.f32.mrf.mxu0 }
 0x15f   : > { %v3477_v49 = vcombine.high %v3475_v46, %v3475_v46  ;;  %v16156_v27 = vrot.slane %v12330_v63, %v12406_v6  ;;  %v6186_v16 = vrot.slane %v6178_v57, %v12424_v23  ;;  %v16157_v21 = vrot.slane %v12345_v17, %v12406_v6  ;;  %v11251_v12 = vpop.eup %11250 }
 0x160   : > { %v5732_v62 = vmul.f32 %v16154_v42, %v3458_v22  ;;  %v5733_v58 = vmul.f32 %v16155_v48, %v3460_v38  ;;  %v6195_v18 = vcombine.low %v5730_v20, %v5731_v4  ;;  %v16158_v22 = vrot.slane %v12345_v17, %v12409_v7  ;;  %v11253_v20 = vpop.eup %11252 }
 0x161   : > { %v13207_v60 = vmul.f32 %v16156_v27, %v3426_v9  ;;  %v5735_v28 = vmul.f32 %v16157_v21, %v3476_v40  ;;  %v13217_v31 = vrot.slane %v3920_v43, %v12424_v23  ;;  %v3492_v63 = vrot.slane %v3478_v55, %v12424_v23  ;;  %v11255_v43 = vpop.eup %11254 }
 0x162   : > { %v5736_v10 = vmul.f32 %v16158_v22, %v3475_v46  ;;  %v6196_v38 = vcombine.low %v5732_v62, %v5733_v58  ;;  %v3493_v9 = vcombine.high %v3485_v35, %v3485_v35  ;;  %v6194_v34 = vcombine.low %v6186_v16, %v6193_v59  ;;  %v13230_v62 = vpop.f32.mrf.mxu0  ;;  %v13237_v59 = vld [vmem:[%s15949_s3] ss:$0 sm:$0xff]  ;;  %v16162_v58 = vld [vmem:[#allocation43_spill] sm:$0xff] }
 0x163   : > { %v16159_v57 = vrot.slane %v12345_v17, %v12412_v14  ;;  %v16160_v40 = vrot.slane %v12345_v17, %v12415_v15  ;;  %v13228_v46 = vrot.slane %v13150_v37, %v12424_v23  ;;  %v6203_v55 = vrot.slane %v6195_v18, %v12424_v23  ;;  %v16163_v22 = vld [vmem:[#allocation5_spill] sm:$0xff] }
 0x164   : > { %v6210_v48 = vrot.slane %v6196_v38, %v12424_v23  ;;  %11264 = vrcp.f32 %v3082_v53  ;;  %v2878_v17 = vmul.f32 %v13237_v59, %v13056_v36  ;;  %v3231_v37 = vmul.f32 %v11247_v61, %v16162_v58  ;;  %v10716_v16 = vpop.f32.mrf.mxu0  ;;  %v11257_v18 = vpop.eup %11256 }
 0x165   : > { %v5737_v4 = vmul.f32 %v16159_v57, %v3477_v49  ;;  %v5738_v42 = vmul.f32 %v16160_v40, %v3485_v35  ;;  %16161 = vst [vmem:[#allocation50_spill] sm:$0xff] %v13228_v46  ;;  %v6219_v35 = vcombine.low %v5735_v28, %v5736_v10  ;;  %v3083_v49 = vadd.f32 1.0, %v11249_v51 }
 0x166   : > { %v6136_v27 = vrot.slane %v13064_v56, %v12424_v23  ;;  %v6211_v21 = vcombine.low %v6203_v55, %v6210_v48  ;;  %v16164_v53 = vrot.slane %v16163_v22, %v12406_v6  ;;  %v16165_v38 = vrot.slane %v16163_v22, %v12409_v7  ;;  %v13250_v51 = vpop.f32.mrf.mxu0  ;;  %v11259_v10 = vpop.eup %11258 }
 0x167   : > { %v3084_v40 = vadd.f32 1.0, %v11253_v20  ;;  %v3494_v36 = vcombine.high %v3492_v63, %v3492_v63  ;;  %v6220_v28 = vcombine.low %v5737_v4, %v5738_v42  ;;  %11266 = vrcp.f32 %v3083_v49  ;;  %v16166_v42 = vld [vmem:[#allocation6_spill] sm:$0xff] }
 0x168   : > { %v5739_v11 = vmul.f32 %v16164_v53, %v3493_v9  ;;  %v5740_v57 = vmul.f32 %v16165_v38, %v3492_v63  ;;  %v3085_v61 = vadd.f32 1.0, %v11255_v43  ;;  %v13252_v56 = vpack.c.bf16 %v6211_v21, %v6194_v34  ;;  %v11261_v9 = vpop.eup %11260  ;;  %v10717_v20 = vpop.f32.mrf.mxu0 }
 0x169   : > { %v3232_v55 = vmul.f32 %v11251_v12, %v12982_v19  ;;  %11268 = vrcp.f32 %v3084_v40  ;;  %v6872_v48 = vshrl.u32 %v13066_v5, 16  ;;  %v3937_v58 = vcombine.high %v3231_v37, %v3231_v37  ;;  %v11263_v4 = vpop.eup %11262  ;;  %v16171_v20 = vld [vmem:[#allocation41_spill] sm:$0xff] }
 0x16a   : > { %v3944_v16 = vrot.slane %v3231_v37, %v12424_v23  ;;  %11270 = vrcp.f32 %v3085_v61  ;;  %v3935_v63 = vcombine.high %v13228_v46, %v13228_v46  ;;  %v16167_v34 = vrot.slane %v16166_v42, %v12406_v6  ;;  %10859 = vmatmul.mubr.msk.bf16.gmra.mxu0 %vm7056_vm3, %v13252_v56  ;;  %v13283_v38 = vpop.f32.mrf.mxu0 }
 0x16b   : > { %v13266_v19 = vrot.slane %v6219_v35, %v12424_v23  ;;  %v6236_v12 = vcombine.low %v5739_v11, %v5740_v57  ;;  %v13268_v49 = vpack.c.bf16 %v6136_v27, %v6136_v27  ;;  %v13273_v37 = vrot.slane %v6220_v28, %v12424_v23 }
 0x16c   : > { %v13263_v43 = vmul.f32 %v16167_v34, %v13183_v39  ;;  %v16169_v21 = vrot.slane %v16163_v22, %v12412_v14  ;;  %v6874_v39 = vshll.u32 %v13066_v5, 16  ;;  %v3936_v35 = vcombine.high %v13217_v31, %v13217_v31  ;;  %v10720_v24 = vpop.f32.mrf.mxu0 }
 0x16d   : > { %16168 = vst [vmem:[#allocation43_spill] sm:$0xff] %v13268_v49  ;;  %v13286_v27 = vrot.slane %v3232_v55, %v12424_v23  ;;  %v3086_v11 = vadd.f32 1.0, %v11257_v18  ;;  %v3087_v57 = vadd.f32 1.0, %v11259_v10  ;;  %v6879_v40 = vshll.u32 %v13268_v49, 16  ;;  %v13299_v55 = vld [vmem:[%s15950_s4] ss:$0 sm:$0xff] }
 0x16e   : > { %v13278_v53 = vmul.f32 %v16169_v21, %v3494_v36  ;;  %v3088_v28 = vadd.f32 1.0, %v11261_v9  ;;  %v6876_v61 = vrot.slane %v6874_v39, 1  ;;  %v16172_v36 = vrot.slane %v16171_v20, %v12406_v6  ;;  %v13311_v46 = vpop.f32.mrf.mxu0 }
 0x16f   : > { %16170 = vst [vmem:[#allocation5_spill] sm:$0xff] %v13286_v27  ;;  %v16173_v34 = vrot.slane %v16171_v20, %v12409_v7  ;;  %v13302_v18 = vadd.f32 %v13299_v55, %v2878_v17  ;;  %v6881_v10 = vrot.slane %v6879_v40, 1  ;;  %v16174_v9 = vrot.slane %v16171_v20, %v12412_v14 }
 0x170   : > { %v5843_v42 = vmul.f32 %v16172_v36, %v3935_v63  ;;  %v16175_v63 = vrot.slane %v16171_v20, %v12415_v15  ;;  %v6877_v29 = vor.u32 %v6876_v61, %v6872_v48  ;;  %v3951_v24 = vrot.slane %v3937_v58, %v12424_v23  ;;  %v16177_v61 = vld [vmem:[#allocation42_spill] sm:$0xff] }
 0x171   : > { %v5844_v21 = vmul.f32 %v16173_v34, %v13217_v31  ;;  %v5845_v39 = vmul.f32 %v16174_v9, %v3936_v35  ;;  %v3952_v34 = vcombine.high %v3944_v16, %v3944_v16  ;;  %v13314_v49 = vrot.slane %v6236_v12, %v12424_v23  ;;  %v11265_v5 = vpop.eup %11264 }
 0x172   : > { %v5846_v36 = vmul.f32 %v16175_v63, %v3944_v16  ;;  %11272 = vrcp.f32 %v3086_v11  ;;  %v3089_v17 = vadd.f32 1.0, %v11263_v4  ;;  %v13317_v35 = vsel %vm6846_vm2, %v6877_v29, %v6881_v10 }
 0x173   : > { %v6711_v31 = vcombine.low %v5843_v42, %v5844_v21  ;;  %16176 = vst [vmem:[#allocation6_spill] sm:$0xff] %v13317_v35  ;;  %v3953_v48 = vcombine.high %v3951_v24, %v3951_v24  ;;  %v16178_v58 = vrot.slane %v16177_v61, %v12415_v15  ;;  %v10721_v42 = vpop.f32.mrf.mxu0  ;;  %v3205_v12 = vmul.f32 %v11265_v5, %v13043_v0 }
 0x174   : > { %v6712_v40 = vcombine.low %v5845_v39, %v5846_v36  ;;  %11274 = vrcp.f32 %v3087_v57  ;;  %v10145_v4 = vmul.f32 -1.442695, %v13302_v18  ;;  %10750 = vmatprep.mubr.msk.bf16.mxu1 %vm7056_vm3, %v13317_v35  ;;  %v16179_v11 = vrot.slane %v16177_v61, %v12406_v6  ;;  %v11267_v57 = vpop.eup %11266 }
 0x175   : > { %v13320_v20 = vrot.slane %v6711_v31, %v12424_v23  ;;  %v13326_v16 = vmul.f32 %v16178_v58, %v13286_v27  ;;  %11276 = vrcp.f32 %v3088_v28  ;;  %v16180_v10 = vrot.slane %v16177_v61, %v12412_v14  ;;  %v13347_v5 = vpop.f32.mrf.mxu0 }
 0x176   : > { %v13333_v29 = vrot.slane %v6712_v40, %v12424_v23  ;;  %v13338_v21 = vmul.f32 %v16179_v11, %v3952_v34  ;;  %v2879_v0 = vmul.f32 %v13237_v59, %v13078_v26  ;;  %v3495_v39 = vcombine.high %v3205_v12, %v3205_v12  ;;  %v11269_v34 = vpop.eup %11268 }
 0x177   : > { %v13343_v9 = vmul.f32 %v16180_v10, %v3953_v48  ;;  %v13350_v63 = vrot.slane %v3205_v12, %v12424_v23  ;;  %v16181_v36 = vrot.slane %v16177_v61, %v12409_v7  ;;  %v6235_v40 = vcombine.low %v13266_v19, %v13273_v37  ;;  %v10724_v58 = vpop.f32.mrf.mxu0  ;;  %v11271_v42 = vpop.eup %11270 }
 0x178   : > { %v3206_v26 = vmul.f32 %v11267_v57, %v13051_v41  ;;  %11278 = vrcp.f32 %v3089_v17  ;;  %v3509_v12 = vrot.slane %v3495_v39, %v12424_v23  ;;  %v16182_v61 = vrot.slane %v16163_v22, %v12415_v15 }
 0x179   : > { %v13357_v31 = vmul.f32 %v16181_v36, %v3951_v24  ;;  %v3207_v11 = vmul.f32 %v11269_v34, %v13054_v52  ;;  %11280 = vpow2.f32 %v10145_v4  ;;  %v3208_v41 = vmul.f32 %v11271_v42, %v13100_v2  ;;  %v13375_v17 = vpop.f32.mrf.mxu0  ;;  %v16185_v4 = vld [vmem:[#allocation8_spill] sm:$0xff] }
 0x17a   : > { %v5742_v24 = vmul.f32 %v16182_v61, %v13350_v63  ;;  %v3512_v10 = vcombine.high %v3206_v26, %v3206_v26  ;;  %v3519_v19 = vrot.slane %v3206_v26, %v12424_v23  ;;  %v13373_v37 = vadd.f32 %v13299_v55, %v2879_v0  ;;  %16184 = vst [vmem:[#allocation42_spill] sm:$0xff] %v13375_v17 }
 0x17b   : > { %v3511_v57 = vcombine.high %v3509_v12, %v3509_v12  ;;  %v13382_v52 = vmul.f32 %v13237_v59, %v13103_v1  ;;  %v16186_v36 = vrot.slane %v16185_v4, %v12406_v6  ;;  %v3529_v26 = vcombine.high %v3207_v11, %v3207_v11  ;;  %v10725_v58 = vpop.f32.mrf.mxu0 }
 0x17c   : > { %16183 = vst [vmem:[#allocation41_spill] sm:$0xff] %v13373_v37  ;;  %v6237_v39 = vcombine.low %v13278_v53, %v5742_v24  ;;  %v3526_v2 = vrot.slane %v3512_v10, %v12424_v23  ;;  %v3527_v0 = vcombine.high %v3519_v19, %v3519_v19  ;;  %v16187_v42 = vrot.slane %v16185_v4, %v12409_v7 }
 0x17d   : > { %v5744_v34 = vmul.f32 %v16186_v36, %v3509_v12  ;;  %v16188_v24 = vrot.slane %v16185_v4, %v12412_v14  ;;  %v3536_v28 = vrot.slane %v3207_v11, %v12424_v23  ;;  %v16189_v12 = vrot.slane %v16185_v4, %v12415_v15  ;;  %v13402_v22 = vpop.f32.mrf.mxu0 }
 0x17e   : > { %v5745_v53 = vmul.f32 %v16187_v42, %v3511_v57  ;;  %v6251_v61 = vrot.slane %v6237_v39, %v12424_v23  ;;  %v3528_v48 = vcombine.high %v3526_v2, %v3526_v2  ;;  %v13400_v36 = vrot.slane %v3529_v26, %v12424_v23  ;;  %16190 = vst [vmem:[#allocation8_spill] sm:$0xff] %v13402_v22  ;;  %v16191_v39 = vld [vmem:[#allocation9_spill] sm:$0xff] }
 0x17f   : > { %v5746_v1 = vmul.f32 %v16188_v24, %v3519_v19  ;;  %v5747_v10 = vmul.f32 %v16189_v12, %v3527_v0  ;;  %v3546_v58 = vcombine.high %v3208_v41, %v3208_v41  ;;  %v16192_v42 = vrot.slane %v16191_v39, %v12406_v6  ;;  %v11273_v24 = vpop.eup %11272  ;;  %v10728_v32 = vpop.f32.mrf.mxu0 }
 0x180   : > { %v6252_v57 = vcombine.low %v13314_v49, %v6251_v61  ;;  %v3544_v19 = vcombine.high %v3536_v28, %v3536_v28  ;;  %v13409_v11 = vmul.f32 -1.442695, %v13373_v37  ;;  %v6260_v25 = vcombine.low %v5744_v34, %v5745_v53 }
 0x181   : > { %v5748_v35 = vmul.f32 %v16192_v42, %v3526_v2  ;;  %v16193_v4 = vrot.slane %v16191_v39, %v12409_v7  ;;  %v6261_v26 = vcombine.low %v5746_v1, %v5747_v10  ;;  %v3545_v12 = vcombine.high %v13400_v36, %v13400_v36  ;;  %v11275_v53 = vpop.eup %11274 }
 0x182   : > { %v13416_v49 = vpack.c.bf16 %v6252_v57, %v6235_v40  ;;  %v16194_v2 = vrot.slane %v16191_v39, %v12412_v14  ;;  %v16195_v42 = vrot.slane %v16191_v39, %v12415_v15  ;;  %v3553_v34 = vrot.slane %v3208_v41, %v12424_v23  ;;  %v13430_v57 = vpop.f32.mrf.mxu0  ;;  %v11277_v27 = vpop.eup %11276 }
 0x183   : > { %v5749_v0 = vmul.f32 %v16193_v4, %v3528_v48  ;;  %v6275_v48 = vrot.slane %v6261_v26, %v12424_v23  ;;  %v3560_v10 = vrot.slane %v3546_v58, %v12424_v23  ;;  %v16196_v4 = vld [vmem:[#allocation10_spill] sm:$0xff]  ;;  %16198 = vst [vmem:[#allocation9_spill] sm:$0xff] %v13430_v57  ;;  %v3209_v41 = vmul.f32 %v11273_v24, %v13120_v8 }
 0x184   : > { %v5750_v61 = vmul.f32 %v16194_v2, %v3536_v28  ;;  %v5751_v30 = vmul.f32 %v16195_v42, %v3544_v19  ;;  %v16197_v32 = vrot.slane %v16196_v4, %v12406_v6  ;;  %v3561_v2 = vcombine.high %v3553_v34, %v3553_v34  ;;  %10862 = vmatprep.mubr.msk.bf16.mxu0 %vm7056_vm3, %v13416_v49 }
 0x185   : > { %v6277_v1 = vcombine.low %v5748_v35, %v5749_v0  ;;  %v16199_v39 = vrot.slane %v16196_v4, %v12409_v7  ;;  %v6268_v35 = vrot.slane %v6260_v25, %v12424_v23  ;;  %v3562_v0 = vcombine.high %v3560_v10, %v3560_v10 }
 0x186   : > { %v5753_v40 = vmul.f32 %v16197_v32, %v3545_v12  ;;  %v6278_v28 = vcombine.low %v5750_v61, %v5751_v30  ;;  %v16200_v26 = vrot.slane %v16196_v4, %v12415_v15  ;;  %v10729_v30 = vpop.f32.mrf.mxu0  ;;  %v11279_v61 = vpop.eup %11278  ;;  %v3563_v32 = vcombine.high %v3209_v41, %v3209_v41 }
 0x187   : > { %v5754_v19 = vmul.f32 %v16199_v39, %v3553_v34  ;;  %v6285_v58 = vrot.slane %v6277_v1, %v12424_v23  ;;  %v16201_v34 = vrot.slane %v16196_v4, %v12412_v14  ;;  %v11281_v39 = vpop.eup %11280  ;;  %v6276_v57 = vcombine.low %v6268_v35, %v6275_v48  ;;  %v16202_v1 = vld [vmem:[#allocation11_spill] sm:$0xff] }
 0x188   : > { %v5756_v12 = vmul.f32 %v16200_v26, %v3560_v10  ;;  %v6292_v42 = vrot.slane %v6278_v28, %v12424_v23  ;;  %v3570_v25 = vrot.slane %v3209_v41, %v12424_v23  ;;  %v16203_v37 = vrot.slane %v16202_v1, %v12406_v6  ;;  %v13452_v26 = vpop.f32.mrf.mxu0 }
 0x189   : > { %v5755_v8 = vmul.f32 %v16201_v34, %v3561_v2  ;;  %v6301_v24 = vcombine.low %v5753_v40, %v5754_v19  ;;  %v3210_v10 = vmul.f32 %v11275_v53, %v13123_v54  ;;  %v13455_v17 = vrot.slane %v3563_v32, %v12424_v23 }
 0x18a   : > { %v5757_v22 = vmul.f32 %v16203_v37, %v3562_v0  ;;  %v6293_v30 = vcombine.low %v6285_v58, %v6292_v42  ;;  %v3211_v4 = vmul.f32 %v11277_v27, %v13137_v33  ;;  %v3578_v40 = vcombine.high %v3570_v25, %v3570_v25  ;;  %v10732_v37 = vpop.f32.mrf.mxu0 }
 0x18b   : > { %v6302_v28 = vcombine.low %v5755_v8, %v5756_v12  ;;  %v16204_v48 = vrot.slane %v16202_v1, %v12409_v7  ;;  %v3580_v19 = vcombine.high %v3210_v10, %v3210_v10  ;;  %v3587_v41 = vrot.slane %v3210_v10, %v12424_v23 }
 0x18c   : > { %v13462_v35 = vpack.c.bf16 %v6293_v30, %v6276_v57  ;;  %v6309_v54 = vrot.slane %v6301_v24, %v12424_v23  ;;  %v16205_v58 = vrot.slane %v16202_v1, %v12415_v15  ;;  %v16206_v27 = vrot.slane %v16202_v1, %v12412_v14  ;;  %v13474_v8 = vpop.f32.mrf.mxu0  ;;  %v16208_v30 = vld [vmem:[#allocation14_spill] sm:$0xff] }
 0x18d   : > { %v5758_v2 = vmul.f32 %v16204_v48, %v3570_v25  ;;  %v6316_v53 = vrot.slane %v6302_v28, %v12424_v23  ;;  %v3594_v42 = vrot.slane %v3580_v19, %v12424_v23  ;;  %v3595_v34 = vcombine.high %v3587_v41, %v3587_v41 }
 0x18e   : > { %v5760_v33 = vmul.f32 %v16205_v58, %v13455_v17  ;;  %v5759_v0 = vmul.f32 %v16206_v27, %v3578_v40  ;;  %v3510_v57 = vcombine.high %v13350_v63, %v13350_v63  ;;  %v3597_v32 = vcombine.high %v3211_v4, %v3211_v4  ;;  %10863 = vmatmul.mubr.msk.bf16.gmra.mxu0 %vm7056_vm3, %v13462_v35 }
 0x18f   : > { %v6318_v12 = vcombine.low %v5757_v22, %v5758_v2  ;;  %v6317_v24 = vcombine.low %v6309_v54, %v6316_v53  ;;  %v16207_v25 = vcombine.low %v13338_v21, %v13357_v31  ;;  %v3596_v22 = vcombine.high %v3594_v42, %v3594_v42  ;;  %v10733_v2 = vpop.f32.mrf.mxu0  ;;  %v11166_v54 = vld [vmem:[%s15951_s5 + $0x8] sm:$0xff]  }
 0x190   : > { %v6319_v1 = vcombine.low %v5759_v0, %v5760_v33  ;;  %v16209_v28 = vrot.slane %v16208_v30, %v12406_v6  ;;  %v16210_v48 = vrot.slane %v16208_v30, %v12409_v7  ;;  %v3604_v37 = vrot.slane %v3211_v4, %v12424_v23  ;;  %10778 = vmatprep.subr.bf16.mxu1 %v11166_v54 }
 0x191   : > { %v6736_v10 = vrot.slane %v16207_v25, %v12424_v23  ;;  %v6326_v19 = vrot.slane %v6318_v12, %v12424_v23  ;;  %v3611_v21 = vrot.slane %v3597_v32, %v12424_v23  ;;  %v3212_v31 = vmul.f32 %v11279_v61, %v13154_v3  ;;  %v16213_v32 = vld [vmem:[#allocation15_spill] sm:$0xff]  ;;  %10779 = vmatpush3.bf16.msra.mxu1 %v11166_v54 }
 0x192   : > { %v5762_v40 = vmul.f32 %v16209_v28, %v3587_v41  ;;  %v5763_v63 = vmul.f32 %v16210_v48, %v3595_v34  ;;  %v6333_v53 = vrot.slane %v6319_v1, %v12424_v23  ;;  %v16211_v41 = vrot.slane %v16208_v30, %v12412_v14 }
 0x193   : > { %v16212_v33 = vrot.slane %v16208_v30, %v12415_v15  ;;  %v3090_v0 = vadd.f32 1.0, %v11281_v39  ;;  %v3612_v12 = vcombine.high %v3604_v37, %v3604_v37  ;;  %v3613_v34 = vcombine.high %v3611_v21, %v3611_v21  ;;  %v11167_v39 = vld [vmem:[%s15951_s5] sm:$0xff]  }
 0x194   : > { %v5764_v58 = vmul.f32 %v16211_v41, %v3594_v42  ;;  %v6342_v4 = vcombine.low %v5762_v40, %v5763_v63  ;;  %v16214_v3 = vrot.slane %v16213_v32, %v12406_v6  ;;  %v6334_v25 = vcombine.low %v6326_v19, %v6333_v53  ;;  %10780 = vmatprep.subr.bf16.mxu1 %v11167_v39 }
 0x195   : > { %v5765_v27 = vmul.f32 %v16212_v33, %v3596_v22  ;;  %v16215_v1 = vrot.slane %v16213_v32, %v12412_v14  ;;  %v3614_v42 = vcombine.high %v3212_v31, %v3212_v31  ;;  %v16216_v22 = vrot.slane %v16213_v32, %v12409_v7  ;;  %10781 = vmatpush3.bf16.msra.mxu1 %v11167_v39  ;;  %v11168_v39 = vld [vmem:[%s15951_s5 + $0x58] sm:$0xff]  }
 0x196   : > { %v5766_v61 = vmul.f32 %v16214_v3, %v3604_v37  ;;  %v16217_v40 = vrot.slane %v16213_v32, %v12415_v15  ;;  %v3621_v2 = vrot.slane %v3212_v31, %v12424_v23  ;;  %11282 = vrcp.f32 %v3090_v0  ;;  %10922 = vmatprep.subr.bf16.mxu0 %v11168_v39 }
 0x197   : > { %v6343_v28 = vcombine.low %v5764_v58, %v5765_v27  ;;  %v5768_v48 = vmul.f32 %v16215_v1, %v3611_v21  ;;  %v5767_v30 = vmul.f32 %v16216_v22, %v3612_v12  ;;  %v3579_v19 = vcombine.high %v13455_v17, %v13455_v17  ;;  %10923 = vmatpush3.bf16.msra.mxu0 %v11168_v39 }
 0x198   : > { %v5769_v63 = vmul.f32 %v16217_v40, %v3613_v34  ;;  %v13522_v37 = vpack.c.bf16 %v6334_v25, %v6317_v24  ;;  %v3628_v21 = vrot.slane %v3614_v42, %v12424_v23  ;;  %v16218_v54 = vcombine.low %v13343_v9, %v13326_v16  ;;  %v16219_v24 = vld [vmem:[#allocation7_spill] sm:$0xff] }
 0x199   : > { %v6357_v41 = vrot.slane %v6343_v28, %v12424_v23  ;;  %v6359_v58 = vcombine.low %v5766_v61, %v5767_v30  ;;  %v6177_v31 = vrot.slane %v13207_v60, %v12424_v23  ;;  %v6218_v17 = vrot.slane %v13263_v43, %v12424_v23  ;;  %v16221_v60 = vld [vmem:[#allocation12_spill] sm:$0xff] }
 0x19a   : > { %v6743_v53 = vrot.slane %v16218_v54, %v12424_v23  ;;  %v6360_v33 = vcombine.low %v5768_v48, %v5769_v63  ;;  %v16220_v27 = vrot.slane %v16219_v24, %v12406_v6  ;;  %v3629_v12 = vcombine.high %v3621_v2, %v3621_v2  ;;  %10866 = vmatprep.mubr.msk.bf16.mxu0 %vm7056_vm3, %v13522_v37 }
 0x19b   : > { %v6350_v16 = vrot.slane %v6342_v4, %v12424_v23  ;;  %v6367_v9 = vrot.slane %v6359_v58, %v12424_v23  ;;  %v3630_v3 = vcombine.high %v3628_v21, %v3628_v21  ;;  %v16222_v43 = vrot.slane %v16221_v60, %v12406_v6 }
 0x19c   : > { %v5743_v0 = vmul.f32 %v16220_v27, %v3510_v57  ;;  %v6744_v34 = vcombine.low %v6736_v10, %v6743_v53  ;;  %v6374_v32 = vrot.slane %v6360_v33, %v12424_v23  ;;  %v16223_v57 = vld [vmem:[#allocation13_spill] sm:$0xff]  ;;  %v16225_v4 = vcombine.low %v13320_v20, %v13333_v29  ;;  %v11169_v20 = vld [vmem:[%s15951_s5 + $0x28] sm:$0xff]   ;;  %v11170_v29 = vld [vmem:[%s15951_s5 + $0x50] sm:$0xff]  }
 0x19d   : > { %v13546_v61 = vmul.f32 %v16222_v43, %v13400_v36  ;;  %v16224_v10 = vrot.slane %v16223_v57, %v12406_v6  ;;  %11284 = vpow2.f32 %v13409_v11  ;;  %v6358_v1 = vcombine.low %v6350_v16, %v6357_v41  ;;  %v16226_v11 = vld [vmem:[#allocation18_spill] sm:$0xff]  ;;  %10814 = vmatprep.subr.bf16.mxu1 %v11169_v20  ;;  %10924 = vmatprep.subr.bf16.mxu0 %v11170_v29 }
 0x19e   : > { %v13556_v28 = vpack.c.bf16 %v6744_v34, %v16225_v4  ;;  %v6375_v48 = vcombine.low %v6367_v9, %v6374_v32  ;;  %v13561_v42 = vadd.f32 %v13299_v55, %v13382_v52  ;;  %v13563_v36 = vpack.c.bf16 %v6177_v31, %v6177_v31  ;;  %v16228_v52 = vld [vmem:[#allocation16_spill] sm:$0xff]  ;;  %10925 = vmatpush3.bf16.msra.mxu0 %v11170_v29 }
 0x19f   : > { %v13551_v25 = vmul.f32 %v16224_v10, %v3579_v19  ;;  %v16227_v22 = vrot.slane %v16226_v11, %v12406_v6  ;;  %v16229_v40 = vrot.slane %v16228_v52, %v12406_v6  ;;  %v16230_v19 = vrot.slane %v16228_v52, %v12409_v7 }
 0x1a0   : > { %v6886_v53 = vshll.u32 %v13114_v47, 16  ;;  %v13586_v41 = vpack.c.bf16 %v6375_v48, %v6358_v1  ;;  %v16231_v58 = vrot.slane %v16228_v52, %v12412_v14  ;;  %v6891_v31 = vshll.u32 %v13563_v36, 16 }
 0x1a1   : > { %v5770_v30 = vmul.f32 %v16227_v22, %v3621_v2  ;;  %v13580_v63 = vmul.f32 %v16229_v40, %v3629_v12  ;;  %v5772_v54 = vmul.f32 %v16230_v19, %v3628_v21  ;;  %v10147_v2 = vmul.f32 -1.442695, %v13561_v42 }
 0x1a2   : > { %v13591_v33 = vmul.f32 %v16231_v58, %v3630_v3  ;;  %v6884_v24 = vshrl.u32 %v13114_v47, 16  ;;  %v6888_v27 = vrot.slane %v6886_v53, 1  ;;  %v2881_v21 = vmul.f32 %v13237_v59, %v13127_v50  ;;  %10867 = vmatmul.mubr.msk.bf16.gmra.mxu0 %vm7056_vm3, %v13586_v41 }
 0x1a3   : > { %v2882_v12 = vmul.f32 %v13237_v59, %v13156_v45  ;;  %11286 = vpow2.f32 %v10147_v2  ;;  %v6893_v34 = vrot.slane %v6891_v31, 1  ;;  %v13600_v16 = vpack.c.bf16 %v6218_v17, %v6218_v17  ;;  %v11283_v10 = vpop.eup %11282 }
 0x1a4   : > { %v6896_v9 = vshrl.u32 %v13252_v56, 16  ;;  %v6889_v32 = vor.u32 %v6888_v27, %v6884_v24  ;;  %v13606_v3 = vadd.f32 %v13299_v55, %v2881_v21  ;;  %v6898_v45 = vshll.u32 %v13252_v56, 16 }
 0x1a5   : > { %v13609_v50 = vadd.f32 %v13299_v55, %v2882_v12  ;;  %v6903_v60 = vshll.u32 %v13600_v16, 16  ;;  %v2883_v17 = vmul.f32 %v13237_v59, %v13178_v44  ;;  %v2884_v43 = vmul.f32 %v13237_v59, %v13196_v13 }
 0x1a6   : > { %v6259_v57 = vrot.slane %v5743_v0, %v12424_v23  ;;  %v13619_v4 = vsel %vm6846_vm2, %v6889_v32, %v6893_v34  ;;  %v10148_v1 = vmul.f32 -1.442695, %v13606_v3  ;;  %v6900_v39 = vrot.slane %v6898_v45, 1 }
 0x1a7   : > { %16232 = vst [vmem:[#allocation10_spill] sm:$0xff] %v13619_v4  ;;  %v10149_v48 = vmul.f32 -1.442695, %v13609_v50  ;;  %v6383_v20 = vcombine.low %v13580_v63, %v5772_v54  ;;  %v3213_v11 = vmul.f32 %v11283_v10, %v13302_v18  ;;  %10751 = vmatmul.mubr.msk.bf16.gmra.mxu1 %vm7056_vm3, %v13619_v4  ;;  %v13628_v44 = vadd.f32 %v13299_v55, %v2883_v17 }
 0x1a8   : > { %v13631_v13 = vadd.f32 %v13299_v55, %v2884_v43  ;;  %11288 = vpow2.f32 %v10148_v1  ;;  %v6901_v0 = vor.u32 %v6900_v39, %v6896_v9  ;;  %v6905_v22 = vrot.slane %v6903_v60, 1  ;;  %v16235_v1 = vld [vmem:[#allocation17_spill] sm:$0xff] }
 0x1a9   : > { %v13633_v40 = vpack.c.bf16 %v6259_v57, %v6259_v57  ;;  %v3631_v19 = vcombine.high %v3213_v11, %v3213_v11  ;;  %v3638_v29 = vrot.slane %v3213_v11, %v12424_v23  ;;  %11290 = vpow2.f32 %v10149_v48 }
 0x1aa   : > { %v10150_v18 = vmul.f32 -1.442695, %v13628_v44  ;;  %v13638_v63 = vsel %vm6846_vm2, %v6901_v0, %v6905_v22  ;;  %v10151_v54 = vmul.f32 -1.442695, %v13631_v13  ;;  %v6910_v53 = vshll.u32 %v13416_v49, 16  ;;  %v11285_v2 = vpop.eup %11284 }
 0x1ab   : > { %16233 = vst [vmem:[#allocation11_spill] sm:$0xff] %v13638_v63  ;;  %v6915_v58 = vshll.u32 %v13633_v40, 16  ;;  %v13644_v31 = vrot.slane %v3631_v19, %v12424_v23  ;;  %v3646_v24 = vcombine.high %v3638_v29, %v3638_v29  ;;  %v16234_v27 = vrot.slane %v16228_v52, %v12415_v15  ;;  %10754 = vmatprep.mubr.msk.bf16.mxu1 %vm7056_vm3, %v13638_v63 }
 0x1ac   : > { %11292 = vpow2.f32 %v10150_v18  ;;  %v3091_v12 = vadd.f32 1.0, %v11285_v2  ;;  %v6908_v34 = vshrl.u32 %v13416_v49, 16  ;;  %v6912_v9 = vrot.slane %v6910_v53, 1 }
 0x1ad   : > { %v5774_v21 = vmul.f32 %v16234_v27, %v3638_v29  ;;  %11294 = vpow2.f32 %v10151_v54  ;;  %v13653_v32 = vrot.slane %v5770_v30, %v12424_v23  ;;  %v13656_v45 = vrot.slane %v6383_v20, %v12424_v23 }
 0x1ae   : > { %v6917_v17 = vrot.slane %v6915_v58, 1  ;;  %11296 = vrcp.f32 %v3091_v12  ;;  %v6913_v52 = vor.u32 %v6912_v9, %v6908_v34  ;;  %v2885_v43 = vmul.f32 %v13237_v59, %v13230_v62 }
 0x1af   : > { %v6384_v60 = vcombine.low %v13591_v33, %v5774_v21  ;;  %v2886_v57 = vmul.f32 %v13237_v59, %v13250_v51  ;;  %v3647_v10 = vcombine.high %v13644_v31, %v13644_v31  ;;  %v16236_v30 = vrot.slane %v16235_v1, %v12406_v6 }
 0x1b0   : > { %v2887_v33 = vmul.f32 %v13237_v59, %v13283_v38  ;;  %v11287_v20 = vpop.eup %11286  ;;  %v13676_v62 = vsel %vm6846_vm2, %v6913_v52, %v6917_v17  ;;  %v13679_v51 = vadd.f32 %v13299_v55, %v2885_v43  ;;  %v6300_v0 = vrot.slane %v13546_v61, %v12424_v23 }
 0x1b1   : > { %v13668_v48 = vmul.f32 %v16236_v30, %v3646_v24  ;;  %v13671_v39 = vrot.slane %v6384_v60, %v12424_v23  ;;  %16237 = vst [vmem:[#allocation14_spill] sm:$0xff] %v13676_v62  ;;  %v13682_v11 = vadd.f32 %v13299_v55, %v2886_v57  ;;  %v16238_v22 = vrot.slane %v16235_v1, %v12409_v7 }
 0x1b2   : > { %v3092_v29 = vadd.f32 1.0, %v11287_v20  ;;  %10755 = vmatmul.mubr.msk.bf16.gmra.mxu1 %vm7056_vm3, %v13676_v62  ;;  %v13697_v18 = vadd.f32 %v13299_v55, %v2887_v33  ;;  %v10152_v54 = vmul.f32 -1.442695, %v13679_v51  ;;  %v13701_v53 = vpack.c.bf16 %v6300_v0, %v6300_v0  ;;  %v16247_v62 = vld [vmem:[#allocation20_spill] sm:$0xff] }
 0x1b3   : > { %v13690_v19 = vmul.f32 %v16238_v22, %v13644_v31  ;;  %v10153_v61 = vmul.f32 -1.442695, %v13682_v11  ;;  %v6920_v58 = vshrl.u32 %v13462_v35, 16  ;;  %v6922_v24 = vshll.u32 %v13462_v35, 16 }
 0x1b4   : > { %11298 = vrcp.f32 %v3092_v29  ;;  %v10154_v2 = vmul.f32 -1.442695, %v13697_v18  ;;  %v2888_v27 = vmul.f32 %v13237_v59, %v13311_v46  ;;  %v6927_v21 = vshll.u32 %v13701_v53, 16 }
 0x1b5   : > { %11300 = vpow2.f32 %v10152_v54  ;;  %v2889_v12 = vmul.f32 %v13237_v59, %v13347_v5  ;;  %v6341_v34 = vrot.slane %v13551_v25, %v12424_v23  ;;  %v11289_v9 = vpop.eup %11288  ;;  %v6924_v60 = vrot.slane %v6922_v24, 1  ;;  %v16239_v54 = vld [vmem:[#allocation42_spill] sm:$0xff] }
 0x1b6   : > { %11302 = vpow2.f32 %v10153_v61  ;;  %v13714_v17 = vadd.f32 %v13299_v55, %v2888_v27  ;;  %v6932_v52 = vshrl.u32 %v13522_v37, 16  ;;  %v11291_v43 = vpop.eup %11290  ;;  %v3093_v57 = vadd.f32 1.0, %v11289_v9 }
 0x1b7   : > { %11304 = vpow2.f32 %v10154_v2  ;;  %v6929_v46 = vrot.slane %v6927_v21, 1  ;;  %v13718_v30 = vadd.f32 %v13299_v55, %v2889_v12  ;;  %v3094_v33 = vadd.f32 1.0, %v11291_v43  ;;  %v16241_v43 = vld [vmem:[#allocation8_spill] sm:$0xff] }
 0x1b8   : > { %v6925_v5 = vor.u32 %v6924_v60, %v6920_v58  ;;  %v10155_v20 = vmul.f32 -1.442695, %v13714_v17  ;;  %v13721_v25 = vpack.c.bf16 %v6341_v34, %v6341_v34  ;;  %11306 = vrcp.f32 %v3093_v57 }
 0x1b9   : > { %v11293_v0 = vpop.eup %11292  ;;  %v10156_v22 = vmul.f32 -1.442695, %v13718_v30  ;;  %v6934_v29 = vshll.u32 %v13522_v37, 16  ;;  %v2890_v61 = vmul.f32 %v13237_v59, %v16239_v54  ;;  %11308 = vrcp.f32 %v3094_v33  ;;  %v16242_v33 = vld [vmem:[#allocation41_spill] sm:$0xff] }
 0x1ba   : > { %v11295_v2 = vpop.eup %11294  ;;  %v3095_v24 = vadd.f32 1.0, %v11293_v0  ;;  %v13728_v27 = vsel %vm6846_vm2, %v6925_v5, %v6929_v46  ;;  %v6939_v58 = vshll.u32 %v13721_v25, 16  ;;  %11310 = vpow2.f32 %v10155_v20 }
 0x1bb   : > { %16240 = vst [vmem:[#allocation15_spill] sm:$0xff] %v13728_v27  ;;  %v3096_v21 = vadd.f32 1.0, %v11295_v2  ;;  %10758 = vmatprep.mubr.msk.bf16.mxu1 %vm7056_vm3, %v13728_v27  ;;  %v6936_v12 = vrot.slane %v6934_v29, 1  ;;  %v13734_v34 = vadd.f32 %v13299_v55, %v2890_v61  ;;  %v11297_v9 = vpop.eup %11296  ;;  %v6400_v60 = vcombine.low %v13668_v48, %v13690_v19 }
 0x1bc   : > { %11312 = vrcp.f32 %v3095_v24  ;;  %v2891_v57 = vmul.f32 %v13237_v59, %v16241_v43  ;;  %v13742_v46 = vpack.c.bf16 %v13653_v32, %v13653_v32  ;;  %v3214_v5 = vmul.f32 %v11297_v9, %v16242_v33 }
 0x1bd   : > { %v6937_v0 = vor.u32 %v6936_v12, %v6932_v52  ;;  %v6941_v20 = vrot.slane %v6939_v58, 1  ;;  %v10157_v29 = vmul.f32 -1.442695, %v13734_v34  ;;  %v16243_v48 = vrot.slane %v16235_v1, %v12412_v14 }
 0x1be   : > { %11314 = vrcp.f32 %v3096_v21  ;;  %v13753_v54 = vadd.f32 %v13299_v55, %v2891_v57  ;;  %v6946_v32 = vshll.u32 %v13586_v41, 16  ;;  %v3648_v61 = vcombine.high %v3214_v5, %v3214_v5 }
 0x1bf   : > { %v5777_v19 = vmul.f32 %v16243_v48, %v3647_v10  ;;  %v13757_v2 = vrot.slane %v3214_v5, %v12424_v23  ;;  %11316 = vpow2.f32 %v10156_v22  ;;  %v13760_v52 = vsel %vm6846_vm2, %v6937_v0, %v6941_v20  ;;  %v16246_v20 = vld [vmem:[#allocation9_spill] sm:$0xff] }
 0x1c0   : > { %16244 = vst [vmem:[#allocation7_spill] sm:$0xff] %v13760_v52  ;;  %10759 = vmatmul.mubr.msk.bf16.gmra.mxu1 %vm7056_vm3, %v13760_v52  ;;  %v10158_v31 = vmul.f32 -1.442695, %v13753_v54  ;;  %v6944_v10 = vshrl.u32 %v13586_v41, 16  ;;  %v6948_v24 = vrot.slane %v6946_v32, 1  ;;  %v6951_v58 = vshll.u32 %v13742_v46, 16 }
 0x1c1   : > { %v11299_v21 = vpop.eup %11298  ;;  %v6408_v12 = vrot.slane %v6400_v60, %v12424_v23  ;;  %v3662_v9 = vrot.slane %v3648_v61, %v12424_v23  ;;  %v16245_v22 = vrot.slane %v16235_v1, %v12415_v15  ;;  %11318 = vpow2.f32 %v10157_v29 }
 0x1c2   : > { %v11301_v57 = vpop.eup %11300  ;;  %v3215_v5 = vmul.f32 %v11299_v21, %v13561_v42  ;;  %v6949_v0 = vor.u32 %v6948_v24, %v6944_v10  ;;  %v13778_v48 = vmul.f32 %v13237_v59, %v16246_v20  ;;  %11320 = vpow2.f32 %v10158_v31 }
 0x1c3   : > { %v5778_v43 = vmul.f32 %v16245_v22, %v13757_v2  ;;  %v11303_v60 = vpop.eup %11302  ;;  %v3664_v32 = vcombine.high %v3662_v9, %v3662_v9  ;;  %v6953_v38 = vrot.slane %v6951_v58, 1  ;;  %v3097_v22 = vadd.f32 1.0, %v11301_v57 }
 0x1c4   : > { %v11305_v52 = vpop.eup %11304  ;;  %v3665_v1 = vcombine.high %v3215_v5, %v3215_v5  ;;  %v3672_v29 = vrot.slane %v3215_v5, %v12424_v23  ;;  %v3098_v27 = vadd.f32 1.0, %v11303_v60  ;;  %v16248_v33 = vrot.slane %v16247_v62, %v12406_v6 }
 0x1c5   : > { %v6401_v61 = vcombine.low %v5777_v19, %v5778_v43  ;;  %v16249_v10 = vrot.slane %v16247_v62, %v12409_v7  ;;  %v13789_v19 = vsel %vm6846_vm2, %v6949_v0, %v6953_v38  ;;  %v11307_v31 = vpop.eup %11306  ;;  %11322 = vrcp.f32 %v3097_v22 }
 0x1c6   : > { %v5780_v42 = vmul.f32 %v16248_v33, %v3662_v9  ;;  %16250 = vst [vmem:[#allocation12_spill] sm:$0xff] %v13789_v19  ;;  %v3679_v58 = vrot.slane %v3665_v1, %v12424_v23  ;;  %v3680_v43 = vcombine.high %v3672_v29, %v3672_v29  ;;  %v3099_v57 = vadd.f32 1.0, %v11305_v52  ;;  %10762 = vmatprep.mubr.msk.bf16.mxu1 %vm7056_vm3, %v13789_v19  ;;  %v11309_v5 = vpop.eup %11308 }
 0x1c7   : > { %v5781_v24 = vmul.f32 %v16249_v10, %v3664_v32  ;;  %v6415_v21 = vrot.slane %v6401_v61, %v12424_v23  ;;  %v3216_v20 = vmul.f32 %v11307_v31, %v13606_v3  ;;  %11324 = vrcp.f32 %v3098_v27  ;;  %v13795_v60 = vpop.eup %11310  ;;  %v16254_v3 = vld [vmem:[#allocation21_spill] sm:$0xff] }
 0x1c8   : > { %v3681_v32 = vcombine.high %v3679_v58, %v3679_v58  ;;  %v16251_v38 = vrot.slane %v16247_v62, %v12412_v14  ;;  %v16252_v61 = vrot.slane %v16247_v62, %v12415_v15  ;;  %v3217_v1 = vmul.f32 %v11309_v5, %v13609_v50 }
 0x1c9   : > { %v6416_v9 = vcombine.low %v6408_v12, %v6415_v21  ;;  %v6424_v33 = vcombine.low %v5780_v42, %v5781_v24  ;;  %v11313_v22 = vpop.eup %11312  ;;  %v16253_v12 = vcombine.low %v13656_v45, %v13671_v39  ;;  %v16255_v27 = vrot.slane %v16254_v3, %v12406_v6 }
 0x1ca   : > { %v5782_v0 = vmul.f32 %v16251_v38, %v3672_v29  ;;  %v5783_v52 = vmul.f32 %v16252_v61, %v3680_v43  ;;  %v3682_v24 = vcombine.high %v3216_v20, %v3216_v20  ;;  %v3689_v21 = vrot.slane %v3216_v20, %v12424_v23 }
 0x1cb   : > { %v13807_v42 = vpack.c.bf16 %v6416_v9, %v16253_v12  ;;  %v5784_v10 = vmul.f32 %v16255_v27, %v3679_v58  ;;  %v16256_v29 = vrot.slane %v16254_v3, %v12409_v7  ;;  %v3699_v43 = vcombine.high %v3217_v1, %v3217_v1  ;;  %v11315_v5 = vpop.eup %11314 }
 0x1cc   : > { %v6425_v31 = vcombine.low %v5782_v0, %v5783_v52  ;;  %v3706_v50 = vrot.slane %v3217_v1, %v12424_v23  ;;  %v6432_v45 = vrot.slane %v6424_v33, %v12424_v23  ;;  %v3696_v39 = vrot.slane %v3682_v24, %v12424_v23  ;;  %v13822_v58 = vpop.eup %11316 }
 0x1cd   : > { %v5785_v62 = vmul.f32 %v16256_v29, %v3681_v32  ;;  %v3697_v9 = vcombine.high %v3689_v21, %v3689_v21  ;;  %v3218_v38 = vmul.f32 %v11313_v22, %v13628_v44  ;;  %10870 = vmatprep.mubr.msk.bf16.mxu0 %vm7056_vm3, %v13807_v42  ;;  %v3713_v0 = vrot.slane %v3699_v43, %v12424_v23  ;;  %v16259_v22 = vld [vmem:[#allocation22_spill] sm:$0xff] }
 0x1ce   : > { %v6439_v20 = vrot.slane %v6425_v31, %v12424_v23  ;;  %v3714_v61 = vcombine.high %v3706_v50, %v3706_v50  ;;  %v3698_v52 = vcombine.high %v3696_v39, %v3696_v39  ;;  %v16257_v33 = vrot.slane %v16254_v3, %v12412_v14  ;;  %v13835_v29 = vpop.eup %11318 }
 0x1cf   : > { %v6441_v32 = vcombine.low %v5784_v10, %v5785_v62  ;;  %v16258_v12 = vrot.slane %v16254_v3, %v12415_v15  ;;  %v16260_v27 = vrot.slane %v16259_v22, %v12409_v7  ;;  %v3715_v62 = vcombine.high %v3713_v0, %v3713_v0 }
 0x1d0   : > { %v5786_v1 = vmul.f32 %v16257_v33, %v3689_v21  ;;  %v6440_v31 = vcombine.low %v6432_v45, %v6439_v20  ;;  %v16261_v43 = vrot.slane %v16259_v22, %v12412_v14  ;;  %v16262_v21 = vrot.slane %v16259_v22, %v12406_v6  ;;  %v16264_v20 = vld [vmem:[#allocation23_spill] sm:$0xff] }
 0x1d1   : > { %v5787_v44 = vmul.f32 %v16258_v12, %v3697_v9  ;;  %v5790_v24 = vmul.f32 %v16260_v27, %v3706_v50  ;;  %v6449_v10 = vrot.slane %v6441_v32, %v12424_v23  ;;  %v16263_v9 = vrot.slane %v16259_v22, %v12415_v15  ;;  %v13847_v12 = vpop.eup %11320 }
 0x1d2   : > { %v5791_v19 = vmul.f32 %v16261_v43, %v3714_v61  ;;  %v5789_v3 = vmul.f32 %v16262_v21, %v3698_v52  ;;  %v3716_v50 = vcombine.high %v3218_v38, %v3218_v38  ;;  %v3723_v45 = vrot.slane %v3218_v38, %v12424_v23  ;;  %v11323_v4 = vpop.eup %11322 }
 0x1d3   : > { %v6442_v63 = vcombine.low %v5786_v1, %v5787_v44  ;;  %v5792_v33 = vmul.f32 %v16263_v9, %v3713_v0  ;;  %v16265_v32 = vrot.slane %v16264_v20, %v12406_v6  ;;  %v3219_v61 = vmul.f32 %v11315_v5, %v13631_v13 }
 0x1d4   : > { %11326 = vrcp.f32 %v3099_v57  ;;  %v6465_v44 = vcombine.low %v5789_v3, %v5790_v24  ;;  %v13856_v43 = vrot.slane %v3716_v50, %v12424_v23  ;;  %v3731_v0 = vcombine.high %v3723_v45, %v3723_v45 }
 0x1d5   : > { %v5793_v27 = vmul.f32 %v16265_v32, %v3715_v62  ;;  %v6456_v1 = vrot.slane %v6442_v63, %v12424_v23  ;;  %v6466_v52 = vcombine.low %v5791_v19, %v5792_v33  ;;  %v16266_v22 = vrot.slane %v16264_v20, %v12409_v7  ;;  %v11325_v19 = vpop.eup %11324  ;;  %v16270_v32 = vld [vmem:[#allocation19_spill] sm:$0xff] }
 0x1d6   : > { %v3733_v38 = vcombine.high %v3219_v61, %v3219_v61  ;;  %v3740_v9 = vrot.slane %v3219_v61, %v12424_v23  ;;  %v6473_v13 = vrot.slane %v6465_v44, %v12424_v23  ;;  %v13866_v63 = vmul.f32 %v13237_v59, %v13452_v26  ;;  %v16272_v61 = vld [vmem:[#allocation24_spill] sm:$0xff] }
 0x1d7   : > { %v5794_v21 = vmul.f32 %v16266_v22, %v3723_v45  ;;  %v6457_v62 = vcombine.low %v6449_v10, %v6456_v1  ;;  %v6480_v57 = vrot.slane %v6466_v52, %v12424_v23  ;;  %v16267_v5 = vrot.slane %v16264_v20, %v12412_v14 }
 0x1d8   : > { %v16268_v3 = vrot.slane %v16264_v20, %v12415_v15  ;;  %v3747_v10 = vrot.slane %v3733_v38, %v12424_v23  ;;  %v16269_v45 = vcombine.high %v13757_v2, %v13757_v2  ;;  %v16271_v59 = vrot.slane %v16270_v32, %v12406_v6  ;;  %v16274_v38 = vld [vmem:[#allocation26_spill] sm:$0xff] }
 0x1d9   : > { %v5795_v24 = vmul.f32 %v16267_v5, %v3731_v0  ;;  %v6482_v50 = vcombine.low %v5793_v27, %v5794_v21  ;;  %v16273_v1 = vrot.slane %v16272_v61, %v12406_v6  ;;  %v13889_v52 = vpack.c.bf16 %v6457_v62, %v6440_v31 }
 0x1da   : > { %v5796_v33 = vmul.f32 %v16268_v3, %v13856_v43  ;;  %v13882_v26 = vmul.f32 %v16271_v59, %v16269_v45  ;;  %v3748_v20 = vcombine.high %v3740_v9, %v3740_v9  ;;  %v6481_v0 = vcombine.low %v6473_v13, %v6480_v57 }
 0x1db   : > { %v13887_v44 = vmul.f32 %v16273_v1, %v3696_v39  ;;  %v6490_v22 = vrot.slane %v6482_v50, %v12424_v23  ;;  %v3749_v21 = vcombine.high %v3747_v10, %v3747_v10  ;;  %v16275_v2 = vrot.slane %v16274_v38, %v12406_v6  ;;  %10871 = vmatmul.mubr.msk.bf16.gmra.mxu0 %vm7056_vm3, %v13889_v52 }
 0x1dc   : > { %v6483_v27 = vcombine.low %v5795_v24, %v5796_v33  ;;  %v16276_v3 = vrot.slane %v16274_v38, %v12409_v7  ;;  %v3220_v32 = vmul.f32 %v11323_v4, %v13679_v51  ;;  %v3221_v39 = vmul.f32 %v11325_v19, %v13682_v11 }
 0x1dd   : > { %v5798_v5 = vmul.f32 %v16275_v2, %v3740_v9  ;;  %v16277_v62 = vrot.slane %v16274_v38, %v12412_v14  ;;  %v16278_v9 = vrot.slane %v16274_v38, %v12415_v15  ;;  %v3100_v24 = vadd.f32 1.0, %v13795_v60 }
 0x1de   : > { %v5799_v45 = vmul.f32 %v16276_v3, %v3748_v20  ;;  %v6497_v31 = vrot.slane %v6483_v27, %v12424_v23  ;;  %v3750_v50 = vcombine.high %v3220_v32, %v3220_v32  ;;  %v3757_v4 = vrot.slane %v3220_v32, %v12424_v23  ;;  %v16279_v3 = vld [vmem:[#allocation27_spill] sm:$0xff] }
 0x1df   : > { %v5800_v13 = vmul.f32 %v16277_v62, %v3747_v10  ;;  %v5801_v57 = vmul.f32 %v16278_v9, %v3749_v21  ;;  %v3767_v51 = vcombine.high %v3221_v39, %v3221_v39  ;;  %v3774_v59 = vrot.slane %v3221_v39, %v12424_v23 }
 0x1e0   : > { %v6506_v33 = vcombine.low %v5798_v5, %v5799_v45  ;;  %v6498_v11 = vcombine.low %v6490_v22, %v6497_v31  ;;  %11328 = vrcp.f32 %v3100_v24  ;;  %v3732_v61 = vcombine.high %v13856_v43, %v13856_v43 }
 0x1e1   : > { %v6507_v19 = vcombine.low %v5800_v13, %v5801_v57  ;;  %v3764_v10 = vrot.slane %v3750_v50, %v12424_v23  ;;  %v3765_v1 = vcombine.high %v3757_v4, %v3757_v4  ;;  %v3101_v20 = vadd.f32 1.0, %v13822_v58  ;;  %v11327_v22 = vpop.eup %11326  ;;  %v16283_v13 = vld [vmem:[#allocation28_spill] sm:$0xff] }
 0x1e2   : > { %v13916_v27 = vpack.c.bf16 %v6498_v11, %v6481_v0  ;;  %v3781_v21 = vrot.slane %v3767_v51, %v12424_v23  ;;  %v3782_v38 = vcombine.high %v3774_v59, %v3774_v59  ;;  %v6514_v2 = vrot.slane %v6506_v33, %v12424_v23  ;;  %v16287_v11 = vld [vmem:[#allocation30_spill] sm:$0xff] }
 0x1e3   : > { %v6521_v60 = vrot.slane %v6507_v19, %v12424_v23  ;;  %v3766_v5 = vcombine.high %v3764_v10, %v3764_v10  ;;  %v16280_v45 = vrot.slane %v16279_v3, %v12406_v6  ;;  %v16281_v39 = vrot.slane %v16279_v3, %v12409_v7 }
 0x1e4   : > { %v16282_v58 = vrot.slane %v16279_v3, %v12412_v14  ;;  %v3783_v62 = vcombine.high %v3781_v21, %v3781_v21  ;;  %v16284_v9 = vrot.slane %v16283_v13, %v12406_v6  ;;  %v16285_v24 = vrot.slane %v16283_v13, %v12409_v7  ;;  %10874 = vmatprep.mubr.msk.bf16.mxu0 %vm7056_vm3, %v13916_v27 }
 0x1e5   : > { %v5802_v32 = vmul.f32 %v16280_v45, %v3757_v4  ;;  %v5803_v31 = vmul.f32 %v16281_v39, %v3765_v1  ;;  %v16286_v50 = vrot.slane %v16279_v3, %v12415_v15  ;;  %v16288_v19 = vrot.slane %v16287_v11, %v12406_v6 }
 0x1e6   : > { %v5804_v0 = vmul.f32 %v16282_v58, %v3764_v10  ;;  %v5807_v57 = vmul.f32 %v16284_v9, %v3782_v38  ;;  %v5808_v33 = vmul.f32 %v16285_v24, %v3781_v21  ;;  %v3222_v1 = vmul.f32 %v11327_v22, %v13697_v18  ;;  %v13949_v21 = vld [vmem:[%s15951_s5 + $0x78] sm:$0xff]   ;;  %v16291_v24 = vld [vmem:[#allocation29_spill] sm:$0xff] }
 0x1e7   : > { %v5805_v4 = vmul.f32 %v16286_v50, %v3766_v5  ;;  %v6523_v51 = vcombine.low %v5802_v32, %v5803_v31  ;;  %v5806_v10 = vmul.f32 %v16288_v19, %v3774_v59  ;;  %v6522_v45 = vcombine.low %v6514_v2, %v6521_v60  ;;  %10994 = vmatprep.subr.bf16.mxu0 %v13949_v21 }
 0x1e8   : > { %v6547_v38 = vcombine.low %v5807_v57, %v5808_v33  ;;  %11330 = vrcp.f32 %v3101_v20  ;;  %v3102_v39 = vadd.f32 1.0, %v13835_v29  ;;  %v3784_v3 = vcombine.high %v3222_v1, %v3222_v1 }
 0x1e9   : > { %v6524_v58 = vcombine.low %v5804_v0, %v5805_v4  ;;  %v3791_v5 = vrot.slane %v3222_v1, %v12424_v23  ;;  %v16289_v32 = vrot.slane %v16283_v13, %v12412_v14  ;;  %v6531_v18 = vrot.slane %v6523_v51, %v12424_v23 }
 0x1ea   : > { %11332 = vrcp.f32 %v3102_v39  ;;  %v3103_v20 = vadd.f32 1.0, %v13847_v12  ;;  %v13959_v29 = vadd.f32 %v13299_v55, %v13778_v48  ;;  %v3798_v22 = vrot.slane %v3784_v3, %v12424_v23 }
 0x1eb   : > { %v5809_v59 = vmul.f32 %v16289_v32, %v3783_v62  ;;  %v6538_v60 = vrot.slane %v6524_v58, %v12424_v23  ;;  %v3799_v2 = vcombine.high %v3791_v5, %v3791_v5  ;;  %v16290_v31 = vrot.slane %v16283_v13, %v12415_v15 }
 0x1ec   : > { %11334 = vrcp.f32 %v3103_v20  ;;  %v10159_v62 = vmul.f32 -1.442695, %v13959_v29  ;;  %v13970_v12 = vadd.f32 %v13299_v55, %v13866_v63  ;;  %v6423_v48 = vrot.slane %v13882_v26, %v12424_v23 }
 0x1ed   : > { %v5810_v0 = vmul.f32 %v16290_v31, %v3791_v5  ;;  %v6539_v9 = vcombine.low %v6531_v18, %v6538_v60  ;;  %v3800_v57 = vcombine.high %v3798_v22, %v3798_v22  ;;  %v16292_v33 = vrot.slane %v16291_v24, %v12406_v6  ;;  %v11329_v19 = vpop.eup %11328  ;;  %v16295_v31 = vld [vmem:[#allocation25_spill] sm:$0xff] }
 0x1ee   : > { %v16293_v13 = vrot.slane %v16291_v24, %v12409_v7  ;;  %v13981_v51 = vrot.slane %v6547_v38, %v12424_v23  ;;  %v10160_v55 = vmul.f32 -1.442695, %v13970_v12  ;;  %v13984_v63 = vpack.c.bf16 %v6423_v48, %v6423_v48 }
 0x1ef   : > { %v5811_v50 = vmul.f32 %v16292_v33, %v3799_v2  ;;  %v6548_v11 = vcombine.low %v5809_v59, %v5810_v0  ;;  %v13986_v26 = vpack.c.bf16 %v6539_v9, %v6522_v45  ;;  %v16294_v39 = vrot.slane %v16291_v24, %v12412_v14  ;;  %v11606_v45 = vld [vmem:[%s15949_s3] ss:$0 sm:$0xff] }
 0x1f0   : > { %v5812_v4 = vmul.f32 %v16293_v13, %v3798_v22  ;;  %11336 = vpow2.f32 %v10159_v62  ;;  %v3223_v5 = vmul.f32 %v11329_v19, %v13714_v17  ;;  %v6958_v38 = vshll.u32 %v13807_v42, 16 }
 0x1f1   : > { %v5813_v58 = vmul.f32 %v16294_v39, %v3800_v57  ;;  %v6562_v3 = vrot.slane %v6548_v11, %v12424_v23  ;;  %11338 = vpow2.f32 %v10160_v55  ;;  %v6956_v32 = vshrl.u32 %v13807_v42, 16  ;;  %10875 = vmatmul.mubr.msk.bf16.gmra.mxu0 %vm7056_vm3, %v13986_v26 }
 0x1f2   : > { %v6564_v1 = vcombine.low %v5811_v50, %v5812_v4  ;;  %v6963_v59 = vshll.u32 %v13984_v63, 16  ;;  %v2894_v18 = vmul.f32 %v11606_v45, %v13474_v8  ;;  %v6464_v20 = vrot.slane %v13887_v44, %v12424_v23  ;;  %v11607_v44 = vld [vmem:[%s15950_s4] ss:$0 sm:$0xff] }
 0x1f3   : > { %v6563_v17 = vcombine.low %v13981_v51, %v6562_v3  ;;  %v3801_v60 = vcombine.high %v3223_v5, %v3223_v5  ;;  %v14006_v22 = vrot.slane %v3223_v5, %v12424_v23  ;;  %v6960_v2 = vrot.slane %v6958_v38, 1 }
 0x1f4   : > { %v16296_v0 = vrot.slane %v16295_v31, %v12406_v6  ;;  %v14015_v62 = vrot.slane %v5806_v10, %v12424_v23  ;;  %v14020_v48 = vadd.f32 %v11607_v44, %v2894_v18  ;;  %v14022_v9 = vpack.c.bf16 %v6464_v20, %v6464_v20 }
 0x1f5   : > { %v6572_v57 = vrot.slane %v6564_v1, %v12424_v23  ;;  %v3815_v33 = vrot.slane %v3801_v60, %v12424_v23  ;;  %v16297_v43 = vrot.slane %v16291_v24, %v12415_v15  ;;  %v6961_v50 = vor.u32 %v6960_v2, %v6956_v32  ;;  %v11331_v10 = vpop.eup %11330  ;;  %v16299_v32 = vld [vmem:[#allocation32_spill] sm:$0xff] }
 0x1f6   : > { %v5797_v8 = vmul.f32 %v16296_v0, %v3732_v61  ;;  %v6965_v13 = vrot.slane %v6963_v59, 1  ;;  %v10161_v4 = vmul.f32 -1.442695, %v14020_v48  ;;  %v6970_v51 = vshll.u32 %v13889_v52, 16 }
 0x1f7   : > { %v5814_v61 = vmul.f32 %v16297_v43, %v14006_v22  ;;  %v6975_v11 = vshll.u32 %v14022_v9, 16  ;;  %v3816_v55 = vcombine.high %v14006_v22, %v14006_v22  ;;  %v3817_v19 = vcombine.high %v3815_v33, %v3815_v33  ;;  %v11333_v3 = vpop.eup %11332 }
 0x1f8   : > { %v6968_v39 = vshrl.u32 %v13889_v52, 16  ;;  %v3224_v24 = vmul.f32 %v11331_v10, %v13718_v30  ;;  %v14038_v5 = vsel %vm6846_vm2, %v6961_v50, %v6965_v13  ;;  %11340 = vpow2.f32 %v10161_v4 }
 0x1f9   : > { %v6565_v1 = vcombine.low %v5813_v58, %v5814_v61  ;;  %16298 = vst [vmem:[#allocation13_spill] sm:$0xff] %v14038_v5  ;;  %v6972_v38 = vrot.slane %v6970_v51, 1  ;;  %v16300_v59 = vrot.slane %v16299_v32, %v12406_v6  ;;  %v16301_v18 = vrot.slane %v16299_v32, %v12409_v7  ;;  %10763 = vmatmul.mubr.msk.bf16.gmra.mxu1 %vm7056_vm3, %v14038_v5  ;;  %v11335_v30 = vpop.eup %11334 }
 0x1fa   : > { %v3225_v60 = vmul.f32 %v11333_v3, %v13734_v34  ;;  %v3818_v2 = vcombine.high %v3224_v24, %v3224_v24  ;;  %v3825_v31 = vrot.slane %v3224_v24, %v12424_v23  ;;  %v6977_v0 = vrot.slane %v6975_v11, 1 }
 0x1fb   : > { %v5816_v45 = vmul.f32 %v16300_v59, %v3815_v33  ;;  %v5817_v20 = vmul.f32 %v16301_v18, %v3817_v19  ;;  %v6579_v58 = vrot.slane %v6565_v1, %v12424_v23  ;;  %v6505_v44 = vrot.slane %v5797_v8, %v12424_v23 }
 0x1fc   : > { %v3835_v61 = vcombine.high %v3225_v60, %v3225_v60  ;;  %v3842_v50 = vrot.slane %v3225_v60, %v12424_v23  ;;  %v3832_v10 = vrot.slane %v3818_v2, %v12424_v23  ;;  %v3833_v13 = vcombine.high %v3825_v31, %v3825_v31 }
 0x1fd   : > { %v6580_v43 = vcombine.low %v6572_v57, %v6579_v58  ;;  %v6588_v33 = vcombine.low %v5816_v45, %v5817_v20  ;;  %v3226_v34 = vmul.f32 %v11335_v30, %v13753_v54  ;;  %v6973_v4 = vor.u32 %v6972_v38, %v6968_v39  ;;  %v11337_v51 = vpop.eup %11336  ;;  %v16304_v54 = vld [vmem:[#allocation33_spill] sm:$0xff] }
 0x1fe   : > { %v16302_v1 = vrot.slane %v16299_v32, %v12412_v14  ;;  %v3849_v8 = vrot.slane %v3835_v61, %v12424_v23  ;;  %v3850_v57 = vcombine.high %v3842_v50, %v3842_v50  ;;  %v11339_v3 = vpop.eup %11338  ;;  %v3834_v59 = vcombine.high %v3832_v10, %v3832_v10 }
 0x1ff   : > { %v14055_v19 = vpack.c.bf16 %v6580_v43, %v6563_v17  ;;  %v6596_v24 = vrot.slane %v6588_v33, %v12424_v23  ;;  %v16303_v45 = vrot.slane %v16299_v32, %v12415_v15  ;;  %v16305_v39 = vrot.slane %v16304_v54, %v12406_v6 }
 0x200   : > { %v5818_v11 = vmul.f32 %v16302_v1, %v3825_v31  ;;  %v3851_v38 = vcombine.high %v3849_v8, %v3849_v8  ;;  %v16306_v20 = vrot.slane %v16304_v54, %v12412_v14  ;;  %v16307_v60 = vrot.slane %v16304_v54, %v12415_v15 }
 0x201   : > { %v5819_v18 = vmul.f32 %v16303_v45, %v3833_v13  ;;  %v5820_v17 = vmul.f32 %v16305_v39, %v3832_v10  ;;  %v3852_v2 = vcombine.high %v3226_v34, %v3226_v34  ;;  %10878 = vmatprep.mubr.msk.bf16.mxu0 %vm7056_vm3, %v14055_v19  ;;  %v16308_v32 = vrot.slane %v16304_v54, %v12409_v7 }
 0x202   : > { %v5822_v58 = vmul.f32 %v16306_v20, %v3842_v50  ;;  %v5823_v30 = vmul.f32 %v16307_v60, %v3850_v57  ;;  %v3859_v33 = vrot.slane %v3226_v34, %v12424_v23  ;;  %v3104_v61 = vadd.f32 1.0, %v11337_v51  ;;  %v16309_v50 = vld [vmem:[#allocation34_spill] sm:$0xff] }
 0x203   : > { %v5821_v31 = vmul.f32 %v16308_v32, %v3834_v59  ;;  %v6589_v43 = vcombine.low %v5818_v11, %v5819_v18  ;;  %v14081_v13 = vrot.slane %v3852_v2, %v12424_v23  ;;  %v16310_v1 = vrot.slane %v16309_v50, %v12406_v6  ;;  %v16314_v32 = vld [vmem:[#allocation31_spill] sm:$0xff] }
 0x204   : > { %v6606_v10 = vcombine.low %v5822_v58, %v5823_v30  ;;  %v3105_v45 = vadd.f32 1.0, %v11339_v3  ;;  %v3867_v60 = vcombine.high %v3859_v33, %v3859_v33  ;;  %v16311_v59 = vrot.slane %v16309_v50, %v12409_v7 }
 0x205   : > { %v5825_v57 = vmul.f32 %v16310_v1, %v3851_v38  ;;  %v6603_v39 = vrot.slane %v6589_v43, %v12424_v23  ;;  %v6605_v20 = vcombine.low %v5820_v17, %v5821_v31  ;;  %v16312_v51 = vrot.slane %v16309_v50, %v12415_v15  ;;  %v11341_v2 = vpop.eup %11340 }
 0x206   : > { %v5826_v11 = vmul.f32 %v16311_v59, %v3859_v33  ;;  %v6620_v34 = vrot.slane %v6606_v10, %v12424_v23  ;;  %11342 = vrcp.f32 %v3104_v61  ;;  %v14095_v54 = vpack.c.bf16 %v6505_v44, %v6505_v44 }
 0x207   : > { %v5828_v18 = vmul.f32 %v16312_v51, %v14081_v13  ;;  %v6604_v38 = vcombine.low %v6596_v24, %v6603_v39  ;;  %v6613_v3 = vrot.slane %v6605_v20, %v12424_v23  ;;  %v16313_v17 = vrot.slane %v16309_v50, %v12412_v14  ;;  %v16317_v24 = vld [vmem:[#allocation36_spill] sm:$0xff] }
 0x208   : > { %v6629_v30 = vcombine.low %v5825_v57, %v5826_v11  ;;  %v16315_v31 = vrot.slane %v16314_v32, %v12406_v6  ;;  %11344 = vrcp.f32 %v3105_v45  ;;  %v14108_v44 = vsel %vm6846_vm2, %v6973_v4, %v6977_v0 }
 0x209   : > { %v5827_v58 = vmul.f32 %v16313_v17, %v3867_v60  ;;  %16316 = vst [vmem:[#allocation18_spill] sm:$0xff] %v14108_v44  ;;  %v16318_v33 = vrot.slane %v16317_v24, %v12406_v6  ;;  %v6621_v10 = vcombine.low %v6613_v3, %v6620_v34  ;;  %v3106_v1 = vadd.f32 1.0, %v11341_v2  ;;  %10766 = vmatprep.mubr.msk.bf16.mxu1 %vm7056_vm3, %v14108_v44 }
 0x20a   : > { %v5815_v43 = vmul.f32 %v16315_v31, %v3816_v55  ;;  %v14116_v22 = vrot.slane %v6629_v30, %v12424_v23  ;;  %v6982_v57 = vshll.u32 %v13916_v27, 16  ;;  %v6987_v55 = vshll.u32 %v14095_v54, 16 }
 0x20b   : > { %v5824_v61 = vmul.f32 %v16318_v33, %v3849_v8  ;;  %v6630_v50 = vcombine.low %v5827_v58, %v5828_v18  ;;  %v14122_v0 = vpack.c.bf16 %v14015_v62, %v14015_v62  ;;  %v14124_v4 = vpack.c.bf16 %v6621_v10, %v6604_v38 }
 0x20c   : > { %11346 = vrcp.f32 %v3106_v1  ;;  %v6994_v45 = vshll.u32 %v13986_v26, 16  ;;  %v6980_v39 = vshrl.u32 %v13916_v27, 16  ;;  %v6984_v20 = vrot.slane %v6982_v57, 1  ;;  %v16323_v57 = vld [vmem:[#allocation35_spill] sm:$0xff] }
 0x20d   : > { %16319 = vst [vmem:[#allocation16_spill] sm:$0xff] %v14124_v4  ;;  %v14127_v8 = vrot.slane %v6630_v50, %v12424_v23  ;;  %v6999_v60 = vshll.u32 %v14122_v0, 16  ;;  %v6587_v59 = vrot.slane %v5815_v43, %v12424_v23  ;;  %v6992_v62 = vshrl.u32 %v13986_v26, 16  ;;  %10879 = vmatmul.mubr.msk.bf16.gmra.mxu0 %vm7056_vm3, %v14124_v4 }
 0x20e   : > { %v6996_v34 = vrot.slane %v6994_v45, 1  ;;  %v7006_v51 = vshll.u32 %v14055_v19, 16  ;;  %v6985_v18 = vor.u32 %v6984_v20, %v6980_v39  ;;  %v6989_v38 = vrot.slane %v6987_v55, 1 }
 0x20f   : > { %v14139_v3 = vpack.c.bf16 %v6587_v59, %v6587_v59  ;;  %v6628_v17 = vrot.slane %v5824_v61, %v12424_v23  ;;  %v7001_v30 = vrot.slane %v6999_v60, 1  ;;  %v7018_v32 = vshll.u32 %v14124_v4, 16 }
 0x210   : > { %v6997_v58 = vor.u32 %v6996_v34, %v6992_v62  ;;  %v7008_v2 = vrot.slane %v7006_v51, 1  ;;  %v14144_v31 = vsel %vm6846_vm2, %v6985_v18, %v6989_v38  ;;  %v7004_v43 = vshrl.u32 %v14055_v19, 16  ;;  %v16324_v34 = vld [vmem:[#allocation37_spill] sm:$0xff]  ;;  %v16325_v18 = vld [vmem:[#allocation38_spill] sm:$0xff] }
 0x211   : > { %16320 = vst [vmem:[#allocation17_spill] sm:$0xff] %v14144_v31  ;;  %v7011_v24 = vshll.u32 %v14139_v3, 16  ;;  %v14148_v33 = vpack.c.bf16 %v6628_v17, %v6628_v17  ;;  %v3868_v10 = vcombine.high %v14081_v13, %v14081_v13  ;;  %10767 = vmatmul.mubr.msk.bf16.gmra.mxu1 %vm7056_vm3, %v14144_v31  ;;  %v7016_v50 = vshrl.u32 %v14124_v4, 16 }
 0x212   : > { %v14155_v61 = vsel %vm6846_vm2, %v6997_v58, %v7001_v30  ;;  %v7020_v1 = vrot.slane %v7018_v32, 1  ;;  %v5373_v55 = vrot.slane %v16323_v57, %v12406_v6  ;;  %v7009_v45 = vor.u32 %v7008_v2, %v7004_v43 }
 0x213   : > { %16321 = vst [vmem:[#allocation42_spill] sm:$0xff] %v14148_v33  ;;  %16322 = vst [vmem:[#allocation8_spill] sm:$0xff] %v14155_v61  ;;  %10770 = vmatprep.mubr.msk.bf16.mxu1 %vm7056_vm3, %v14155_v61  ;;  %v7023_v39 = vshll.u32 %v14148_v33, 16  ;;  %v11343_v20 = vpop.eup %11342  ;;  %v5380_v13 = vrot.slane %v16323_v57, %v12409_v7  ;;  %v5387_v60 = vrot.slane %v16323_v57, %v12412_v14  ;;  %v7013_v58 = vrot.slane %v7011_v24, 1  ;;  %v16327_v24 = vld [vmem:[#allocation39_spill] sm:$0xff] }
 0x214   : > { %v5394_v59 = vrot.slane %v16323_v57, %v12415_v15  ;;  %v7021_v62 = vor.u32 %v7020_v1, %v7016_v50  ;;  %v5401_v51 = vrot.slane %v16324_v34, %v12406_v6  ;;  %v5408_v38 = vrot.slane %v16325_v18, %v12406_v6  ;;  %v4393_v57 = vpop.permute.xlu1 %4392 }
 0x215   : > { %v3227_v17 = vmul.f32 %v11343_v20, %v13959_v29  ;;  %v11345_v30 = vpop.eup %11344  ;;  %v5415_v2 = vrot.slane %v16325_v18, %v12409_v7  ;;  %v5422_v32 = vrot.slane %v16325_v18, %v12412_v14  ;;  %v5829_v43 = vmul.f32 %v5373_v55, %v3868_v10 }
 0x216   : > { %v7025_v11 = vrot.slane %v7023_v39, 1  ;;  %v3228_v34 = vmul.f32 %v11345_v30, %v13970_v12  ;;  %v14181_v61 = vsel %vm6846_vm2, %v7009_v45, %v7013_v58  ;;  %v5429_v29 = vrot.slane %v16325_v18, %v12415_v15  ;;  %v16329_v45 = vld [vmem:[#allocation5_spill] sm:$0xff] }
 0x217   : > { %v3869_v50 = vcombine.high %v3227_v17, %v3227_v17  ;;  %v3876_v1 = vrot.slane %v3227_v17, %v12424_v23  ;;  %16326 = vst [vmem:[#allocation41_spill] sm:$0xff] %v14181_v61  ;;  %v5436_v20 = vrot.slane %v16327_v24, %v12406_v6  ;;  %v5443_v31 = vrot.slane %v16327_v24, %v12409_v7 }
 0x218   : > { %v14190_v10 = vsel %vm6846_vm2, %v7021_v62, %v7025_v11  ;;  %v3886_v30 = vcombine.high %v3228_v34, %v3228_v34  ;;  %v3961_v58 = vcombine.high %v16329_v45, %v16329_v45  ;;  %v5527_v18 = vrot.slane %v4393_v57, %v12406_v6 }
 0x219   : > { %16328 = vst [vmem:[#allocation9_spill] sm:$0xff] %v14190_v10  ;;  %v11347_v55 = vpop.eup %11346  ;;  %v3883_v39 = vrot.slane %v3869_v50, %v12424_v23  ;;  %v3884_v17 = vcombine.high %v3876_v1, %v3876_v1  ;;  %v5830_v12 = vmul.f32 %v5380_v13, %v3876_v1  ;;  %v3893_v44 = vrot.slane %v3228_v34, %v12424_v23 }
 0x21a   : > { %v3229_v5 = vmul.f32 %v11347_v55, %v14020_v48  ;;  %10771 = vmatmul.mubr.msk.bf16.gmra.mxu1 %vm7056_vm3, %v14181_v61  ;;  %v5450_v13 = vrot.slane %v16327_v24, %v12412_v14  ;;  %v3900_v50 = vrot.slane %v3886_v30, %v12424_v23  ;;  %v5457_v48 = vrot.slane %v16327_v24, %v12415_v15 }
 0x21b   : > { %v3885_v7 = vcombine.high %v3883_v39, %v3883_v39  ;;  %v5831_v11 = vmul.f32 %v5387_v60, %v3884_v17  ;;  %v5832_v62 = vmul.f32 %v5394_v59, %v3883_v39  ;;  %v6646_v33 = vcombine.low %v5829_v43, %v5830_v12  ;;  %10774 = vmatprep.mubr.msk.bf16.mxu1 %vm7056_vm3, %v14190_v10 }
 0x21c   : > { %v3901_v57 = vcombine.high %v3893_v44, %v3893_v44  ;;  %v3903_v1 = vcombine.high %v3229_v5, %v3229_v5  ;;  %v3910_v45 = vrot.slane %v3229_v5, %v12424_v23  ;;  %v5851_v60 = vmul.f32 %v5527_v18, %v3961_v58 }
 0x21d   : > { %v5833_v34 = vmul.f32 %v5401_v51, %v3885_v7  ;;  %v6647_v55 = vcombine.low %v5831_v11, %v5832_v62  ;;  %v3902_v59 = vcombine.high %v3900_v50, %v3900_v50  ;;  %v6654_v17 = vrot.slane %v6646_v33, %v12424_v23 }
 0x21e   : > { %v5835_v43 = vmul.f32 %v5415_v2, %v3901_v57  ;;  %v3917_v39 = vrot.slane %v3903_v1, %v12424_v23  ;;  %v3918_v12 = vcombine.high %v3910_v45, %v3910_v45  ;;  %v5834_v10 = vmul.f32 %v5408_v38, %v3893_v44 }
 0x21f   : > { %v6661_v14 = vrot.slane %v6647_v55, %v12424_v23  ;;  %v6669_v30 = vrot.slane %v5833_v34, %v12424_v23  ;;  %v5836_v61 = vmul.f32 %v5422_v32, %v3900_v50  ;;  %v5837_v4 = vmul.f32 %v5429_v29, %v3902_v59  ;;  %v16331_v50 = vld [vmem:[#allocation48_spill] sm:$0xff] }
 0x220   : > { %v3919_v15 = vcombine.high %v3917_v39, %v3917_v39  ;;  %v5838_v24 = vmul.f32 %v5436_v20, %v3910_v45  ;;  %v5839_v7 = vmul.f32 %v5443_v31, %v3918_v12  ;;  %v6670_v58 = vcombine.low %v5834_v10, %v5835_v43  ;;  %v16334_v12 = vld [vmem:[#allocation46_spill] sm:$0xff] }
 0x221   : > { %v6662_v51 = vcombine.low %v6654_v17, %v6661_v14  ;;  %v14212_v5 = vpack.c.bf16 %v6669_v30, %v6669_v30  ;;  %v6671_v2 = vcombine.low %v5836_v61, %v5837_v4  ;;  %v5840_v18 = vmul.f32 %v5450_v13, %v3917_v39  ;;  %v16333_v14 = vld [vmem:[#allocation44_spill] sm:$0xff] }
 0x222   : > { %v5841_v11 = vmul.f32 %v5457_v48, %v3919_v15  ;;  %v16330_v33 = vcombine.low %v14116_v22, %v14127_v8  ;;  %v6687_v57 = vcombine.low %v5838_v24, %v5839_v7  ;;  %v6751_v32 = vrot.slane %v5851_v60, %v12424_v23  ;;  %v16332_v60 = vld [vmem:[#allocation45_spill] sm:$0xff] }
 0x223   : > { %v6685_v44 = vrot.slane %v6671_v2, %v12424_v23  ;;  %v7035_v4 = vshll.u32 %v14212_v5, 16  ;;  %v6678_v61 = vrot.slane %v6670_v58, %v12424_v23  ;;  %v7507_v1 = vrot.slane %v16331_v50, 1  ;;  %v11171_v2 = vld [vmem:[%s15951_s5 + $0x20] sm:$0xff]  }
 0x224   : > { %v14217_v62 = vpack.c.bf16 %v6662_v51, %v16330_v33  ;;  %v6688_v38 = vcombine.low %v5840_v18, %v5841_v11  ;;  %v6695_v29 = vrot.slane %v6687_v57, %v12424_v23  ;;  %v14230_v48 = vpack.c.bf16 %v6751_v32, %v6751_v32  ;;  %v16335_v51 = vld [vmem:[#allocation43_spill] sm:$0xff]  ;;  %v11608_v57 = vld [vmem:[%s15951_s5 + $0x28] sm:$0xff]  }
 0x225   : > { %v6686_v10 = vcombine.low %v6678_v61, %v6685_v44  ;;  %v7037_v55 = vrot.slane %v7035_v4, 1  ;;  %v7508_v59 = vrot.slane %v16332_v60, 1  ;;  %v7510_v30 = vrot.slane %v16334_v12, 1  ;;  %v11174_v33 = vld [vmem:[%s15951_s5 + $0x70] sm:$0xff]   ;;  %v14284_v44 = vld [vmem:[%s15951_s5 + $0x48] sm:$0xff]  }
 0x226   : > { %10882 = vmatprep.mubr.msk.bf16.mxu0 %vm7056_vm3, %v14217_v62  ;;  %v7030_v31 = vshll.u32 %v14217_v62, 16  ;;  %v6702_v22 = vrot.slane %v6688_v38, %v12424_v23  ;;  %v7028_v8 = vshrl.u32 %v14217_v62, 16  ;;  %v8905_v17 = vrot.slane %v14230_v48, 1 }
 0x227   : > { %v14243_v39 = vsel %vm7503_vm4, %v7507_v1, %v7508_v59  ;;  %v8904_v15 = vrot.slane %v13556_v28, 1  ;;  %v7511_v24 = vrot.slane %v16335_v51, 1  ;;  %v7513_v7 = vrot.slane %v13114_v47, 1 }
 0x228   : > { %v7032_v20 = vrot.slane %v7030_v31, 1  ;;  %v6703_v13 = vcombine.low %v6695_v29, %v6702_v22  ;;  %v7514_v11 = vrot.slane %v13563_v36, 1  ;;  %v7516_v38 = vrot.slane %v13252_v56, 1 }
 0x229   : > { %v14255_v58 = vsel %vm7503_vm4, %v8904_v15, %v8905_v17  ;;  %v14261_v18 = vsel %vm7503_vm4, %v7510_v30, %v7511_v24  ;;  %v7519_v32 = vrot.slane %v13416_v49, 1  ;;  %v7517_v31 = vrot.slane %v13600_v16, 1  ;;  %v16337_v17 = vld [vmem:[#allocation40_spill] sm:$0xff] }
 0x22a   : > { %v7033_v34 = vor.u32 %v7032_v20, %v7028_v8  ;;  %v14232_v45 = vpack.c.bf16 %v6703_v13, %v6686_v10  ;;  %16336 = vst [vmem:[#allocation20_spill] sm:$0xff] %v14255_v58  ;;  %v14277_v36 = vsel %vm7503_vm4, %v7513_v7, %v7514_v11  ;;  %v7520_v4 = vrot.slane %v13633_v40, 1 }
 0x22b   : > { %v14293_v61 = vsel %vm7503_vm4, %v7516_v38, %v7517_v31  ;;  %v7522_v16 = vrot.slane %v13462_v35, 1  ;;  %v7525_v40 = vrot.slane %v13522_v37, 1  ;;  %v7523_v29 = vrot.slane %v13701_v53, 1 }
 0x22c   : > { %v14236_v43 = vsel %vm6846_vm2, %v7033_v34, %v7037_v55  ;;  %10883 = vmatmul.mubr.msk.bf16.gmra.mxu0 %vm7056_vm3, %v14232_v45  ;;  %v7526_v22 = vrot.slane %v13721_v25, 1  ;;  %v7528_v53 = vrot.slane %v13586_v41, 1  ;;  %v7531_v25 = vrot.slane %v13807_v42, 1 }
 0x22d   : > { %10775 = vmatmul.mubr.msk.bf16.gmra.mxu1 %vm7056_vm3, %v14236_v43  ;;  %10926 = vmatprep.mubr.msk.bf16.mxu0 %vm7056_vm3, %v14243_v39  ;;  %v14311_v8 = vsel %vm7503_vm4, %v7522_v16, %v7523_v29  ;;  %v7529_v10 = vrot.slane %v13742_v46, 1  ;;  %v7532_v13 = vrot.slane %v13984_v63, 1  ;;  %v7534_v46 = vrot.slane %v13889_v52, 1  ;;  %v16345_v29 = vld [vmem:[#allocation47_spill] sm:$0xff] }
 0x22e   : > { %10782 = vmatprep.mubr.msk.bf16.mxu1 %vm7056_vm3, %v16333_v14  ;;  %v14318_v20 = vsel %vm7503_vm4, %v7525_v40, %v7526_v22  ;;  %v7537_v63 = vrot.slane %v13916_v27, 1  ;;  %v7535_v34 = vrot.slane %v14022_v9, 1  ;;  %v7538_v55 = vrot.slane %v14095_v54, 1 }
 0x22f   : > { %v14336_v1 = vsel %vm7503_vm4, %v7531_v25, %v7532_v13  ;;  %v7540_v9 = vrot.slane %v13986_v26, 1  ;;  %v7543_v54 = vrot.slane %v14055_v19, 1  ;;  %v5464_v30 = vrot.slane %v16337_v17, %v12406_v6  ;;  %v16341_v6 = vld [vmem:[#allocation16_spill] sm:$0xff]  ;;  %v16348_v13 = vld [vmem:[#allocation10_spill] sm:$0xff] }
 0x230   : > { %v14347_v60 = vsel %vm7503_vm4, %v7534_v46, %v7535_v34  ;;  %v14354_v59 = vsel %vm7503_vm4, %v7537_v63, %v7538_v55  ;;  %v7541_v15 = vrot.slane %v14122_v0, 1  ;;  %v7544_v51 = vrot.slane %v14139_v3, 1  ;;  %v16349_v46 = vld [vmem:[#allocation11_spill] sm:$0xff]  ;;  %v11176_v63 = vld [vmem:[%s15951_s5 + $0x68] sm:$0xff]   ;;  %v16353_v55 = vld [vmem:[#allocation12_spill] sm:$0xff] }
 0x231   : > { %v7546_v0 = vrot.slane %v16341_v6, 1  ;;  %v7549_v3 = vrot.slane %v14217_v62, 1  ;;  %v7505_v22 = vrot.slane %v16345_v29, 1  ;;  %v16352_v34 = vld [vmem:[#allocation7_spill] sm:$0xff]  ;;  %v16355_v17 = vld [vmem:[#allocation18_spill] sm:$0xff] }
 0x232   : > { %v14367_v24 = vsel %vm7503_vm4, %v7540_v9, %v7541_v15  ;;  %v14374_v7 = vsel %vm7503_vm4, %v7543_v54, %v7544_v51  ;;  %v14445_v9 = vpop.f32.mrf.mxu1  ;;  %v16354_v54 = vld [vmem:[#allocation13_spill] sm:$0xff] }
 0x233   : > { %16338 = vst [vmem:[#allocation21_spill] sm:$0xff] %v14367_v24  ;;  %16339 = vst [vmem:[#allocation22_spill] sm:$0xff] %v14374_v7  ;;  %v16356_v51 = vld [vmem:[#allocation17_spill] sm:$0xff] }
 0x234   : > { %10927 = vmatmul.mubr.msk.bf16.vlgmr.msra.gmra.mxu0 %vm7056_vm3, %v14261_v18 }
 0x235   : > { %10783 = vmatmul.mubr.msk.bf16.vlgmr.msra.gmra.mxu1 %vm7056_vm3, %v16331_v50  ;;  %10930 = vmatprep.mubr.msk.bf16.mxu0 %vm7056_vm3, %v14277_v36  ;;  %v14329_v50 = vsel %vm7503_vm4, %v7528_v53, %v7529_v10  ;;  %v16347_v10 = vld [vmem:[#allocation6_spill] sm:$0xff] }
 0x236   : > { %10815 = vmatpush3.bf16.msra.mxu1 %v11608_v57  ;;  %10786 = vmatprep.mubr.msk.bf16.mxu1 %vm7056_vm3, %v16334_v12  ;;  %v16342_v57 = vld [vmem:[#allocation42_spill] sm:$0xff] }
 0x237   : > { %10816 = vmatprep.subr.bf16.mxu1 %v11171_v2  ;;  %10995 = vmatpush3.bf16.msra.mxu0 %v13949_v21  ;;  %v14300_v21 = vsel %vm7503_vm4, %v7519_v32, %v7520_v4  ;;  %v7547_v38 = vrot.slane %v16342_v57, 1  ;;  %v7550_v32 = vrot.slane %v14212_v5, 1  ;;  %v7504_v5 = vrot.slane %v16333_v14, 1  ;;  %v11175_v14 = vld [vmem:[%s15951_s5 + $0x40] sm:$0xff]  }
 0x238   : > { %10996 = vmatprep.subr.bf16.mxu0 %v11174_v33 }
 0x239   : > { %v14387_v31 = vsel %vm7503_vm4, %v7546_v0, %v7547_v38  ;;  %v14394_v4 = vsel %vm7503_vm4, %v7549_v3, %v7550_v32  ;;  %v7506_v25 = vsel %vm7503_vm4, %v7504_v5, %v7505_v22  ;;  %v8025_v0 = vshll.u32 %v14232_v45, 16  ;;  %v16359_v38 = vld [vmem:[#allocation9_spill] sm:$0xff] }
 0x23a   : > { %10817 = vmatpush3.bf16.msra.mxu1 %v11171_v2  ;;  %v16340_v2 = vld [vmem:[#allocation50_spill] sm:$0xff]  ;;  %16343 = vst [vmem:[#allocation23_spill] sm:$0xff] %v14387_v31  ;;  %16344 = vst [vmem:[#allocation19_spill] sm:$0xff] %v14394_v4  ;;  %v8023_v5 = vshrl.u32 %v14232_v45, 16 }
 0x23b   : > { %10886 = vmatprep.subr.bf16.mxu1 %v14284_v44  ;;  %10997 = vmatpush3.bf16.msra.mxu0 %v11174_v33  ;;  %v5842_v11 = vmul.f32 %v5464_v30, %v16340_v2  ;;  %v14455_v30 = vpop.f32.mrf.mxu1  ;;  %v16357_v2 = vld [vmem:[#allocation8_spill] sm:$0xff]  ;;  %v8027_v57 = vrot.slane %v8025_v0, 1  ;;  %v8678_v0 = vshrl.u32 %v13556_v28, 16 }
 0x23c   : > { %10931 = vmatmul.mubr.msk.bf16.gmra.mxu0 %vm7056_vm3, %v14293_v61 }
 0x23d   : > { %10787 = vmatmul.mubr.msk.bf16.gmra.mxu1 %vm7056_vm3, %v13114_v47  ;;  %10934 = vmatprep.mubr.msk.bf16.mxu0 %vm7056_vm3, %v14300_v21  ;;  %v6710_v33 = vrot.slane %v5842_v11, %v12424_v23  ;;  %v8249_v23 = vrot.slane %v14232_v45, 1  ;;  %v14457_v15 = vpop.f32.mrf.mxu1  ;;  %v8028_v29 = vor.u32 %v8027_v57, %v8023_v5 }
 0x23e   : > { %10790 = vmatprep.mubr.msk.bf16.mxu1 %vm7056_vm3, %v13252_v56 }
 0x23f   : > { %v6839_v16 = vpack.c.bf16 %v6710_v33, %v6710_v33  ;;  %v14467_v11 = vpop.f32.mrf.mxu1  ;;  %v16358_v33 = vld [vmem:[#allocation41_spill] sm:$0xff] }
 0x241   : > { %v8250_v40 = vrot.slane %v6839_v16, 1  ;;  %v8030_v32 = vshll.u32 %v6839_v16, 16 }
 0x243   : > { %v14404_v53 = vsel %vm7503_vm4, %v8249_v23, %v8250_v40  ;;  %v8680_v40 = vshll.u32 %v13556_v28, 16  ;;  %v8032_v22 = vrot.slane %v8030_v32, 1 }
 0x244   : > { %10935 = vmatmul.mubr.msk.bf16.gmra.mxu0 %vm7056_vm3, %v14311_v8  ;;  %16346 = vst [vmem:[#allocation24_spill] sm:$0xff] %v14404_v53 }
 0x245   : > { %10791 = vmatmul.mubr.msk.bf16.gmra.mxu1 %vm7056_vm3, %v13416_v49  ;;  %10938 = vmatprep.mubr.msk.bf16.mxu0 %vm7056_vm3, %v14318_v20  ;;  %v8682_v58 = vrot.slane %v8680_v40, 1  ;;  %v14493_v16 = vsel %vm6846_vm2, %v8028_v29, %v8032_v22  ;;  %v16360_v29 = vld [vmem:[#allocation49_spill] sm:$0xff] }
 0x246   : > { %10794 = vmatprep.mubr.msk.bf16.mxu1 %vm7056_vm3, %v13462_v35 }
 0x247   : > { %v8683_v32 = vor.u32 %v8682_v58, %v8678_v0  ;;  %v11177_v58 = vld [vmem:[%s15951_s5 + $0x60] sm:$0xff]  }
 0x24c   : > { %10939 = vmatmul.mubr.msk.bf16.gmra.mxu0 %vm7056_vm3, %v14329_v50 }
 0x24d   : > { %10795 = vmatmul.mubr.msk.bf16.gmra.mxu1 %vm7056_vm3, %v13522_v37  ;;  %10942 = vmatprep.mubr.msk.bf16.mxu0 %vm7056_vm3, %v14336_v1 }
 0x24e   : > { %10798 = vmatprep.mubr.msk.bf16.mxu1 %vm7056_vm3, %v13586_v41 }
 0x254   : > { %10943 = vmatmul.mubr.msk.bf16.gmra.mxu0 %vm7056_vm3, %v14347_v60 }
 0x255   : > { %10799 = vmatmul.mubr.msk.bf16.gmra.mxu1 %vm7056_vm3, %v13807_v42  ;;  %10946 = vmatprep.mubr.msk.bf16.mxu0 %vm7056_vm3, %v14354_v59 }
 0x256   : > { %10802 = vmatprep.mubr.msk.bf16.mxu1 %vm7056_vm3, %v13889_v52 }
 0x25c   : > { %10947 = vmatmul.mubr.msk.bf16.gmra.mxu0 %vm7056_vm3, %v14367_v24 }
 0x25d   : > { %10803 = vmatmul.mubr.msk.bf16.gmra.mxu1 %vm7056_vm3, %v13916_v27  ;;  %10950 = vmatprep.mubr.msk.bf16.mxu0 %vm7056_vm3, %v14374_v7 }
 0x25e   : > { %10806 = vmatprep.mubr.msk.bf16.mxu1 %vm7056_vm3, %v13986_v26 }
 0x264   : > { %10951 = vmatmul.mubr.msk.bf16.gmra.mxu0 %vm7056_vm3, %v14387_v31 }
 0x265   : > { %10807 = vmatmul.mubr.msk.bf16.gmra.mxu1 %vm7056_vm3, %v14055_v19  ;;  %10954 = vmatprep.mubr.msk.bf16.mxu0 %vm7056_vm3, %v14394_v4 }
 0x266   : > { %10810 = vmatprep.mubr.msk.bf16.mxu1 %vm7056_vm3, %v16341_v6 }
 0x267   : > { %v14470_v3 = vpop.f32.mrf.mxu1 }
 0x269   : > { %v14480_v23 = vpop.f32.mrf.mxu1 }
 0x26c   : > { %10955 = vmatmul.mubr.msk.bf16.gmra.mxu0 %vm7056_vm3, %v14404_v53 }
 0x26d   : > { %10811 = vmatmul.mubr.msk.bf16.gmra.mxu1 %vm7056_vm3, %v14217_v62  ;;  %10998 = vmatprep.mubr.msk.bf16.mxu0 %vm7056_vm3, %v16347_v10 }
 0x26e   : > { %10818 = vmatprep.mubr.msk.bf16.mxu1 %vm7056_vm3, %v7506_v25  ;;  %v14484_v25 = vpop.f32.mrf.mxu1 }
 0x270   : > { %v14499_v57 = vpop.f32.mrf.mxu1 }
 0x272   : > { %v14501_v5 = vpop.f32.mrf.mxu1 }
 0x274   : > { %10999 = vmatmul.mubr.msk.bf16.vlgmr.msra.gmra.mxu0 %vm7056_vm3, %v16348_v13  ;;  %v14504_v53 = vpop.f32.mrf.mxu1 }
 0x275   : > { %10819 = vmatmul.mubr.msk.bf16.vlgmr.msra.gmra.mxu1 %vm7056_vm3, %v14243_v39  ;;  %11002 = vmatprep.mubr.msk.bf16.mxu0 %vm7056_vm3, %v16349_v46  ;;  %v16350_v39 = vld [vmem:[#allocation14_spill] sm:$0xff] }
 0x276   : > { %10887 = vmatpush3.bf16.msra.mxu1 %v14284_v44  ;;  %10822 = vmatprep.mubr.msk.bf16.mxu1 %vm7056_vm3, %v14261_v18  ;;  %v16351_v44 = vld [vmem:[#allocation15_spill] sm:$0xff]  ;;  %v14511_v22 = vpop.f32.mrf.mxu1 }
 0x277   : > { %10888 = vmatprep.subr.bf16.mxu1 %v11175_v14 }
 0x278   : > { %v14518_v0 = vpop.f32.mrf.mxu1 }
 0x27a   : > { %10889 = vmatpush3.bf16.msra.mxu1 %v11175_v14  ;;  %v8685_v14 = vshll.u32 %v14230_v48, 16 }
 0x27b   : > { %10958 = vmatprep.subr.bf16.mxu1 %v11176_v63 }
 0x27c   : > { %11003 = vmatmul.mubr.msk.bf16.gmra.mxu0 %vm7056_vm3, %v16350_v39  ;;  %v8687_v48 = vrot.slane %v8685_v14, 1  ;;  %v14516_v14 = vpop.f32.mrf.mxu0 }
 0x27d   : > { %10823 = vmatmul.mubr.msk.bf16.gmra.mxu1 %vm7056_vm3, %v14277_v36  ;;  %11006 = vmatprep.mubr.msk.bf16.mxu0 %vm7056_vm3, %v16351_v44  ;;  %16361 = vst [vmem:[#allocation26_spill] sm:$0xff] %v14516_v14 }
 0x27e   : > { %10826 = vmatprep.mubr.msk.bf16.mxu1 %vm7056_vm3, %v14293_v61  ;;  %v8688_v40 = vsel %vm6846_vm2, %v8683_v32, %v8687_v48  ;;  %v11178_v32 = vld [vmem:[%s15951_s5 + $0x88] sm:$0xff]  }
 0x280   : > { %v14524_v48 = vpop.f32.mrf.mxu1 }
 0x284   : > { %11007 = vmatmul.mubr.msk.bf16.gmra.mxu0 %vm7056_vm3, %v16352_v34 }
 0x285   : > { %10827 = vmatmul.mubr.msk.bf16.gmra.mxu1 %vm7056_vm3, %v14300_v21  ;;  %11010 = vmatprep.mubr.msk.bf16.mxu0 %vm7056_vm3, %v16353_v55 }
 0x286   : > { %10830 = vmatprep.mubr.msk.bf16.mxu1 %vm7056_vm3, %v14311_v8 }
 0x28c   : > { %11011 = vmatmul.mubr.msk.bf16.gmra.mxu0 %vm7056_vm3, %v16354_v54 }
 0x28d   : > { %10831 = vmatmul.mubr.msk.bf16.gmra.mxu1 %vm7056_vm3, %v14318_v20  ;;  %11014 = vmatprep.mubr.msk.bf16.mxu0 %vm7056_vm3, %v16355_v17 }
 0x28e   : > { %10834 = vmatprep.mubr.msk.bf16.mxu1 %vm7056_vm3, %v14329_v50 }
 0x294   : > { %11015 = vmatmul.mubr.msk.bf16.gmra.mxu0 %vm7056_vm3, %v16356_v51 }
 0x295   : > { %10835 = vmatmul.mubr.msk.bf16.gmra.mxu1 %vm7056_vm3, %v14336_v1  ;;  %11018 = vmatprep.mubr.msk.bf16.mxu0 %vm7056_vm3, %v16357_v2 }
 0x296   : > { %10838 = vmatprep.mubr.msk.bf16.mxu1 %vm7056_vm3, %v14347_v60 }
 0x29c   : > { %11019 = vmatmul.mubr.msk.bf16.gmra.mxu0 %vm7056_vm3, %v16358_v33 }
 0x29d   : > { %10839 = vmatmul.mubr.msk.bf16.gmra.mxu1 %vm7056_vm3, %v14354_v59  ;;  %11022 = vmatprep.mubr.msk.bf16.mxu0 %vm7056_vm3, %v16359_v38 }
 0x29e   : > { %10842 = vmatprep.mubr.msk.bf16.mxu1 %vm7056_vm3, %v14367_v24 }
 0x2a4   : > { %11023 = vmatmul.mubr.msk.bf16.gmra.mxu0 %vm7056_vm3, %v14236_v43 }
 0x2a5   : > { %10843 = vmatmul.mubr.msk.bf16.gmra.mxu1 %vm7056_vm3, %v14374_v7  ;;  %11026 = vmatprep.mubr.msk.bf16.mxu0 %vm7056_vm3, %v14493_v16 }
 0x2a6   : > { %10846 = vmatprep.mubr.msk.bf16.mxu1 %vm7056_vm3, %v14387_v31 }
 0x2ac   : > { %11027 = vmatmul.mubr.msk.bf16.gmra.mxu0 %vm7056_vm3, %v8688_v40  ;;  %v14529_v40 = vpop.f32.mrf.mxu0 }
 0x2ad   : > { %10847 = vmatmul.mubr.msk.bf16.gmra.mxu1 %vm7056_vm3, %v14394_v4  ;;  %16362 = vst [vmem:[#allocation27_spill] sm:$0xff] %v14529_v40 }
 0x2ae   : > { %10890 = vmatprep.mubr.msk.bf16.mxu1 %vm7056_vm3, %v16360_v29  ;;  %v14531_v29 = vpop.f32.mrf.mxu1  ;;  %v14533_v14 = vpop.f32.mrf.mxu0 }
 0x2af   : > { %16363 = vst [vmem:[#allocation28_spill] sm:$0xff] %v14533_v14 }
 0x2b5   : > { %10891 = vmatmul.mubr.msk.bf16.vlgmr.msra.gmra.mxu1 %vm7056_vm3, %v16347_v10  ;;  %v14539_v10 = vpop.f32.mrf.mxu1 }
 0x2b6   : > { %10959 = vmatpush3.bf16.msra.mxu1 %v11176_v63  ;;  %10894 = vmatprep.mubr.msk.bf16.mxu1 %vm7056_vm3, %v16348_v13  ;;  %v14541_v13 = vpop.f32.mrf.mxu0 }
 0x2b7   : > { %10960 = vmatprep.subr.bf16.mxu1 %v11177_v58  ;;  %16364 = vst [vmem:[#allocation30_spill] sm:$0xff] %v14541_v13  ;;  %v14545_v4 = vpop.f32.mrf.mxu1 }
 0x2b8   : > { %v14543_v63 = vpop.f32.mrf.mxu0 }
 0x2b9   : > { %16365 = vst [vmem:[#allocation29_spill] sm:$0xff] %v14543_v63 }
 0x2ba   : > { %10961 = vmatpush3.bf16.msra.mxu1 %v11177_v58  ;;  %v14547_v58 = vpop.f32.mrf.mxu1 }
 0x2bb   : > { %11030 = vmatprep.subr.bf16.mxu1 %v11178_v32 }
 0x2bc   : > { %v14555_v14 = vpop.f32.mrf.mxu1 }
 0x2bd   : > { %10895 = vmatmul.mubr.msk.bf16.gmra.mxu1 %vm7056_vm3, %v16349_v46  ;;  %v14553_v46 = vpop.f32.mrf.mxu0 }
 0x2be   : > { %10898 = vmatprep.mubr.msk.bf16.mxu1 %vm7056_vm3, %v16350_v39  ;;  %16366 = vst [vmem:[#allocation25_spill] sm:$0xff] %v14553_v46  ;;  %v14559_v40 = vpop.f32.mrf.mxu1 }
 0x2bf   : > { %v14557_v39 = vpop.f32.mrf.mxu0  ;;  %16368 = vst [vmem:[#allocation33_spill] sm:$0xff] %v14559_v40 }
 0x2c0   : > { %16367 = vst [vmem:[#allocation32_spill] sm:$0xff] %v14557_v39  ;;  %v14569_v13 = vpop.f32.mrf.mxu1 }
 0x2c1   : > { %v14565_v63 = vpop.f32.mrf.mxu0  ;;  %16371 = vst [vmem:[#allocation36_spill] sm:$0xff] %v14569_v13 }
 0x2c2   : > { %16369 = vst [vmem:[#allocation34_spill] sm:$0xff] %v14565_v63 }
 0x2c5   : > { %10899 = vmatmul.mubr.msk.bf16.gmra.mxu1 %vm7056_vm3, %v16351_v44  ;;  %v14567_v44 = vpop.f32.mrf.mxu0 }
 0x2c6   : > { %10902 = vmatprep.mubr.msk.bf16.mxu1 %vm7056_vm3, %v16352_v34  ;;  %16370 = vst [vmem:[#allocation31_spill] sm:$0xff] %v14567_v44 }
 0x2c7   : > { %v14573_v46 = vpop.f32.mrf.mxu0 }
 0x2c8   : > { %16373 = vst [vmem:[#allocation37_spill] sm:$0xff] %v14573_v46 }
 0x2cd   : > { %10903 = vmatmul.mubr.msk.bf16.gmra.mxu1 %vm7056_vm3, %v16353_v55  ;;  %v14581_v55 = vpop.f32.mrf.mxu0 }
 0x2ce   : > { %10906 = vmatprep.mubr.msk.bf16.mxu1 %vm7056_vm3, %v16354_v54  ;;  %16375 = vst [vmem:[#allocation39_spill] sm:$0xff] %v14581_v55 }
 0x2cf   : > { %v14585_v63 = vpop.f32.mrf.mxu0 }
 0x2d0   : > { %16377 = vst [vmem:[#allocation48_spill] sm:$0xff] %v14585_v63 }
 0x2d1   : > { %v14571_v34 = vpop.f32.mrf.mxu1  ;;  %v14593_v46 = vpop.f32.mrf.mxu0 }
 0x2d2   : > { %16372 = vst [vmem:[#allocation35_spill] sm:$0xff] %v14571_v34  ;;  %16379 = vst [vmem:[#allocation44_spill] sm:$0xff] %v14593_v46 }
 0x2d3   : > { %v14575_v31 = vpop.f32.mrf.mxu1  ;;  %v14597_v39 = vpop.f32.mrf.mxu0 }
 0x2d4   : > { %16374 = vst [vmem:[#allocation38_spill] sm:$0xff] %v14575_v31  ;;  %16381 = vst [vmem:[#allocation43_spill] sm:$0xff] %v14597_v39 }
 0x2d5   : > { %10907 = vmatmul.mubr.msk.bf16.gmra.mxu1 %vm7056_vm3, %v16355_v17  ;;  %v14583_v54 = vpop.f32.mrf.mxu1  ;;  %v14605_v63 = vpop.f32.mrf.mxu0 }
 0x2d6   : > { %10910 = vmatprep.mubr.msk.bf16.mxu1 %vm7056_vm3, %v16356_v51  ;;  %16376 = vst [vmem:[#allocation5_spill] sm:$0xff] %v14583_v54  ;;  %16383 = vst [vmem:[#allocation50_spill] sm:$0xff] %v14605_v63 }
 0x2d7   : > { %v14587_v44 = vpop.f32.mrf.mxu1  ;;  %v14609_v55 = vpop.f32.mrf.mxu0 }
 0x2d8   : > { %16378 = vst [vmem:[#allocation45_spill] sm:$0xff] %v14587_v44  ;;  %16385 = vst [vmem:[#allocation42_spill] sm:$0xff] %v14609_v55 }
 0x2d9   : > { %v14613_v46 = vpop.f32.mrf.mxu0 }
 0x2da   : > { %v14595_v17 = vpop.f32.mrf.mxu1  ;;  %16386 = vst [vmem:[#allocation47_spill] sm:$0xff] %v14613_v46  ;;  %v11179_v46 = vld [vmem:[%s15951_s5 + $0x80] sm:$0xff]  }
 0x2db   : > { %16380 = vst [vmem:[#allocation46_spill] sm:$0xff] %v14595_v17 }
 0x2dc   : > { %v14599_v51 = vpop.f32.mrf.mxu1 }
 0x2dd   : > { %10911 = vmatmul.mubr.msk.bf16.gmra.mxu1 %vm7056_vm3, %v16357_v2  ;;  %16382 = vst [vmem:[#allocation40_spill] sm:$0xff] %v14599_v51 }
 0x2de   : > { %10914 = vmatprep.mubr.msk.bf16.mxu1 %vm7056_vm3, %v16358_v33  ;;  %v14607_v2 = vpop.f32.mrf.mxu1 }
 0x2df   : > { %16384 = vst [vmem:[#allocation16_spill] sm:$0xff] %v14607_v2 }
 0x2e0   : > { %v14611_v33 = vpop.f32.mrf.mxu1 }
 0x2e5   : > { %10915 = vmatmul.mubr.msk.bf16.gmra.mxu1 %vm7056_vm3, %v16359_v38 }
 0x2e6   : > { %10918 = vmatprep.mubr.msk.bf16.mxu1 %vm7056_vm3, %v14236_v43  ;;  %v14623_v43 = vpop.f32.mrf.mxu0 }
 0x2e7   : > { %16387 = vst [vmem:[#allocation6_spill] sm:$0xff] %v14623_v43 }
 0x2e8   : > { %v14632_v55 = vpop.f32.mrf.mxu0 }
 0x2e9   : > { %16388 = vst [vmem:[#allocation10_spill] sm:$0xff] %v14632_v55 }
 0x2ed   : > { %v14615_v17 = vpop.f32.mrf.mxu1  ;;  %10919 = vmatmul.mubr.msk.bf16.gmra.mxu1 %vm7056_vm3, %v14493_v16  ;;  %v14642_v16 = vpop.f32.mrf.mxu0 }
 0x2ee   : > { %10962 = vmatprep.mubr.msk.bf16.mxu1 %vm7056_vm3, %v16334_v12  ;;  %16389 = vst [vmem:[#allocation11_spill] sm:$0xff] %v14642_v16 }
 0x2ef   : > { %v14621_v38 = vpop.f32.mrf.mxu1  ;;  %v14646_v51 = vpop.f32.mrf.mxu0 }
 0x2f0   : > { %16390 = vst [vmem:[#allocation14_spill] sm:$0xff] %v14646_v51 }
 0x2f1   : > { %v14625_v63 = vpop.f32.mrf.mxu1 }
 0x2f3   : > { %v14627_v39 = vpop.f32.mrf.mxu1 }
 0x2f5   : > { %v14634_v2 = vpop.f32.mrf.mxu1  ;;  %10963 = vmatmul.mubr.msk.bf16.vlgmr.msra.gmra.mxu1 %vm7056_vm3, %v13114_v47  ;;  %v14656_v47 = vpop.f32.mrf.mxu0 }
 0x2f6   : > { %11031 = vmatpush3.bf16.msra.mxu1 %v11178_v32  ;;  %10966 = vmatprep.mubr.msk.bf16.mxu1 %vm7056_vm3, %v13252_v56  ;;  %16391 = vst [vmem:[#allocation15_spill] sm:$0xff] %v14656_v47 }
 0x2f7   : > { %v14640_v12 = vpop.f32.mrf.mxu1  ;;  %11032 = vmatprep.subr.bf16.mxu1 %v11179_v46  ;;  %v14662_v16 = vpop.f32.mrf.mxu0 }
 0x2f8   : > { %16392 = vst [vmem:[#allocation7_spill] sm:$0xff] %v14662_v16 }
 0x2f9   : > { %v14644_v43 = vpop.f32.mrf.mxu1 }
 0x2fa   : > { %11033 = vmatpush3.bf16.msra.mxu1 %v11179_v46 }
 0x2fb   : > { %v14648_v55 = vpop.f32.mrf.mxu1 }
 0x2fd   : > { %v14650_v44 = vpop.f32.mrf.mxu1  ;;  %10967 = vmatmul.mubr.msk.bf16.gmra.mxu1 %vm7056_vm3, %v13416_v49  ;;  %v14672_v49 = vpop.f32.mrf.mxu0 }
 0x2fe   : > { %10970 = vmatprep.mubr.msk.bf16.mxu1 %vm7056_vm3, %v13462_v35  ;;  %16393 = vst [vmem:[#allocation12_spill] sm:$0xff] %v14672_v49 }
 0x2ff   : > { %v14658_v56 = vpop.f32.mrf.mxu1  ;;  %v14676_v47 = vpop.f32.mrf.mxu0 }
 0x300   : > { %16394 = vst [vmem:[#allocation13_spill] sm:$0xff] %v14676_v47 }
 0x301   : > { %v14660_v32 = vpop.f32.mrf.mxu1  ;;  %v14682_v16 = vpop.f32.mrf.mxu0 }
 0x302   : > { %16395 = vst [vmem:[#allocation18_spill] sm:$0xff] %v14682_v16 }
 0x303   : > { %v14664_v46 = vpop.f32.mrf.mxu1 }
 0x305   : > { %v14666_v51 = vpop.f32.mrf.mxu1  ;;  %10971 = vmatmul.mubr.msk.bf16.gmra.mxu1 %vm7056_vm3, %v13522_v37 }
 0x306   : > { %10974 = vmatprep.mubr.msk.bf16.mxu1 %vm7056_vm3, %v13586_v41  ;;  %v14692_v41 = vpop.f32.mrf.mxu0 }
 0x307   : > { %v14674_v35 = vpop.f32.mrf.mxu1  ;;  %16396 = vst [vmem:[#allocation17_spill] sm:$0xff] %v14692_v41 }
 0x308   : > { %v14698_v34 = vpop.f32.mrf.mxu0 }
 0x309   : > { %v14678_v54 = vpop.f32.mrf.mxu1  ;;  %16397 = vst [vmem:[#allocation8_spill] sm:$0xff] %v14698_v34 }
 0x30b   : > { %v14680_v31 = vpop.f32.mrf.mxu1 }
 0x30d   : > { %v14684_v7 = vpop.f32.mrf.mxu1  ;;  %10975 = vmatmul.mubr.msk.bf16.gmra.mxu1 %vm7056_vm3, %v13807_v42  ;;  %v14706_v42 = vpop.f32.mrf.mxu0 }
 0x30e   : > { %10978 = vmatprep.mubr.msk.bf16.mxu1 %vm7056_vm3, %v13889_v52  ;;  %16398 = vst [vmem:[#allocation41_spill] sm:$0xff] %v14706_v42 }
 0x30f   : > { %v14690_v37 = vpop.f32.mrf.mxu1  ;;  %v14712_v41 = vpop.f32.mrf.mxu0 }
 0x310   : > { %16400 = vst [vmem:[#allocation49_spill] sm:$0xff] %v14712_v41 }
 0x311   : > { %v14694_v49 = vpop.f32.mrf.mxu1 }
 0x313   : > { %v14696_v47 = vpop.f32.mrf.mxu1 }
 0x315   : > { %v14700_v13 = vpop.f32.mrf.mxu1  ;;  %10979 = vmatmul.mubr.msk.bf16.gmra.mxu1 %vm7056_vm3, %v13916_v27  ;;  %v14722_v27 = vpop.f32.mrf.mxu0 }
 0x316   : > { %10982 = vmatprep.mubr.msk.bf16.mxu1 %vm7056_vm3, %v13986_v26  ;;  %16401 = vst [vmem:[#allocation51_spill] sm:$0xff] %v14722_v27 }
 0x317   : > { %v14708_v52 = vpop.f32.mrf.mxu1  ;;  %v14728_v34 = vpop.f32.mrf.mxu0 }
 0x318   : > { %16404 = vst [vmem:[#allocation54_spill] sm:$0xff] %v14728_v34 }
 0x319   : > { %v14710_v16 = vpop.f32.mrf.mxu1 }
 0x31a   : > { %16399 = vst [vmem:[#allocation9_spill] sm:$0xff] %v14710_v16 }
 0x31b   : > { %v14714_v40 = vpop.f32.mrf.mxu1 }
 0x31d   : > { %v14716_v24 = vpop.f32.mrf.mxu1  ;;  %10983 = vmatmul.mubr.msk.bf16.gmra.mxu1 %vm7056_vm3, %v14055_v19  ;;  %v14738_v19 = vpop.f32.mrf.mxu0 }
 0x31e   : > { %10986 = vmatprep.mubr.msk.bf16.mxu1 %vm7056_vm3, %v16341_v6  ;;  %16406 = vst [vmem:[#allocation56_spill] sm:$0xff] %v14738_v19 }
 0x31f   : > { %v14724_v26 = vpop.f32.mrf.mxu1 }
 0x320   : > { %16402 = vst [vmem:[#allocation52_spill] sm:$0xff] %v14724_v26  ;;  %v14744_v26 = vpop.f32.mrf.mxu0 }
 0x321   : > { %v14726_v42 = vpop.f32.mrf.mxu1  ;;  %16408 = vst [vmem:[#allocation58_spill] sm:$0xff] %v14744_v26 }
 0x322   : > { %16403 = vst [vmem:[#allocation53_spill] sm:$0xff] %v14726_v42 }
 0x323   : > { %v14730_v16 = vpop.f32.mrf.mxu1 }
 0x324   : > { %16405 = vst [vmem:[#allocation55_spill] sm:$0xff] %v14730_v16 }
 0x325   : > { %v14732_v41 = vpop.f32.mrf.mxu1  ;;  %10987 = vmatmul.mubr.msk.bf16.gmra.mxu1 %vm7056_vm3, %v14217_v62 }
 0x326   : > { %10990 = vmatprep.mubr.msk.bf16.mxu1 %vm7056_vm3, %v14232_v45  ;;  %v14756_v45 = vpop.f32.mrf.mxu0 }
 0x327   : > { %v14740_v6 = vpop.f32.mrf.mxu1 }
 0x329   : > { %v14742_v27 = vpop.f32.mrf.mxu1 }
 0x32a   : > { %16407 = vst [vmem:[#allocation57_spill] sm:$0xff] %v14742_v27 }
 0x32b   : > { %v7443_v42 = vpop.f32.mrf.mxu1 }
 0x32c   : > { %v14747_v34 = vadd.f32 %v7443_v42, %v14611_v33  ;;  %v14764_v42 = vpop.f32.mrf.mxu0 }
 0x32d   : > { %v10812_v16 = vpop.f32.mrf.mxu1  ;;  %10991 = vmatmul.mubr.msk.bf16.gmra.mxu1 %vm7056_vm3, %v13556_v28  ;;  %v7353_v28 = vadd.f32 %v14634_v2, %v14445_v9  ;;  %v7356_v9 = vadd.f32 %v14644_v43, %v14457_v15  ;;  %v7361_v15 = vadd.f32 %v14658_v56, %v14480_v23 }
 0x32e   : > { %16409 = vst [vmem:[#allocation59_spill] sm:$0xff] %v14747_v34  ;;  %v14752_v62 = vadd.f32 %v10812_v16, %v14615_v17  ;;  %11034 = vmatprep.mubr.msk.bf16.mxu1 %vm7056_vm3, %v14261_v18 }
 0x32f   : > { %v7456_v19 = vpop.f32.mrf.mxu1 }
 0x330   : > { %v14759_v27 = vadd.f32 %v7456_v19, %v14621_v38  ;;  %v7345_v38 = vadd.f32 %v14640_v12, %v14455_v30 }
 0x331   : > { %v10813_v26 = vpop.f32.mrf.mxu1 }
 0x332   : > { %v14762_v33 = vadd.f32 %v10813_v26, %v14625_v63  ;;  %v14779_v63 = vpop.f32.mrf.mxu0 }
 0x333   : > { %v7459_v34 = vpop.f32.mrf.mxu1 }
 0x334   : > { %v14769_v17 = vadd.f32 %v7459_v34, %v14627_v39  ;;  %v14789_v30 = vpop.f32.mrf.mxu0 }
 0x335   : > { %v10820_v18 = vpop.f32.mrf.mxu1  ;;  %11035 = vmatmul.mubr.msk.bf16.vlgmr.msra.gmra.mxu1 %vm7056_vm3, %v14277_v36  ;;  %v7348_v36 = vadd.f32 %v14648_v55, %v14467_v11 }
 0x336   : > { %v14775_v16 = vadd.f32 %v10820_v18, %v7353_v28  ;;  %11038 = vmatprep.mubr.msk.bf16.mxu1 %vm7056_vm3, %v14293_v61  ;;  %v7369_v61 = vadd.f32 %v14650_v44, %v14470_v3  ;;  %v14803_v11 = vpop.f32.mrf.mxu0  ;;  %v7372_v3 = vadd.f32 %v14660_v32, %v14484_v25  ;;  %v7377_v25 = vadd.f32 %v14674_v35, %v14504_v53 }
 0x337   : > { %v7651_v26 = vpop.f32.mrf.mxu1 }
 0x338   : > { %v14783_v39 = vadd.f32 %v7651_v26, %v7345_v38  ;;  %v14813_v23 = vpop.f32.mrf.mxu0 }
 0x339   : > { %v10821_v34 = vpop.f32.mrf.mxu1  ;;  %16410 = vst [vmem:[#allocation60_spill] sm:$0xff] %v14813_v23 }
 0x33a   : > { %v14787_v2 = vadd.f32 %v10821_v34, %v7356_v9 }
 0x33b   : > { %v7654_v12 = vpop.f32.mrf.mxu1 }
 0x33c   : > { %v14793_v19 = vadd.f32 %v7654_v12, %v7348_v36 }
 0x33d   : > { %v10824_v28 = vpop.f32.mrf.mxu1  ;;  %11039 = vmatmul.mubr.msk.bf16.gmra.mxu1 %vm7056_vm3, %v14300_v21  ;;  %v7364_v21 = vadd.f32 %v14664_v46, %v14499_v57  ;;  %v14827_v57 = vpop.f32.mrf.mxu0 }
 0x33e   : > { %v14799_v43 = vadd.f32 %v10824_v28, %v7369_v61  ;;  %11042 = vmatprep.mubr.msk.bf16.mxu1 %vm7056_vm3, %v14311_v8  ;;  %v7385_v8 = vadd.f32 %v14666_v51, %v14501_v5  ;;  %v7388_v5 = vadd.f32 %v14678_v54, %v14511_v22  ;;  %v7393_v22 = vadd.f32 %v14690_v37, %v14531_v29 }
 0x33f   : > { %v7667_v55 = vpop.f32.mrf.mxu1  ;;  %v14837_v53 = vpop.f32.mrf.mxu0 }
 0x340   : > { %v14807_v44 = vadd.f32 %v7667_v55, %v7361_v15 }
 0x341   : > { %v10825_v18 = vpop.f32.mrf.mxu1 }
 0x342   : > { %v14811_v38 = vadd.f32 %v10825_v18, %v7372_v3 }
 0x343   : > { %v7670_v56 = vpop.f32.mrf.mxu1 }
 0x344   : > { %v14817_v26 = vadd.f32 %v7670_v56, %v7364_v21  ;;  %v16413_v21 = vld [vmem:[#allocation33_spill] sm:$0xff] }
 0x345   : > { %v10828_v9 = vpop.f32.mrf.mxu1  ;;  %11043 = vmatmul.mubr.msk.bf16.gmra.mxu1 %vm7056_vm3, %v14318_v20  ;;  %v7380_v20 = vadd.f32 %v14680_v31, %v14518_v0  ;;  %v14851_v31 = vpop.f32.mrf.mxu0  ;;  %v16414_v56 = vld [vmem:[#allocation9_spill] sm:$0xff] }
 0x346   : > { %v14823_v32 = vadd.f32 %v10828_v9, %v7385_v8  ;;  %11046 = vmatprep.mubr.msk.bf16.mxu1 %vm7056_vm3, %v14329_v50  ;;  %v7401_v50 = vadd.f32 %v14684_v7, %v14524_v48  ;;  %v7404_v7 = vadd.f32 %v14694_v49, %v14539_v10  ;;  %v7409_v10 = vadd.f32 %v14708_v52, %v14555_v14  ;;  %v16415_v9 = vld [vmem:[#allocation36_spill] sm:$0xff] }
 0x347   : > { %v7683_v46 = vpop.f32.mrf.mxu1  ;;  %v14861_v29 = vpop.f32.mrf.mxu0 }
 0x348   : > { %v14831_v51 = vadd.f32 %v7683_v46, %v7377_v25  ;;  %16411 = vst [vmem:[#allocation61_spill] sm:$0xff] %v14861_v29  ;;  %v16416_v46 = vld [vmem:[#allocation35_spill] sm:$0xff] }
 0x349   : > { %v10829_v34 = vpop.f32.mrf.mxu1 }
 0x34a   : > { %v14835_v36 = vadd.f32 %v10829_v34, %v7388_v5  ;;  %v7433_v5 = vadd.f32 %v14716_v24, %v16416_v46  ;;  %v16427_v46 = vld [vmem:[#allocation19_spill] sm:$0xff] }
 0x34b   : > { %v7686_v35 = vpop.f32.mrf.mxu1 }
 0x34c   : > { %v14841_v12 = vadd.f32 %v7686_v35, %v7380_v20  ;;  %v16417_v35 = vld [vmem:[#allocation22_spill] sm:$0xff] }
 0x34d   : > { %v10832_v61 = vpop.f32.mrf.mxu1  ;;  %11047 = vmatmul.mubr.msk.bf16.gmra.mxu1 %vm7056_vm3, %v14336_v1  ;;  %v7396_v1 = vadd.f32 %v14696_v47, %v14545_v4  ;;  %v16412_v4 = vld [vmem:[#allocation21_spill] sm:$0xff]  ;;  %v14875_v47 = vpop.f32.mrf.mxu0 }
 0x34e   : > { %v14847_v54 = vadd.f32 %v10832_v61, %v7401_v50  ;;  %11050 = vmatprep.mubr.msk.bf16.mxu1 %vm7056_vm3, %v14347_v60  ;;  %v7417_v60 = vadd.f32 %v14700_v13, %v14547_v58  ;;  %v7420_v13 = vadd.f32 %v16414_v56, %v16413_v21  ;;  %v16418_v50 = vld [vmem:[#allocation38_spill] sm:$0xff]  ;;  %v16419_v61 = vld [vmem:[#allocation52_spill] sm:$0xff] }
 0x34f   : > { %v7699_v0 = vpop.f32.mrf.mxu1  ;;  %v14885_v14 = vpop.f32.mrf.mxu0 }
 0x350   : > { %v14855_v48 = vadd.f32 %v7699_v0, %v7393_v22  ;;  %v7425_v22 = vadd.f32 %v16419_v61, %v16418_v50  ;;  %v16429_v50 = vld [vmem:[#allocation24_spill] sm:$0xff] }
 0x351   : > { %v10833_v28 = vpop.f32.mrf.mxu1  ;;  %v11180_v61 = vld [vmem:[%s15954_s8 + $0x18] sm:$0xff]  }
 0x352   : > { %v14859_v15 = vadd.f32 %v10833_v28, %v7404_v7  ;;  %v14899_v7 = vpop.f32.mrf.mxu0  ;;  %11066 = vmatprep.subr.bf16.mxu0 %v11180_v61 }
 0x353   : > { %v7702_v37 = vpop.f32.mrf.mxu1  ;;  %11067 = vmatpush3.bf16.msra.mxu0 %v11180_v61 }
 0x354   : > { %v14865_v55 = vadd.f32 %v7702_v37, %v7396_v1  ;;  %v16421_v1 = vld [vmem:[#allocation5_spill] sm:$0xff]  ;;  %v14909_v56 = vpop.f32.mrf.mxu0 }
 0x355   : > { %v10836_v3 = vpop.f32.mrf.mxu1  ;;  %11051 = vmatmul.mubr.msk.bf16.gmra.mxu1 %vm7056_vm3, %v14354_v59  ;;  %v7412_v59 = vadd.f32 %v14714_v40, %v16415_v9  ;;  %v16420_v40 = vld [vmem:[#allocation23_spill] sm:$0xff]  ;;  %v16422_v37 = vld [vmem:[#allocation53_spill] sm:$0xff]  ;;  %16425 = vst [vmem:[#allocation21_spill] sm:$0xff] %v14909_v56 }
 0x356   : > { %v14871_v49 = vadd.f32 %v10836_v3, %v7417_v60  ;;  %11054 = vmatprep.mubr.msk.bf16.mxu1 %vm7056_vm3, %v16412_v4  ;;  %v7436_v24 = vadd.f32 %v16422_v37, %v16421_v1  ;;  %v16424_v4 = vld [vmem:[#allocation55_spill] sm:$0xff] }
 0x357   : > { %v7715_v18 = vpop.f32.mrf.mxu1 }
 0x358   : > { %v14879_v58 = vadd.f32 %v7715_v18, %v7409_v10  ;;  %v16423_v10 = vld [vmem:[#allocation45_spill] sm:$0xff] }
 0x359   : > { %v10837_v8 = vpop.f32.mrf.mxu1  ;;  %v7428_v18 = vadd.f32 %v16424_v4, %v16423_v10  ;;  %v16432_v4 = vld [vmem:[#allocation59_spill] sm:$0xff] }
 0x35a   : > { %v14883_v25 = vadd.f32 %v10837_v8, %v7420_v13  ;;  %v16426_v8 = vld [vmem:[#allocation46_spill] sm:$0xff] }
 0x35b   : > { %v7718_v52 = vpop.f32.mrf.mxu1  ;;  %v7449_v9 = vadd.f32 %v14732_v41, %v16426_v8  ;;  %v16433_v8 = vld [vmem:[#allocation20_spill] sm:$0xff] }
 0x35c   : > { %v14889_v34 = vadd.f32 %v7718_v52, %v7412_v59 }
 0x35d   : > { %v10840_v20 = vpop.f32.mrf.mxu1  ;;  %11055 = vmatmul.mubr.msk.bf16.gmra.mxu1 %vm7056_vm3, %v16417_v35 }
 0x35e   : > { %v14895_v0 = vadd.f32 %v10840_v20, %v7433_v5  ;;  %11058 = vmatprep.mubr.msk.bf16.mxu1 %vm7056_vm3, %v16420_v40  ;;  %v16428_v5 = vld [vmem:[#allocation40_spill] sm:$0xff] }
 0x35f   : > { %v7731_v28 = vpop.f32.mrf.mxu1  ;;  %v7441_v20 = vadd.f32 %v14740_v6, %v16428_v5  ;;  %v16430_v40 = vld [vmem:[#allocation16_spill] sm:$0xff] }
 0x360   : > { %v14903_v60 = vadd.f32 %v7731_v28, %v7425_v22  ;;  %v14926_v22 = vpop.f32.mrf.mxu0  ;;  %v16431_v28 = vld [vmem:[#allocation57_spill] sm:$0xff] }
 0x361   : > { %v10841_v3 = vpop.f32.mrf.mxu1  ;;  %v7452_v1 = vadd.f32 %v16431_v28, %v16430_v40  ;;  %v16435_v28 = vld [vmem:[#allocation26_spill] sm:$0xff] }
 0x362   : > { %v14907_v21 = vadd.f32 %v10841_v3, %v7436_v24  ;;  %v14934_v3 = vpop.f32.mrf.mxu0 }
 0x363   : > { %v7734_v13 = vpop.f32.mrf.mxu1 }
 0x364   : > { %v14913_v59 = vadd.f32 %v7734_v13, %v7428_v18 }
 0x365   : > { %v10844_v52 = vpop.f32.mrf.mxu1  ;;  %11059 = vmatmul.mubr.msk.bf16.gmra.mxu1 %vm7056_vm3, %v16427_v46 }
 0x366   : > { %v14919_v35 = vadd.f32 %v10844_v52, %v7449_v9  ;;  %11062 = vmatprep.mubr.msk.bf16.mxu1 %vm7056_vm3, %v16429_v50  ;;  %v14944_v52 = vpop.f32.mrf.mxu0 }
 0x367   : > { %v7747_v41 = vpop.f32.mrf.mxu1 }
 0x368   : > { %v14930_v37 = vadd.f32 %v7747_v41, %v7441_v20  ;;  %v14952_v61 = vpop.f32.mrf.mxu0 }
 0x369   : > { %v10845_v24 = vpop.f32.mrf.mxu1  ;;  %16434 = vst [vmem:[#allocation33_spill] sm:$0xff] %v14952_v61 }
 0x36a   : > { %v14932_v6 = vadd.f32 %v10845_v24, %v7452_v1 }
 0x36b   : > { %v7750_v10 = vpop.f32.mrf.mxu1 }
 0x36c   : > { %v14937_v18 = vadd.f32 %v7750_v10, %v16432_v4  ;;  %v16436_v10 = vld [vmem:[#allocation27_spill] sm:$0xff]  ;;  %v14963_v4 = vpop.f32.mrf.mxu0 }
 0x36d   : > { %v10848_v13 = vpop.f32.mrf.mxu1  ;;  %11063 = vmatmul.mubr.msk.bf16.gmra.mxu1 %vm7056_vm3, %v16433_v8  ;;  %v16437_v8 = vld [vmem:[#allocation28_spill] sm:$0xff] }
 0x36e   : > { %v14942_v9 = vadd.f32 %v10848_v13, %v14752_v62  ;;  %v7993_v62 = vadd.f32 %v16435_v28, %v14775_v16  ;;  %v14973_v28 = vpop.f32.mrf.mxu0 }
 0x36f   : > { %v7763_v46 = vpop.f32.mrf.mxu1 }
 0x370   : > { %v14947_v5 = vadd.f32 %v7763_v46, %v14759_v27  ;;  %v7991_v27 = vadd.f32 %v16436_v10, %v14783_v39  ;;  %v7994_v46 = vadd.f32 %v16437_v8, %v14787_v2  ;;  %v16439_v39 = vld [vmem:[#allocation29_spill] sm:$0xff]  ;;  %v14984_v8 = vpop.f32.mrf.mxu0 }
 0x371   : > { %v10849_v20 = vpop.f32.mrf.mxu1  ;;  %v7997_v10 = vadd.f32 %v16439_v39, %v14799_v43  ;;  %v16442_v43 = vld [vmem:[#allocation34_spill] sm:$0xff] }
 0x372   : > { %v14950_v50 = vadd.f32 %v10849_v20, %v14762_v33 }
 0x373   : > { %v7766_v41 = vpop.f32.mrf.mxu1 }
 0x374   : > { %v14955_v40 = vadd.f32 %v7766_v41, %v14769_v17  ;;  %v16438_v41 = vld [vmem:[#allocation30_spill] sm:$0xff] }
 0x375   : > { %v10892_v1 = vpop.f32.mrf.mxu1  ;;  %v7992_v16 = vadd.f32 %v16438_v41, %v14793_v19 }
 0x376   : > { %v14959_v24 = vadd.f32 %v10892_v1, %v7993_v62 }
 0x377   : > { %v8088_v13 = vpop.f32.mrf.mxu1 }
 0x378   : > { %v14965_v33 = vadd.f32 %v8088_v13, %v7991_v27  ;;  %v16440_v27 = vld [vmem:[#allocation25_spill] sm:$0xff] }
 0x379   : > { %v10893_v20 = vpop.f32.mrf.mxu1  ;;  %v7995_v13 = vadd.f32 %v16440_v27, %v14807_v44  ;;  %v14995_v44 = vpop.f32.mrf.mxu0 }
 0x37a   : > { %v14969_v17 = vadd.f32 %v10893_v20, %v7994_v46  ;;  %v16441_v20 = vld [vmem:[#allocation32_spill] sm:$0xff]  ;;  %16443 = vst [vmem:[#allocation9_spill] sm:$0xff] %v14995_v44 }
 0x37b   : > { %v8091_v62 = vpop.f32.mrf.mxu1  ;;  %v7998_v41 = vadd.f32 %v16441_v20, %v14811_v38  ;;  %v16446_v38 = vld [vmem:[#allocation37_spill] sm:$0xff] }
 0x37c   : > { %v8216_v1 = vadd.f32 %v8091_v62, %v7992_v16  ;;  %v7999_v20 = vadd.f32 %v16446_v38, %v14831_v51  ;;  %v16450_v51 = vld [vmem:[#allocation44_spill] sm:$0xff] }
 0x37d   : > { %v10896_v61 = vpop.f32.mrf.mxu1  ;;  %v8005_v38 = vadd.f32 %v16450_v51, %v14847_v54 }
 0x37e   : > { %v14977_v56 = vadd.f32 %v10896_v61, %v7997_v10  ;;  %v14982_v2 = vadd.f32 %v14764_v42, %v8216_v1  ;;  %v7996_v61 = vadd.f32 %v16442_v43, %v14817_v26  ;;  %v16445_v10 = vld [vmem:[#allocation31_spill] sm:$0xff] }
 0x37f   : > { %v8104_v46 = vpop.f32.mrf.mxu1  ;;  %v8001_v27 = vadd.f32 %v16445_v10, %v14823_v32 }
 0x380   : > { %v8219_v19 = vadd.f32 %v8104_v46, %v7995_v13 }
 0x381   : > { %v10897_v16 = vpop.f32.mrf.mxu1 }
 0x382   : > { %v14988_v62 = vadd.f32 %v10897_v16, %v7998_v41  ;;  %v14993_v39 = vadd.f32 %v14789_v30, %v8219_v19  ;;  %v15005_v41 = vpop.f32.mrf.mxu0  ;;  %v16447_v30 = vld [vmem:[#allocation39_spill] sm:$0xff] }
 0x383   : > { %v8107_v42 = vpop.f32.mrf.mxu1  ;;  %v8002_v19 = vadd.f32 %v16447_v30, %v14835_v36 }
 0x384   : > { %v14997_v1 = vadd.f32 %v8107_v42, %v7996_v61  ;;  %v16448_v42 = vld [vmem:[#allocation48_spill] sm:$0xff]  ;;  %v15015_v10 = vpop.f32.mrf.mxu0 }
 0x385   : > { %v10900_v13 = vpop.f32.mrf.mxu1  ;;  %v8000_v32 = vadd.f32 %v16448_v42, %v14841_v12  ;;  %v16452_v12 = vld [vmem:[#allocation50_spill] sm:$0xff] }
 0x386   : > { %16444 = vst [vmem:[#allocation36_spill] sm:$0xff] %v14997_v1  ;;  %v15001_v46 = vadd.f32 %v10900_v13, %v8001_v27  ;;  %v15025_v30 = vpop.f32.mrf.mxu0  ;;  %v8006_v42 = vadd.f32 %v16452_v12, %v14859_v15  ;;  %v16456_v15 = vld [vmem:[#allocation6_spill] sm:$0xff] }
 0x387   : > { %v8120_v26 = vpop.f32.mrf.mxu1 }
 0x388   : > { %v15007_v16 = vadd.f32 %v8120_v26, %v7999_v20  ;;  %v16451_v26 = vld [vmem:[#allocation43_spill] sm:$0xff] }
 0x389   : > { %v10901_v43 = vpop.f32.mrf.mxu1  ;;  %v8003_v36 = vadd.f32 %v16451_v26, %v14855_v48  ;;  %v16455_v48 = vld [vmem:[#allocation47_spill] sm:$0xff] }
 0x38a   : > { %v15011_v61 = vadd.f32 %v10901_v43, %v8002_v19  ;;  %v8009_v26 = vadd.f32 %v16455_v48, %v14871_v49 }
 0x38b   : > { %v8123_v27 = vpop.f32.mrf.mxu1 }
 0x38c   : > { %v15017_v13 = vadd.f32 %v8123_v27, %v8000_v32  ;;  %v16453_v32 = vld [vmem:[#allocation42_spill] sm:$0xff] }
 0x38d   : > { %v10904_v44 = vpop.f32.mrf.mxu1  ;;  %v8004_v27 = vadd.f32 %v16453_v32, %v14865_v55 }
 0x38e   : > { %16449 = vst [vmem:[#allocation35_spill] sm:$0xff] %v15017_v13  ;;  %v15021_v20 = vadd.f32 %v10904_v44, %v8005_v38  ;;  %v8405_v44 = vpop.f32.mrf.mxu0  ;;  %v16465_v13 = vld [vmem:[#allocation13_spill] sm:$0xff] }
 0x38f   : > { %v8136_v19 = vpop.f32.mrf.mxu1 }
 0x390   : > { %v8227_v43 = vadd.f32 %v8136_v19, %v8003_v36  ;;  %v15044_v12 = vpop.f32.mrf.mxu0 }
 0x391   : > { %v10905_v29 = vpop.f32.mrf.mxu1 }
 0x392   : > { %v15029_v23 = vadd.f32 %v10905_v29, %v8006_v42  ;;  %v15034_v54 = vadd.f32 %v14885_v14, %v8227_v43  ;;  %v8007_v29 = vadd.f32 %v16456_v15, %v14879_v58  ;;  %v16457_v14 = vld [vmem:[#allocation10_spill] sm:$0xff]  ;;  %v15054_v48 = vpop.f32.mrf.mxu0 }
 0x393   : > { %v8139_v51 = vpop.f32.mrf.mxu1  ;;  %v8010_v43 = vadd.f32 %v16457_v14, %v14883_v25  ;;  %v16460_v58 = vld [vmem:[#allocation14_spill] sm:$0xff]  ;;  %v16461_v14 = vld [vmem:[#allocation15_spill] sm:$0xff] }
 0x394   : > { %v15036_v38 = vadd.f32 %v8139_v51, %v8004_v27  ;;  %v16458_v51 = vld [vmem:[#allocation11_spill] sm:$0xff]  ;;  %v8013_v15 = vadd.f32 %v16460_v58, %v14895_v0 }
 0x395   : > { %v10908_v36 = vpop.f32.mrf.mxu1  ;;  %v8008_v49 = vadd.f32 %v16458_v51, %v14889_v34  ;;  %v15067_v34 = vpop.f32.mrf.mxu0 }
 0x396   : > { %16454 = vst [vmem:[#allocation22_spill] sm:$0xff] %v15036_v38  ;;  %v15040_v19 = vadd.f32 %v10908_v36, %v8009_v26 }
 0x397   : > { %v8152_v42 = vpop.f32.mrf.mxu1 }
 0x398   : > { %v15046_v55 = vadd.f32 %v8152_v42, %v8007_v29  ;;  %v11181_v29 = vld [vmem:[%s15954_s8 + $0x10] sm:$0xff]  }
 0x399   : > { %v10909_v32 = vpop.f32.mrf.mxu1  ;;  %11068 = vmatprep.subr.bf16.mxu0 %v11181_v29 }
 0x39a   : > { %v15050_v27 = vadd.f32 %v10909_v32, %v8010_v43  ;;  %v8011_v43 = vadd.f32 %v16461_v14, %v14903_v60  ;;  %11069 = vmatpush3.bf16.msra.mxu0 %v11181_v29  ;;  %v8017_v29 = vadd.f32 %v16465_v13, %v14919_v35 }
 0x39b   : > { %v8155_v26 = vpop.f32.mrf.mxu1 }
 0x39c   : > { %v15056_v36 = vadd.f32 %v8155_v26, %v8008_v49  ;;  %v16462_v49 = vld [vmem:[#allocation7_spill] sm:$0xff] }
 0x39d   : > { %v10912_v42 = vpop.f32.mrf.mxu1  ;;  %v8014_v26 = vadd.f32 %v16462_v49, %v14907_v21  ;;  %v16466_v21 = vld [vmem:[#allocation18_spill] sm:$0xff] }
 0x39e   : > { %16459 = vst [vmem:[#allocation38_spill] sm:$0xff] %v15056_v36  ;;  %v15063_v25 = vadd.f32 %v10912_v42, %v8013_v15  ;;  %v16463_v36 = vld [vmem:[#allocation12_spill] sm:$0xff]  ;;  %v8421_v42 = vpop.f32.mrf.mxu0  ;;  %v8015_v49 = vadd.f32 %v16466_v21, %v14930_v37  ;;  %v16469_v37 = vld [vmem:[#allocation41_spill] sm:$0xff] }
 0x39f   : > { %v8168_v32 = vpop.f32.mrf.mxu1  ;;  %v8012_v38 = vadd.f32 %v16463_v36, %v14913_v59  ;;  %v8021_v21 = vadd.f32 %v16469_v37, %v14942_v9  ;;  %v16472_v9 = vld [vmem:[#allocation51_spill] sm:$0xff] }
 0x3a0   : > { %v8235_v51 = vadd.f32 %v8168_v32, %v8011_v43 }
 0x3a1   : > { %v10913_v0 = vpop.f32.mrf.mxu1 }
 0x3a2   : > { %v15071_v58 = vadd.f32 %v10913_v0, %v8014_v26  ;;  %v15076_v15 = vadd.f32 %v14973_v28, %v8235_v51  ;;  %v15086_v26 = vpop.f32.mrf.mxu0  ;;  %v16467_v28 = vld [vmem:[#allocation17_spill] sm:$0xff] }
 0x3a3   : > { %v8171_v60 = vpop.f32.mrf.mxu1  ;;  %v8018_v36 = vadd.f32 %v16467_v28, %v14932_v6  ;;  %v16470_v6 = vld [vmem:[#allocation49_spill] sm:$0xff] }
 0x3a4   : > { %v15078_v14 = vadd.f32 %v8171_v60, %v8012_v38  ;;  %v16468_v60 = vld [vmem:[#allocation8_spill] sm:$0xff]  ;;  %v15096_v13 = vpop.f32.mrf.mxu0  ;;  %v8019_v28 = vadd.f32 %v16470_v6, %v14947_v5 }
 0x3a5   : > { %v10916_v43 = vpop.f32.mrf.mxu1  ;;  %v8016_v35 = vadd.f32 %v16468_v60, %v14937_v18 }
 0x3a6   : > { %16464 = vst [vmem:[#allocation52_spill] sm:$0xff] %v15078_v14  ;;  %v15082_v32 = vadd.f32 %v10916_v43, %v8017_v29  ;;  %v15109_v18 = vpop.f32.mrf.mxu0 }
 0x3a7   : > { %v8184_v0 = vpop.f32.mrf.mxu1  ;;  %16471 = vst [vmem:[#allocation23_spill] sm:$0xff] %v15109_v18 }
 0x3a8   : > { %v15088_v59 = vadd.f32 %v8184_v0, %v8015_v49  ;;  %v11182_v49 = vld [vmem:[%s15954_s8 + $0x8] sm:$0xff]   ;;  %v15119_v1 = vpop.f32.mrf.mxu0 }
 0x3a9   : > { %v10917_v51 = vpop.f32.mrf.mxu1  ;;  %11070 = vmatprep.subr.bf16.mxu0 %v11182_v49 }
 0x3aa   : > { %v15092_v38 = vadd.f32 %v10917_v51, %v8018_v36  ;;  %11071 = vmatpush3.bf16.msra.mxu0 %v11182_v49 }
 0x3ab   : > { %v8187_v29 = vpop.f32.mrf.mxu1 }
 0x3ac   : > { %v8240_v43 = vadd.f32 %v8187_v29, %v8016_v35  ;;  %v8022_v35 = vadd.f32 %v16472_v9, %v14950_v50  ;;  %v15129_v9 = vpop.f32.mrf.mxu0 }
 0x3ad   : > { %v10920_v14 = vpop.f32.mrf.mxu1 }
 0x3ae   : > { %v15103_v0 = vadd.f32 %v10920_v14, %v8021_v21  ;;  %v15107_v36 = vadd.f32 %v8405_v44, %v8240_v43  ;;  %v16473_v14 = vld [vmem:[#allocation54_spill] sm:$0xff]  ;;  %v16474_v43 = vld [vmem:[#allocation56_spill] sm:$0xff] }
 0x3af   : > { %v8200_v51 = vpop.f32.mrf.mxu1  ;;  %v8020_v21 = vadd.f32 %v16473_v14, %v14955_v40  ;;  %v8435_v6 = vadd.f32 %v16474_v43, %v14959_v24  ;;  %v8436_v40 = vadd.f32 %v14756_v45, %v14969_v17  ;;  %v15137_v24 = vpop.f32.mrf.mxu0  ;;  %v11183_v43 = vld [vmem:[%s15954_s8] sm:$0xff]  }
 0x3b0   : > { %v15111_v60 = vadd.f32 %v8200_v51, %v8019_v28  ;;  %v16475_v51 = vld [vmem:[#allocation58_spill] sm:$0xff]  ;;  %11072 = vmatprep.subr.bf16.mxu0 %v11183_v43 }
 0x3b1   : > { %v10921_v29 = vpop.f32.mrf.mxu1  ;;  %v8433_v50 = vadd.f32 %v16475_v51, %v14965_v33  ;;  %v8439_v33 = vadd.f32 %v14779_v63, %v14977_v56  ;;  %v15149_v45 = vpop.f32.mrf.mxu0  ;;  %11073 = vmatpush3.bf16.msra.mxu0 %v11183_v43 }
 0x3b2   : > { %v15115_v37 = vadd.f32 %v10921_v29, %v8022_v35 }
 0x3b3   : > { %v8203_v5 = vpop.f32.mrf.mxu1  ;;  %v15158_v56 = vpop.f32.mrf.mxu0 }
 0x3b4   : > { %v8244_v44 = vadd.f32 %v8203_v5, %v8020_v21 }
 0x3b5   : > { %v10964_v18 = vpop.f32.mrf.mxu1 }
 0x3b6   : > { %v15123_v28 = vadd.f32 %v10964_v18, %v8435_v6  ;;  %v15127_v49 = vadd.f32 %v8421_v42, %v8244_v44 }
 0x3b7   : > { %v8519_v35 = vpop.f32.mrf.mxu1 }
 0x3b8   : > { %v15131_v29 = vadd.f32 %v8519_v35, %v8433_v50  ;;  %v8443_v35 = vadd.f32 %v14827_v57, %v15001_v46  ;;  %v8447_v46 = vadd.f32 %v14875_v47, %v15021_v20  ;;  %v8451_v47 = vadd.f32 %v14926_v22, %v15040_v19 }
 0x3b9   : > { %v10965_v14 = vpop.f32.mrf.mxu1  ;;  %v8455_v19 = vadd.f32 %v14963_v4, %v15063_v25  ;;  %v8459_v4 = vadd.f32 %v15005_v41, %v15082_v32 }
 0x3ba   : > { %v15135_v21 = vadd.f32 %v10965_v14, %v8436_v40 }
 0x3bb   : > { %v8522_v18 = vpop.f32.mrf.mxu1 }
 0x3bc   : > { %v15140_v5 = vadd.f32 %v8522_v18, %v14982_v2  ;;  %v8440_v2 = vadd.f32 %v14803_v11, %v14988_v62  ;;  %v15168_v18 = vpop.f32.mrf.mxu0 }
 0x3bd   : > { %v10968_v42 = vpop.f32.mrf.mxu1 }
 0x3be   : > { %v15144_v44 = vadd.f32 %v10968_v42, %v8439_v33  ;;  %v8444_v33 = vadd.f32 %v14851_v31, %v15011_v61  ;;  %v8448_v31 = vadd.f32 %v14899_v7, %v15029_v23  ;;  %v8452_v7 = vadd.f32 %v14944_v52, %v15050_v27 }
 0x3bf   : > { %v8535_v17 = vpop.f32.mrf.mxu1  ;;  %v8456_v52 = vadd.f32 %v14984_v8, %v15071_v58  ;;  %v8460_v58 = vadd.f32 %v15025_v30, %v15092_v38 }
 0x3c0   : > { %v15152_v6 = vadd.f32 %v8535_v17, %v14993_v39  ;;  %v8441_v39 = vadd.f32 %v14837_v53, %v15007_v16  ;;  %v15176_v17 = vpop.f32.mrf.mxu0 }
 0x3c1   : > { %v10969_v51 = vpop.f32.mrf.mxu1 }
 0x3c2   : > { %v15156_v63 = vadd.f32 %v10969_v51, %v8440_v2  ;;  %v15184_v16 = vpop.f32.mrf.mxu0 }
 0x3c3   : > { %v15160_v50 = vpop.f32.mrf.mxu1 }
 0x3c5   : > { %v10972_v40 = vpop.f32.mrf.mxu1 }
 0x3c6   : > { %v15164_v14 = vadd.f32 %v10972_v40, %v8443_v35 }
 0x3c7   : > { %v8551_v11 = vpop.f32.mrf.mxu1 }
 0x3c8   : > { %v15170_v62 = vadd.f32 %v8551_v11, %v8441_v39  ;;  %v15193_v39 = vpop.f32.mrf.mxu0 }
 0x3c9   : > { %v10973_v42 = vpop.f32.mrf.mxu1 }
 0x3ca   : > { %v15174_v43 = vadd.f32 %v10973_v42, %v8444_v33  ;;  %v15203_v42 = vpop.f32.mrf.mxu0 }
 0x3cb   : > { %v15178_v57 = vpop.f32.mrf.mxu1 }
 0x3cd   : > { %v10976_v2 = vpop.f32.mrf.mxu1 }
 0x3ce   : > { %v15182_v53 = vadd.f32 %v10976_v2, %v8447_v46 }
 0x3cf   : > { %v8567_v51 = vpop.f32.mrf.mxu1 }
 0x3d0   : > { %v15187_v35 = vadd.f32 %v8567_v51, %v15034_v54  ;;  %v8449_v54 = vadd.f32 %v14934_v3, %v15046_v55 }
 0x3d1   : > { %v10977_v61 = vpop.f32.mrf.mxu1 }
 0x3d2   : > { %v15191_v40 = vadd.f32 %v10977_v61, %v8448_v31  ;;  %v15211_v31 = vpop.f32.mrf.mxu0 }
 0x3d3   : > { %v15195_v11 = vpop.f32.mrf.mxu1 }
 0x3d4   : > { %v15219_v55 = vpop.f32.mrf.mxu0 }
 0x3d5   : > { %v10980_v20 = vpop.f32.mrf.mxu1 }
 0x3d6   : > { %v15199_v33 = vadd.f32 %v10980_v20, %v8451_v47 }
 0x3d7   : > { %v8583_v46 = vpop.f32.mrf.mxu1 }
 0x3d8   : > { %v15205_v23 = vadd.f32 %v8583_v46, %v8449_v54  ;;  %v15228_v46 = vpop.f32.mrf.mxu0 }
 0x3d9   : > { %v10981_v2 = vpop.f32.mrf.mxu1 }
 0x3da   : > { %v15209_v51 = vadd.f32 %v10981_v2, %v8452_v7 }
 0x3db   : > { %v15213_v22 = vpop.f32.mrf.mxu1 }
 0x3dd   : > { %v10984_v61 = vpop.f32.mrf.mxu1 }
 0x3de   : > { %v15217_v3 = vadd.f32 %v10984_v61, %v8455_v19  ;;  %v15238_v19 = vpop.f32.mrf.mxu0 }
 0x3df   : > { %v8599_v47 = vpop.f32.mrf.mxu1 }
 0x3e0   : > { %v15222_v20 = vadd.f32 %v8599_v47, %v15076_v15  ;;  %v8457_v15 = vadd.f32 %v15015_v10, %v15088_v59  ;;  %v8463_v10 = vadd.f32 %v15044_v12, %v15103_v0 }
 0x3e1   : > { %v10985_v27 = vpop.f32.mrf.mxu1 }
 0x3e2   : > { %v15226_v54 = vadd.f32 %v10985_v27, %v8456_v52  ;;  %v15246_v27 = vpop.f32.mrf.mxu0 }
 0x3e3   : > { %v15230_v7 = vpop.f32.mrf.mxu1 }
 0x3e5   : > { %v10988_v25 = vpop.f32.mrf.mxu1 }
 0x3e6   : > { %v15234_v2 = vadd.f32 %v10988_v25, %v8459_v4  ;;  %v8461_v25 = vadd.f32 %v15054_v48, %v15111_v60  ;;  %v8872_v48 = vadd.f32 %v15086_v26, %v15123_v28 }
 0x3e7   : > { %v8615_v61 = vpop.f32.mrf.mxu1 }
 0x3e8   : > { %v15240_v8 = vadd.f32 %v8615_v61, %v8457_v15  ;;  %v15257_v15 = vpop.f32.mrf.mxu0  ;;  %v8464_v61 = vadd.f32 %v15067_v34, %v15115_v37  ;;  %v8870_v34 = vadd.f32 %v15096_v13, %v15131_v29 }
 0x3e9   : > { %v10989_v47 = vpop.f32.mrf.mxu1 }
 0x3ea   : > { %v15244_v52 = vadd.f32 %v10989_v47, %v8460_v58  ;;  %v15265_v47 = vpop.f32.mrf.mxu0 }
 0x3eb   : > { %v8618_v41 = vpop.f32.mrf.mxu1 }
 0x3ec   : > { %v15249_v32 = vadd.f32 %v8618_v41, %v15107_v36  ;;  %v15275_v41 = vld [vmem:[%s15952_s6] ss:$0 sm:$0xff]  ;;  %v15279_v37 = vpop.f32.mrf.mxu0 }
 0x3ed   : > { %v10992_v59 = vpop.f32.mrf.mxu1 }
 0x3ee   : > { %v15253_v4 = vadd.f32 %v10992_v59, %v8463_v10 }
 0x3ef   : > { %v8631_v30 = vpop.f32.mrf.mxu1 }
 0x3f0   : > { %v15259_v38 = vadd.f32 %v8631_v30, %v8461_v25  ;;  %v16479_v25 = vld [vmem:[#allocation23_spill] sm:$0xff] }
 0x3f1   : > { %v10993_v58 = vpop.f32.mrf.mxu1  ;;  %v8873_v30 = vadd.f32 %v16479_v25, %v15135_v21  ;;  %v16484_v25 = vld [vmem:[#allocation35_spill] sm:$0xff] }
 0x3f2   : > { %16476 = vst [vmem:[#allocation5_spill] sm:$0xff] %v15259_v38  ;;  %v15263_v36 = vadd.f32 %v10993_v58, %v8464_v61  ;;  %v16491_v38 = vld [vmem:[#allocation9_spill] sm:$0xff] }
 0x3f3   : > { %v8634_v12 = vpop.f32.mrf.mxu1 }
 0x3f4   : > { %16477 = vst [vmem:[#allocation53_spill] sm:$0xff] %v15263_v36  ;;  %v15268_v0 = vadd.f32 %v8634_v12, %v15127_v49  ;;  %v15284_v49 = vld [vmem:[%s15953_s7] ss:$0 sm:$0xff]  ;;  %v8871_v12 = vadd.f32 %v15119_v1, %v15140_v5  ;;  %v8876_v1 = vadd.f32 %v15129_v9, %v15144_v44 }
 0x3f5   : > { %v11036_v60 = vpop.f32.mrf.mxu1 }
 0x3f6   : > { %16478 = vst [vmem:[#allocation45_spill] sm:$0xff] %v15268_v0  ;;  %v9090_v10 = vadd.f32 %v11036_v60, %v8872_v48  ;;  %v15295_v48 = vpop.f32.mrf.mxu0  ;;  %v16481_v60 = vld [vmem:[#allocation36_spill] sm:$0xff] }
 0x3f7   : > { %v8961_v59 = vpop.f32.mrf.mxu1  ;;  %v16482_v0 = vld [vmem:[#allocation60_spill] sm:$0xff] }
 0x3f8   : > { %v9129_v26 = vmul.f32 %v15275_v41, %v9090_v10  ;;  %v9088_v28 = vadd.f32 %v8961_v59, %v8870_v34  ;;  %v8438_v36 = vadd.f32 %v16482_v0, %v16481_v60  ;;  %v8874_v0 = vadd.f32 %v15137_v24, %v15152_v6 }
 0x3f9   : > { %v11037_v61 = vpop.f32.mrf.mxu1  ;;  %v8877_v24 = vadd.f32 %v15149_v45, %v15156_v63 }
 0x3fa   : > { %v15290_v58 = vadd.f32 %v15284_v49, %v9129_v26  ;;  %v9127_v13 = vmul.f32 %v15275_v41, %v9088_v28  ;;  %v9091_v29 = vadd.f32 %v11037_v61, %v8873_v30  ;;  %v8651_v28 = vadd.f32 %v15160_v50, %v8438_v36  ;;  %v16485_v30 = vld [vmem:[#allocation61_spill] sm:$0xff]  ;;  %v16486_v50 = vld [vmem:[#allocation22_spill] sm:$0xff] }
 0x3fb   : > { %v8964_v10 = vpop.f32.mrf.mxu1  ;;  %v8442_v61 = vadd.f32 %v16485_v30, %v16484_v25  ;;  %v16487_v36 = vld [vmem:[#allocation21_spill] sm:$0xff]  ;;  %v16488_v25 = vld [vmem:[#allocation38_spill] sm:$0xff] }
 0x3fc   : > { %16480 = vst [vmem:[#allocation55_spill] sm:$0xff] %v15290_v58  ;;  %v10363_v34 = vmul.f32 -1.442695, %v15290_v58  ;;  %v15301_v21 = vadd.f32 %v15284_v49, %v9127_v13  ;;  %v9130_v59 = vmul.f32 %v15275_v41, %v9091_v29  ;;  %v9089_v26 = vadd.f32 %v8964_v10, %v8871_v12  ;;  %v15316_v12 = vpop.f32.mrf.mxu0  ;;  %v16489_v30 = vld [vmem:[#allocation33_spill] sm:$0xff] }
 0x3fd   : > { %v11040_v5 = vpop.f32.mrf.mxu1  ;;  %v8446_v10 = vadd.f32 %v16487_v36, %v16486_v50  ;;  %v8450_v9 = vadd.f32 %v16489_v30, %v16488_v25 }
 0x3fe   : > { %16483 = vst [vmem:[#allocation46_spill] sm:$0xff] %v15301_v21  ;;  %11348 = vpow2.f32 %v10363_v34  ;;  %v10361_v60 = vmul.f32 -1.442695, %v15301_v21  ;;  %v15313_v13 = vadd.f32 %v15284_v49, %v9130_v59  ;;  %v9128_v29 = vmul.f32 %v15275_v41, %v9089_v26  ;;  %v16490_v21 = vld [vmem:[#allocation52_spill] sm:$0xff] }
 0x3ff   : > { %v9094_v44 = vadd.f32 %v11040_v5, %v8876_v1  ;;  %v8977_v58 = vpop.f32.mrf.mxu1  ;;  %v8655_v26 = vadd.f32 %v15178_v57, %v8442_v61  ;;  %v8454_v50 = vadd.f32 %v16491_v38, %v16490_v21  ;;  %v8875_v1 = vadd.f32 %v15158_v56, %v8651_v28 }
 0x400   : > { %11350 = vpow2.f32 %v10361_v60  ;;  %v10364_v6 = vmul.f32 -1.442695, %v15313_v13  ;;  %v15326_v34 = vadd.f32 %v15284_v49, %v9128_v29  ;;  %v9092_v59 = vadd.f32 %v8977_v58, %v8874_v0  ;;  %v15335_v60 = vpop.f32.mrf.mxu0 }
 0x401   : > { %v9133_v36 = vmul.f32 %v15275_v41, %v9094_v44  ;;  %v11041_v25 = vpop.f32.mrf.mxu1  ;;  %v8880_v38 = vadd.f32 %v15168_v18, %v15164_v14  ;;  %v8878_v21 = vadd.f32 %v15176_v17, %v15170_v62  ;;  %v8881_v56 = vadd.f32 %v15184_v16, %v15174_v43 }
 0x402   : > { %11352 = vpow2.f32 %v10364_v6  ;;  %v10362_v45 = vmul.f32 -1.442695, %v15326_v34  ;;  %v9131_v63 = vmul.f32 %v15275_v41, %v9092_v59  ;;  %v9095_v5 = vadd.f32 %v11041_v25, %v8877_v24  ;;  %v15360_v24 = vpop.f32.mrf.mxu0 }
 0x403   : > { %v15338_v58 = vadd.f32 %v15284_v49, %v9133_v36  ;;  %v8980_v57 = vpop.f32.mrf.mxu1  ;;  %v8659_v29 = vadd.f32 %v15195_v11, %v8446_v10  ;;  %v8879_v14 = vadd.f32 %v15193_v39, %v8655_v26  ;;  %v8884_v18 = vadd.f32 %v15203_v42, %v15182_v53 }
 0x404   : > { %11354 = vpow2.f32 %v10362_v45  ;;  %v15347_v28 = vadd.f32 %v15284_v49, %v9131_v63  ;;  %v9134_v61 = vmul.f32 %v15275_v41, %v9095_v5  ;;  %v9093_v0 = vadd.f32 %v8980_v57, %v8875_v1  ;;  %v8839_v1 = vpop.f32.mrf.mxu0 }
 0x405   : > { %v10367_v30 = vmul.f32 -1.442695, %v15338_v58  ;;  %v11044_v44 = vpop.f32.mrf.mxu1  ;;  %v8663_v11 = vadd.f32 %v15213_v22, %v8450_v9  ;;  %v8882_v39 = vadd.f32 %v15211_v31, %v15187_v35  ;;  %v8885_v53 = vadd.f32 %v15219_v55, %v15191_v40 }
 0x406   : > { %v10365_v62 = vmul.f32 -1.442695, %v15347_v28  ;;  %v15357_v43 = vadd.f32 %v15284_v49, %v9134_v61  ;;  %v9132_v17 = vmul.f32 %v15275_v41, %v9093_v0  ;;  %v9098_v16 = vadd.f32 %v11044_v44, %v8880_v38  ;;  %v11025_v0 = vpop.f32.mrf.mxu0 }
 0x407   : > { %11356 = vpow2.f32 %v10367_v30  ;;  %v8993_v10 = vpop.f32.mrf.mxu1  ;;  %v8883_v22 = vadd.f32 %v15228_v46, %v8659_v29  ;;  %v15375_v9 = vadd.f32 %v15238_v19, %v15199_v33  ;;  %v15379_v35 = vadd.f32 %v15246_v27, %v15205_v23 }
 0x408   : > { %11358 = vpow2.f32 %v10365_v62  ;;  %v10368_v42 = vmul.f32 -1.442695, %v15357_v43  ;;  %v15369_v6 = vadd.f32 %v15284_v49, %v9132_v17  ;;  %v9137_v59 = vmul.f32 %v15275_v41, %v9098_v16 }
 0x409   : > { %v9096_v26 = vadd.f32 %v8993_v10, %v8878_v21  ;;  %v11045_v36 = vpop.f32.mrf.mxu1  ;;  %v15388_v33 = vadd.f32 %v15257_v15, %v15209_v51  ;;  %v15391_v19 = vadd.f32 %v15265_v47, %v8663_v11  ;;  %v15395_v23 = vadd.f32 %v15279_v37, %v15217_v3  ;;  %v8842_v10 = vpop.f32.mrf.mxu0 }
 0x40a   : > { %11360 = vpow2.f32 %v10368_v42  ;;  %v10366_v40 = vmul.f32 -1.442695, %v15369_v6  ;;  %v15383_v31 = vadd.f32 %v15284_v49, %v9137_v59  ;;  %v9099_v55 = vadd.f32 %v11045_v36, %v8881_v56 }
 0x40b   : > { %v11349_v25 = vpop.eup %11348  ;;  %v9135_v45 = vmul.f32 %v15275_v41, %v9096_v26  ;;  %v8996_v46 = vpop.f32.mrf.mxu1  ;;  %v8667_v38 = vadd.f32 %v15230_v7, %v8454_v50  ;;  %v15405_v47 = vadd.f32 %v15295_v48, %v15222_v20  ;;  %v15414_v30 = vadd.f32 %v15316_v12, %v15226_v54 }
 0x40c   : > { %v9296_v27 = vadd.f32 1.0, %v11349_v25  ;;  %11362 = vpow2.f32 %v10366_v40  ;;  %v10371_v63 = vmul.f32 -1.442695, %v15383_v31  ;;  %v9138_v5 = vmul.f32 %v15275_v41, %v9099_v55 }
 0x40d   : > { %v11351_v57 = vpop.eup %11350  ;;  %v15401_v21 = vadd.f32 %v15284_v49, %v9135_v45  ;;  %v9097_v51 = vadd.f32 %v8996_v46, %v8879_v14  ;;  %v11048_v15 = vpop.f32.mrf.mxu1  ;;  %v15422_v16 = vadd.f32 %v15335_v60, %v8667_v38 }
 0x40e   : > { %11364 = vrcp.f32 %v9296_v27  ;;  %v9294_v3 = vadd.f32 1.0, %v11351_v57  ;;  %v15408_v37 = vadd.f32 %v15284_v49, %v9138_v5  ;;  %v9102_v56 = vadd.f32 %v11048_v15, %v8884_v18  ;;  %v11028_v57 = vpop.f32.mrf.mxu0 }
 0x40f   : > { %v11353_v61 = vpop.eup %11352  ;;  %11366 = vpow2.f32 %v10371_v63  ;;  %v10369_v7 = vmul.f32 -1.442695, %v15401_v21  ;;  %v9136_v50 = vmul.f32 %v15275_v41, %v9097_v51  ;;  %v9009_v29 = vpop.f32.mrf.mxu1  ;;  %v15439_v27 = vadd.f32 %v8839_v1, %v15240_v8 }
 0x410   : > { %11368 = vrcp.f32 %v9294_v3  ;;  %v9297_v20 = vadd.f32 1.0, %v11353_v61  ;;  %v10372_v48 = vmul.f32 -1.442695, %v15408_v37  ;;  %v9141_v44 = vmul.f32 %v15275_v41, %v9102_v56 }
 0x411   : > { %v11355_v14 = vpop.eup %11354  ;;  %11370 = vpow2.f32 %v10369_v7  ;;  %v15419_v18 = vadd.f32 %v15284_v49, %v9136_v50  ;;  %v9100_v62 = vadd.f32 %v9009_v29, %v8882_v39  ;;  %v11049_v17 = vpop.f32.mrf.mxu1  ;;  %v15431_v39 = vadd.f32 %v15360_v24, %v15234_v2 }
 0x412   : > { %11372 = vrcp.f32 %v9297_v20  ;;  %v9295_v11 = vadd.f32 1.0, %v11355_v14  ;;  %v15425_v54 = vadd.f32 %v15284_v49, %v9141_v44  ;;  %v9103_v12 = vadd.f32 %v11049_v17, %v8885_v53 }
 0x413   : > { %11374 = vpow2.f32 %v10372_v48  ;;  %v10370_v42 = vmul.f32 -1.442695, %v15419_v18  ;;  %v9139_v59 = vmul.f32 %v15275_v41, %v9100_v62  ;;  %v9012_v26 = vpop.f32.mrf.mxu1  ;;  %v15448_v15 = vadd.f32 %v11025_v0, %v15244_v52  ;;  %v8855_v48 = vpop.f32.mrf.mxu0 }
 0x414   : > { %v11357_v36 = vpop.eup %11356  ;;  %11376 = vrcp.f32 %v9295_v11  ;;  %v10375_v60 = vmul.f32 -1.442695, %v15425_v54  ;;  %v9142_v40 = vmul.f32 %v15275_v41, %v9103_v12  ;;  %v9101_v55 = vadd.f32 %v9012_v26, %v8883_v22  ;;  %v16492_v12 = vld [vmem:[#allocation5_spill] sm:$0xff] }
 0x415   : > { %v11359_v25 = vpop.eup %11358  ;;  %v9300_v53 = vadd.f32 1.0, %v11357_v36  ;;  %11378 = vpow2.f32 %v10370_v42  ;;  %v15436_v45 = vadd.f32 %v15284_v49, %v9139_v59  ;;  %v11052_v46 = vpop.f32.mrf.mxu1 }
 0x416   : > { %v9298_v63 = vadd.f32 1.0, %v11359_v25  ;;  %11380 = vpow2.f32 %v10375_v60  ;;  %v15442_v2 = vadd.f32 %v15284_v49, %v9142_v40  ;;  %v9140_v24 = vmul.f32 %v15275_v41, %v9101_v55  ;;  %v16493_v60 = vld [vmem:[#allocation55_spill] sm:$0xff] }
 0x417   : > { %v11361_v5 = vpop.eup %11360  ;;  %11382 = vrcp.f32 %v9300_v53  ;;  %v10373_v22 = vmul.f32 -1.442695, %v15436_v45  ;;  %v9106_v38 = vadd.f32 %v11052_v46, %v15375_v9  ;;  %v9025_v51 = vpop.f32.mrf.mxu1  ;;  %v15457_v9 = vadd.f32 %v8842_v10, %v15249_v32  ;;  %v16494_v46 = vld [vmem:[#allocation46_spill] sm:$0xff] }
 0x418   : > { %11384 = vrcp.f32 %v9298_v63  ;;  %v9301_v8 = vadd.f32 1.0, %v11361_v5  ;;  %v10376_v1 = vmul.f32 -1.442695, %v15442_v2  ;;  %v15452_v3 = vadd.f32 %v15284_v49, %v9140_v24 }
 0x419   : > { %v11363_v56 = vpop.eup %11362  ;;  %11386 = vpow2.f32 %v10373_v22  ;;  %v9145_v61 = vmul.f32 %v15275_v41, %v9106_v38  ;;  %v9104_v7 = vadd.f32 %v9025_v51, %v15379_v35  ;;  %v11053_v50 = vpop.f32.mrf.mxu1  ;;  %v15466_v35 = vadd.f32 %v11028_v57, %v15253_v4 }
 0x41a   : > { %11388 = vrcp.f32 %v9301_v8  ;;  %v9299_v52 = vadd.f32 1.0, %v11363_v56  ;;  %v10374_v0 = vmul.f32 -1.442695, %v15452_v3  ;;  %v9107_v29 = vadd.f32 %v11053_v50, %v15388_v33 }
 0x41b   : > { %v11365_v20 = vpop.eup %11364  ;;  %11390 = vpow2.f32 %v10376_v1  ;;  %v15462_v44 = vadd.f32 %v15284_v49, %v9145_v61  ;;  %v9143_v14 = vmul.f32 %v15275_v41, %v9104_v7  ;;  %v9028_v62 = vpop.f32.mrf.mxu1  ;;  %v15471_v33 = vadd.f32 %v8855_v48, %v16492_v12 }
 0x41c   : > { %v11367_v32 = vpop.eup %11366  ;;  %11392 = vrcp.f32 %v9299_v52  ;;  %v9146_v17 = vmul.f32 %v15275_v41, %v9107_v29  ;;  %v9105_v11 = vadd.f32 %v9028_v62, %v15391_v19  ;;  %v15478_v40 = vmul.f32 %v11365_v20, %v16493_v60 }
 0x41d   : > { %v11369_v10 = vpop.eup %11368  ;;  %v9304_v42 = vadd.f32 1.0, %v11367_v32  ;;  %11394 = vpow2.f32 %v10374_v0  ;;  %v10379_v59 = vmul.f32 -1.442695, %v15462_v44  ;;  %v15475_v26 = vadd.f32 %v15284_v49, %v9143_v14  ;;  %v11056_v36 = vpop.f32.mrf.mxu1 }
 0x41e   : > { %v11371_v4 = vpop.eup %11370  ;;  %v15481_v55 = vadd.f32 %v15284_v49, %v9146_v17  ;;  %v9144_v19 = vmul.f32 %v15275_v41, %v9105_v11  ;;  %v9110_v25 = vadd.f32 %v11056_v36, %v15395_v23  ;;  %v15486_v63 = vmul.f32 %v11369_v10, %v16494_v46 }
 0x41f   : > { %v11373_v53 = vpop.eup %11372  ;;  %11396 = vrcp.f32 %v9304_v42  ;;  %v9302_v24 = vadd.f32 1.0, %v11371_v4  ;;  %v10377_v5 = vmul.f32 -1.442695, %v15475_v26  ;;  %v9041_v57 = vpop.f32.mrf.mxu1 }
 0x420   : > { %v11375_v22 = vpop.eup %11374  ;;  %v15490_v38 = vmul.f32 %v11373_v53, %v15313_v13  ;;  %11398 = vpow2.f32 %v10379_v59  ;;  %v10380_v51 = vmul.f32 -1.442695, %v15481_v55  ;;  %v15494_v8 = vadd.f32 %v15284_v49, %v9144_v19 }
 0x421   : > { %v11377_v23 = vpop.eup %11376  ;;  %11400 = vrcp.f32 %v9302_v24  ;;  %v9305_v1 = vadd.f32 1.0, %v11375_v22  ;;  %v9149_v56 = vmul.f32 %v15275_v41, %v9110_v25  ;;  %v9108_v61 = vadd.f32 %v9041_v57, %v15405_v47  ;;  %v11057_v7 = vpop.f32.mrf.mxu1 }
 0x422   : > { %v11379_v50 = vpop.eup %11378  ;;  %v9423_v13 = vpack.c.bf16 %v15490_v38, %v15478_v40  ;;  %v9391_v52 = vmul.f32 %v11377_v23, %v15326_v34  ;;  %11402 = vpow2.f32 %v10377_v5  ;;  %v10378_v0 = vmul.f32 -1.442695, %v15494_v8  ;;  %v11029_v23 = vpop.f32.mrf.mxu0 }
 0x423   : > { %v11381_v29 = vpop.eup %11380  ;;  %11404 = vrcp.f32 %v9305_v1  ;;  %v9303_v20 = vadd.f32 1.0, %v11379_v50  ;;  %v15503_v48 = vadd.f32 %v15284_v49, %v9149_v56  ;;  %v9147_v14 = vmul.f32 %v15275_v41, %v9108_v61  ;;  %v9044_v62 = vpop.f32.mrf.mxu1 }
 0x424   : > { %v11383_v47 = vpop.eup %11382  ;;  %v9308_v32 = vadd.f32 1.0, %v11381_v29  ;;  %11406 = vpow2.f32 %v10380_v51  ;;  %v9111_v17 = vadd.f32 %v11057_v7, %v15414_v30  ;;  %v9109_v11 = vadd.f32 %v9044_v62, %v15422_v16 }
 0x425   : > { %v11385_v34 = vpop.eup %11384  ;;  %v15509_v12 = vmul.f32 %v11383_v47, %v15338_v58  ;;  %11408 = vrcp.f32 %v9303_v20  ;;  %v10383_v10 = vmul.f32 -1.442695, %v15503_v48  ;;  %v15513_v42 = vadd.f32 %v15284_v49, %v9147_v14  ;;  %v11060_v59 = vpop.f32.mrf.mxu1 }
 0x426   : > { %v11387_v36 = vpop.eup %11386  ;;  %v9394_v4 = vmul.f32 %v11385_v34, %v15347_v28  ;;  %11410 = vrcp.f32 %v9308_v32  ;;  %v9150_v60 = vmul.f32 %v15275_v41, %v9111_v17  ;;  %v9148_v30 = vmul.f32 %v15275_v41, %v9109_v11  ;;  %v16495_v32 = vld [vmem:[#allocation53_spill] sm:$0xff]  ;;  %v8858_v34 = vpop.f32.mrf.mxu0 }
 0x427   : > { %v11389_v16 = vpop.eup %11388  ;;  %v9306_v40 = vadd.f32 1.0, %v11387_v36  ;;  %11412 = vpow2.f32 %v10378_v0  ;;  %v10381_v58 = vmul.f32 -1.442695, %v15513_v42  ;;  %v9114_v19 = vadd.f32 %v11060_v59, %v15431_v39  ;;  %v9057_v25 = vpop.f32.mrf.mxu1 }
 0x428   : > { %v11391_v53 = vpop.eup %11390  ;;  %v15521_v46 = vmul.f32 %v11389_v16, %v15357_v43  ;;  %11414 = vpow2.f32 %v10383_v10  ;;  %v15524_v28 = vadd.f32 %v15284_v49, %v9150_v60  ;;  %v15527_v24 = vadd.f32 %v15284_v49, %v9148_v30 }
 0x429   : > { %v11393_v5 = vpop.eup %11392  ;;  %11416 = vrcp.f32 %v9306_v40  ;;  %v9309_v57 = vadd.f32 1.0, %v11391_v53  ;;  %v9153_v22 = vmul.f32 %v15275_v41, %v9114_v19  ;;  %v9422_v38 = vpack.c.bf16 %v9391_v52, %v15486_v63  ;;  %v11061_v39 = vpop.f32.mrf.mxu1 }
 0x42a   : > { %v11395_v51 = vpop.eup %11394  ;;  %v9425_v43 = vpack.c.bf16 %v15521_v46, %v15509_v12  ;;  %v9395_v1 = vmul.f32 %v11393_v5, %v15369_v6  ;;  %11418 = vpow2.f32 %v10381_v58  ;;  %v10384_v56 = vmul.f32 -1.442695, %v15524_v28 }
 0x42b   : > { %11420 = vrcp.f32 %v9309_v57  ;;  %v9307_v61 = vadd.f32 1.0, %v11395_v51  ;;  %v10382_v7 = vmul.f32 -1.442695, %v15527_v24  ;;  %v15537_v50 = vadd.f32 %v15284_v49, %v9153_v22  ;;  %11074 = vmatprep.mubr.msk.bf16.mxu0 %vm9477_vm5, %v9422_v38  ;;  %v9060_v63 = vpop.f32.mrf.mxu1 }
 0x42c   : > { %v11397_v52 = vpop.eup %11396  ;;  %11422 = vpow2.f32 %v10384_v56  ;;  %v9112_v0 = vadd.f32 %v9057_v25, %v15439_v27  ;;  %11075 = vmatmul.mubr.msk.bf16.vlgmr.msra.gmra.mxu0 %vm9477_vm5, %v9423_v13  ;;  %v9115_v6 = vadd.f32 %v11061_v39, %v15448_v15  ;;  %v9113_v29 = vadd.f32 %v9060_v63, %v15457_v9 }
 0x42d   : > { %v11399_v20 = vpop.eup %11398  ;;  %11424 = vrcp.f32 %v9307_v61  ;;  %v10387_v14 = vmul.f32 -1.442695, %v15537_v50  ;;  %v11064_v62 = vpop.f32.mrf.mxu1  ;;  %v9424_v47 = vpack.c.bf16 %v9395_v1, %v9394_v4  ;;  %v8901_v17 = vadd.f32 %v11029_v23, %v16495_v32  ;;  %v16496_v4 = vld [vmem:[#allocation45_spill] sm:$0xff] }
 0x42e   : > { %v11401_v11 = vpop.eup %11400  ;;  %v9312_v12 = vadd.f32 1.0, %v11399_v20  ;;  %11426 = vpow2.f32 %v10382_v7  ;;  %v9151_v27 = vmul.f32 %v15275_v41, %v9112_v0  ;;  %v9154_v13 = vmul.f32 %v15275_v41, %v9115_v6 }
 0x42f   : > { %v11403_v10 = vpop.eup %11402  ;;  %v15549_v15 = vmul.f32 %v11397_v52, %v15383_v31  ;;  %v9152_v9 = vmul.f32 %v15275_v41, %v9113_v29  ;;  %v9118_v59 = vadd.f32 %v11064_v62, %v15466_v35  ;;  %11078 = vmatprep.mubr.msk.bf16.mxu0 %vm9477_vm5, %v9424_v47  ;;  %v9073_v36 = vpop.f32.mrf.mxu1  ;;  %v8899_v60 = vadd.f32 %v8858_v34, %v16496_v4 }
 0x430   : > { %v11405_v30 = vpop.eup %11404  ;;  %v9310_v16 = vadd.f32 1.0, %v11403_v10  ;;  %11428 = vpow2.f32 %v10387_v14  ;;  %v15556_v40 = vadd.f32 %v15284_v49, %v9151_v27  ;;  %v15559_v58 = vadd.f32 %v15284_v49, %v9154_v13 }
 0x431   : > { %v11407_v31 = vpop.eup %11406  ;;  %v9401_v19 = vmul.f32 %v11405_v30, %v15408_v37  ;;  %v15563_v25 = vadd.f32 %v15284_v49, %v9152_v9  ;;  %v9157_v35 = vmul.f32 %v15275_v41, %v9118_v59  ;;  %v9116_v53 = vadd.f32 %v9073_v36, %v15471_v33  ;;  %v11065_v46 = vpop.f32.mrf.mxu1 }
 0x432   : > { %v11409_v5 = vpop.eup %11408  ;;  %11430 = vrcp.f32 %v9312_v12  ;;  %v9313_v57 = vadd.f32 1.0, %v11407_v31  ;;  %v10385_v22 = vmul.f32 -1.442695, %v15556_v40  ;;  %v10388_v38 = vmul.f32 -1.442695, %v15559_v58 }
 0x433   : > { %v11411_v39 = vpop.eup %11410  ;;  %v9427_v51 = vpack.c.bf16 %v9401_v19, %v15549_v15  ;;  %v9399_v37 = vmul.f32 %v11409_v5, %v15419_v18  ;;  %11432 = vrcp.f32 %v9310_v16  ;;  %v15572_v23 = vadd.f32 %v15284_v49, %v9157_v35  ;;  %v9076_v1 = vpop.f32.mrf.mxu1 }
 0x434   : > { %v11413_v56 = vpop.eup %11412  ;;  %v9398_v33 = vmul.f32 %v11401_v11, %v15401_v21  ;;  %11434 = vrcp.f32 %v9313_v57  ;;  %v9155_v61 = vmul.f32 %v15275_v41, %v9116_v53  ;;  %11079 = vmatmul.mubr.msk.bf16.gmra.mxu0 %vm9477_vm5, %v9425_v43  ;;  %v9119_v7 = vadd.f32 %v11065_v46, %v8901_v17 }
 0x435   : > { %v11415_v63 = vpop.eup %11414  ;;  %v9311_v52 = vadd.f32 1.0, %v11413_v56  ;;  %11436 = vpow2.f32 %v10385_v22  ;;  %v10386_v0 = vmul.f32 -1.442695, %v15563_v25  ;;  %v9117_v18 = vadd.f32 %v9076_v1, %v8899_v60 }
 0x436   : > { %v11417_v6 = vpop.eup %11416  ;;  %v9316_v29 = vadd.f32 1.0, %v11415_v63  ;;  %11438 = vpow2.f32 %v10388_v38  ;;  %v15579_v20 = vadd.f32 %v15284_v49, %v9155_v61  ;;  %v9158_v21 = vmul.f32 %v15275_v41, %v9119_v7 }
 0x437   : > { %v11419_v14 = vpop.eup %11418  ;;  %11440 = vrcp.f32 %v9311_v52  ;;  %v10391_v62 = vmul.f32 -1.442695, %v15572_v23  ;;  %v9156_v43 = vmul.f32 %v15275_v41, %v9117_v18  ;;  %v9426_v47 = vpack.c.bf16 %v9399_v37, %v9398_v33 }
 0x438   : > { %v11421_v32 = vpop.eup %11420  ;;  %v9404_v17 = vmul.f32 %v11411_v39, %v15425_v54  ;;  %11442 = vrcp.f32 %v9316_v29  ;;  %v9314_v11 = vadd.f32 1.0, %v11419_v14  ;;  %v15586_v34 = vadd.f32 %v15284_v49, %v9158_v21 }
 0x439   : > { %v11423_v12 = vpop.eup %11422  ;;  %v9405_v27 = vmul.f32 %v11421_v32, %v15442_v2  ;;  %11444 = vpow2.f32 %v10386_v0  ;;  %v10389_v13 = vmul.f32 -1.442695, %v15579_v20  ;;  %v15591_v10 = vadd.f32 %v15284_v49, %v9156_v43  ;;  %11082 = vmatprep.mubr.msk.bf16.mxu0 %vm9477_vm5, %v9426_v47 }
 0x43a   : > { %v11425_v41 = vpop.eup %11424  ;;  %11446 = vrcp.f32 %v9314_v11  ;;  %v9317_v15 = vadd.f32 1.0, %v11423_v12  ;;  %v9402_v9 = vmul.f32 %v11417_v6, %v15436_v45  ;;  %v10392_v4 = vmul.f32 -1.442695, %v15586_v34 }
 0x43b   : > { %v11427_v54 = vpop.eup %11426  ;;  %v9429_v59 = vpack.c.bf16 %v9405_v27, %v9404_v17  ;;  %v9403_v36 = vmul.f32 %v11425_v41, %v15452_v3  ;;  %11448 = vpow2.f32 %v10391_v62  ;;  %v10390_v60 = vmul.f32 -1.442695, %v15591_v10 }
 0x43c   : > { %11450 = vrcp.f32 %v9317_v15  ;;  %v9315_v2 = vadd.f32 1.0, %v11427_v54  ;;  %11083 = vmatmul.mubr.msk.bf16.gmra.mxu0 %vm9477_vm5, %v9427_v51 }
 0x43d   : > { %v11429_v49 = vpop.eup %11428  ;;  %11452 = vpow2.f32 %v10389_v13  ;;  %v9428_v30 = vpack.c.bf16 %v9403_v36, %v9402_v9 }
 0x43e   : > { %11454 = vrcp.f32 %v9315_v2  ;;  %v9320_v31 = vadd.f32 1.0, %v11429_v49 }
 0x43f   : > { %v11431_v16 = vpop.eup %11430  ;;  %11086 = vmatprep.mubr.msk.bf16.mxu0 %vm9477_vm5, %v9428_v30  ;;  %11456 = vpow2.f32 %v10392_v4 }
 0x440   : > { %v11433_v45 = vpop.eup %11432  ;;  %11458 = vpow2.f32 %v10390_v60  ;;  %v9408_v35 = vmul.f32 %v11431_v16, %v15462_v44 }
 0x441   : > { %v11435_v3 = vpop.eup %11434  ;;  %11460 = vrcp.f32 %v9320_v31  ;;  %v9406_v51 = vmul.f32 %v11433_v45, %v15475_v26 }
 0x442   : > { %v11437_v19 = vpop.eup %11436  ;;  %v9409_v53 = vmul.f32 %v11435_v3, %v15481_v55 }
 0x443   : > { %v11439_v46 = vpop.eup %11438  ;;  %v9318_v5 = vadd.f32 1.0, %v11437_v19 }
 0x444   : > { %v11441_v57 = vpop.eup %11440  ;;  %v9431_v22 = vpack.c.bf16 %v9409_v53, %v9408_v35  ;;  %v9321_v38 = vadd.f32 1.0, %v11439_v46  ;;  %11087 = vmatmul.mubr.msk.bf16.gmra.mxu0 %vm9477_vm5, %v9429_v59 }
 0x445   : > { %v11443_v39 = vpop.eup %11442  ;;  %v9407_v37 = vmul.f32 %v11441_v57, %v15494_v8 }
 0x446   : > { %v11445_v1 = vpop.eup %11444  ;;  %11462 = vrcp.f32 %v9321_v38  ;;  %v9412_v63 = vmul.f32 %v11443_v39, %v15503_v48 }
 0x447   : > { %v11447_v56 = vpop.eup %11446  ;;  %11464 = vrcp.f32 %v9318_v5  ;;  %v9319_v44 = vadd.f32 1.0, %v11445_v1  ;;  %v9430_v33 = vpack.c.bf16 %v9407_v37, %v9406_v51 }
 0x448   : > { %v11449_v55 = vpop.eup %11448  ;;  %v9410_v8 = vmul.f32 %v11447_v56, %v15513_v42 }
 0x449   : > { %v11451_v61 = vpop.eup %11450  ;;  %11466 = vrcp.f32 %v9319_v44  ;;  %11090 = vmatprep.mubr.msk.bf16.mxu0 %vm9477_vm5, %v9430_v33  ;;  %v9324_v0 = vadd.f32 1.0, %v11449_v55 }
 0x44a   : > { %v11453_v7 = vpop.eup %11452  ;;  %v9413_v52 = vmul.f32 %v11451_v61, %v15524_v28 }
 0x44b   : > { %v11455_v26 = vpop.eup %11454  ;;  %v9322_v18 = vadd.f32 1.0, %v11453_v7  ;;  %11468 = vrcp.f32 %v9324_v0 }
 0x44c   : > { %v9433_v6 = vpack.c.bf16 %v9413_v52, %v9412_v63  ;;  %v9411_v29 = vmul.f32 %v11455_v26, %v15527_v24  ;;  %11091 = vmatmul.mubr.msk.bf16.gmra.mxu0 %vm9477_vm5, %v9431_v22  ;;  %v11457_v21 = vpop.eup %11456 }
 0x44d   : > { %v11459_v14 = vpop.eup %11458  ;;  %v9325_v62 = vadd.f32 1.0, %v11457_v21  ;;  %11470 = vrcp.f32 %v9322_v18 }
 0x44e   : > { %v9432_v43 = vpack.c.bf16 %v9411_v29, %v9410_v8  ;;  %v9323_v47 = vadd.f32 1.0, %v11459_v14  ;;  %v11461_v48 = vpop.eup %11460 }
 0x44f   : > { %11472 = vrcp.f32 %v9325_v62  ;;  %v9416_v42 = vmul.f32 %v11461_v48, %v15537_v50 }
 0x450   : > { %11094 = vmatprep.mubr.msk.bf16.mxu0 %vm9477_vm5, %v9432_v43  ;;  %11474 = vrcp.f32 %v9323_v47 }
 0x453   : > { %v11463_v28 = vpop.eup %11462 }
 0x454   : > { %v11465_v32 = vpop.eup %11464  ;;  %v9417_v24 = vmul.f32 %v11463_v28, %v15559_v58  ;;  %11095 = vmatmul.mubr.msk.bf16.gmra.mxu0 %vm9477_vm5, %v9433_v6 }
 0x455   : > { %v9414_v12 = vmul.f32 %v11465_v32, %v15556_v40 }
 0x456   : > { %v11467_v17 = vpop.eup %11466  ;;  %v9435_v11 = vpack.c.bf16 %v9417_v24, %v9416_v42 }
 0x457   : > { %v9415_v27 = vmul.f32 %v11467_v17, %v15563_v25  ;;  %v15628_v25 = vld [vmem:[%s15955_s9] ss:$0 sm:$0xff] }
 0x458   : > { %v11469_v41 = vpop.eup %11468 }
 0x459   : > { %v9434_v13 = vpack.c.bf16 %v9415_v27, %v9414_v12  ;;  %v9420_v50 = vmul.f32 %v11469_v41, %v15572_v23 }
 0x45a   : > { %v11471_v15 = vpop.eup %11470 }
 0x45b   : > { %11098 = vmatprep.mubr.msk.bf16.mxu0 %vm9477_vm5, %v9434_v13  ;;  %v9418_v59 = vmul.f32 %v11471_v15, %v15579_v20  ;;  %v16497_v13 = vlaneseq }
 0x45c   : > { %11099 = vmatmul.mubr.msk.bf16.gmra.mxu0 %vm9477_vm5, %v9435_v11  ;;  %v11473_v54 = vpop.eup %11472 }
 0x45d   : > { %v11475_v9 = vpop.eup %11474  ;;  %v9421_v58 = vmul.f32 %v11473_v54, %v15586_v34  ;;  %v15687_v41 = vand.u32 127, %v16497_v13 }
 0x45e   : > { %v9419_v36 = vmul.f32 %v11475_v9, %v15591_v10 }
 0x45f   : > { %v9437_v40 = vpack.c.bf16 %v9421_v58, %v9420_v50  ;;  %vm9689_vm6 = vcmp.lt.s32.totalorder %v15687_v41, 6 }
 0x460   : > { %v9436_v2 = vpack.c.bf16 %v9419_v36, %v9418_v59 }
 0x462   : > { %11102 = vmatprep.mubr.msk.bf16.mxu0 %vm9477_vm5, %v9436_v2 }
 0x464   : > { %11103 = vmatmul.mubr.msk.bf16.gmra.mxu0 %vm9477_vm5, %v9437_v40 }
 0x4ec   : > { %v11076_v4 = vpop.f32.mrf.mxu0 }
 0x4ed   : > { %v15631_v23 = vadd.f32 %v11076_v4, %v15628_v25 }
 0x4ee   : > { %v9560_v34 = vpop.f32.mrf.mxu0 }
 0x4ef   : > { %v10416_v20 = vmul.f32 -1.442695, %v15631_v23  ;;  %v15635_v10 = vadd.f32 %v15628_v25, %v9560_v34 }
 0x4f0   : > { %v11077_v49 = vpop.f32.mrf.mxu0 }
 0x4f1   : > { %11476 = vpow2.f32 %v10416_v20  ;;  %v10414_v60 = vmul.f32 -1.442695, %v15635_v10  ;;  %v15639_v30 = vadd.f32 %v11077_v49, %v15628_v25 }
 0x4f2   : > { %v9563_v16 = vpop.f32.mrf.mxu0 }
 0x4f3   : > { %11478 = vpow2.f32 %v10414_v60  ;;  %v10417_v45 = vmul.f32 -1.442695, %v15639_v30  ;;  %v15643_v31 = vadd.f32 %v15628_v25, %v9563_v16 }
 0x4f4   : > { %v11080_v3 = vpop.f32.mrf.mxu0 }
 0x4f5   : > { %11480 = vpow2.f32 %v10417_v45  ;;  %v10415_v19 = vmul.f32 -1.442695, %v15643_v31  ;;  %v15647_v35 = vadd.f32 %v11080_v3, %v15628_v25 }
 0x4f6   : > { %v9576_v53 = vpop.f32.mrf.mxu0 }
 0x4f7   : > { %11482 = vpow2.f32 %v10415_v19  ;;  %v10420_v46 = vmul.f32 -1.442695, %v15647_v35  ;;  %v15651_v5 = vadd.f32 %v15628_v25, %v9576_v53 }
 0x4f8   : > { %v11081_v57 = vpop.f32.mrf.mxu0 }
 0x4f9   : > { %11484 = vpow2.f32 %v10420_v46  ;;  %v10418_v22 = vmul.f32 -1.442695, %v15651_v5  ;;  %v15655_v38 = vadd.f32 %v11081_v57, %v15628_v25 }
 0x4fa   : > { %v9579_v39 = vpop.f32.mrf.mxu0 }
 0x4fb   : > { %11486 = vpow2.f32 %v10418_v22  ;;  %v10421_v51 = vmul.f32 -1.442695, %v15655_v38  ;;  %v15659_v37 = vadd.f32 %v15628_v25, %v9579_v39 }
 0x4fc   : > { %v11084_v1 = vpop.f32.mrf.mxu0 }
 0x4fd   : > { %11488 = vpow2.f32 %v10421_v51  ;;  %v10419_v56 = vmul.f32 -1.442695, %v15659_v37  ;;  %v15663_v44 = vadd.f32 %v11084_v1, %v15628_v25 }
 0x4fe   : > { %v11477_v33 = vpop.eup %11476  ;;  %v9592_v55 = vpop.f32.mrf.mxu0 }
 0x4ff   : > { %v9788_v61 = vadd.f32 1.0, %v11477_v33  ;;  %11490 = vpow2.f32 %v10419_v56  ;;  %v10424_v7 = vmul.f32 -1.442695, %v15663_v44  ;;  %v15667_v63 = vadd.f32 %v15628_v25, %v9592_v55 }
 0x500   : > { %v11479_v52 = vpop.eup %11478  ;;  %v11085_v0 = vpop.f32.mrf.mxu0 }
 0x501   : > { %11492 = vrcp.f32 %v9788_v61  ;;  %v9786_v26 = vadd.f32 1.0, %v11479_v52  ;;  %v10422_v18 = vmul.f32 -1.442695, %v15667_v63  ;;  %v15671_v8 = vadd.f32 %v11085_v0, %v15628_v25 }
 0x502   : > { %v11481_v6 = vpop.eup %11480  ;;  %11494 = vpow2.f32 %v10424_v7  ;;  %v9595_v29 = vpop.f32.mrf.mxu0 }
 0x503   : > { %11496 = vrcp.f32 %v9786_v26  ;;  %v9789_v21 = vadd.f32 1.0, %v11481_v6  ;;  %v10425_v14 = vmul.f32 -1.442695, %v15671_v8  ;;  %v15675_v62 = vadd.f32 %v15628_v25, %v9595_v29 }
 0x504   : > { %v11483_v43 = vpop.eup %11482  ;;  %11498 = vpow2.f32 %v10422_v18  ;;  %v11088_v47 = vpop.f32.mrf.mxu0 }
 0x505   : > { %11500 = vrcp.f32 %v9789_v21  ;;  %v9787_v48 = vadd.f32 1.0, %v11483_v43  ;;  %v10423_v28 = vmul.f32 -1.442695, %v15675_v62  ;;  %v15679_v32 = vadd.f32 %v11088_v47, %v15628_v25 }
 0x506   : > { %v11485_v42 = vpop.eup %11484  ;;  %11502 = vpow2.f32 %v10425_v14  ;;  %v9608_v24 = vpop.f32.mrf.mxu0 }
 0x507   : > { %11504 = vrcp.f32 %v9787_v48  ;;  %v9792_v17 = vadd.f32 1.0, %v11485_v42  ;;  %v10428_v11 = vmul.f32 -1.442695, %v15679_v32  ;;  %v15684_v12 = vadd.f32 %v15628_v25, %v9608_v24 }
 0x508   : > { %v11487_v27 = vpop.eup %11486  ;;  %11506 = vpow2.f32 %v10423_v28  ;;  %v11089_v15 = vpop.f32.mrf.mxu0 }
 0x509   : > { %11508 = vrcp.f32 %v9792_v17  ;;  %v9790_v54 = vadd.f32 1.0, %v11487_v27  ;;  %v10426_v9 = vmul.f32 -1.442695, %v15684_v12  ;;  %v15691_v50 = vadd.f32 %v11089_v15, %v15628_v25 }
 0x50a   : > { %v11489_v58 = vpop.eup %11488  ;;  %11510 = vpow2.f32 %v10428_v11  ;;  %v9611_v59 = vpop.f32.mrf.mxu0 }
 0x50b   : > { %11512 = vrcp.f32 %v9790_v54  ;;  %v9793_v36 = vadd.f32 1.0, %v11489_v58  ;;  %v10429_v40 = vmul.f32 -1.442695, %v15691_v50  ;;  %v15697_v2 = vadd.f32 %v15628_v25, %v9611_v59 }
 0x50c   : > { %v11491_v4 = vpop.eup %11490  ;;  %11514 = vpow2.f32 %v10426_v9  ;;  %v11092_v34 = vpop.f32.mrf.mxu0 }
 0x50d   : > { %11516 = vrcp.f32 %v9793_v36  ;;  %v9791_v20 = vadd.f32 1.0, %v11491_v4  ;;  %v10427_v49 = vmul.f32 -1.442695, %v15697_v2  ;;  %v15702_v60 = vadd.f32 %v11092_v34, %v15628_v25 }
 0x50e   : > { %v11493_v16 = vpop.eup %11492  ;;  %11518 = vpow2.f32 %v10429_v40  ;;  %v9624_v45 = vpop.f32.mrf.mxu0 }
 0x50f   : > { %v11495_v3 = vpop.eup %11494  ;;  %v9884_v19 = vsel %vm9689_vm6, %v11493_v16, %v15631_v23  ;;  %11520 = vrcp.f32 %v9791_v20  ;;  %v10432_v53 = vmul.f32 -1.442695, %v15702_v60  ;;  %v15709_v46 = vadd.f32 %v15628_v25, %v9624_v45 }
 0x510   : > { %v11497_v57 = vpop.eup %11496  ;;  %9916 = vst [vmem:[%s15711_s28 + $0x10] sm:$0xff] %v9884_v19  ;;  %v9796_v22 = vadd.f32 1.0, %v11495_v3  ;;  %11522 = vpow2.f32 %v10427_v49  ;;  %v11093_v39 = vpop.f32.mrf.mxu0 }
 0x511   : > { %v11499_v51 = vpop.eup %11498  ;;  %v9882_v23 = vsel %vm9689_vm6, %v11497_v57, %v15635_v10  ;;  %11524 = vpow2.f32 %v10432_v53  ;;  %v10430_v1 = vmul.f32 -1.442695, %v15709_v46  ;;  %v15719_v56 = vadd.f32 %v11093_v39, %v15628_v25 }
 0x512   : > { %v11501_v33 = vpop.eup %11500  ;;  %9914 = vst [vmem:[%s15711_s28] sm:$0xff] %v9882_v23  ;;  %11526 = vrcp.f32 %v9796_v22  ;;  %v9794_v55 = vadd.f32 1.0, %v11499_v51  ;;  %v9627_v61 = vpop.f32.mrf.mxu0 }
 0x513   : > { %v11503_v7 = vpop.eup %11502  ;;  %v9885_v52 = vsel %vm9689_vm6, %v11501_v33, %v15639_v30  ;;  %11528 = vpow2.f32 %v10430_v1  ;;  %v10433_v10 = vmul.f32 -1.442695, %v15719_v56  ;;  %v15727_v0 = vadd.f32 %v15628_v25, %v9627_v61 }
 0x514   : > { %v11505_v26 = vpop.eup %11504  ;;  %9917 = vst [vmem:[%s15711_s28 + $0x18] sm:$0xff] %v9885_v52  ;;  %11530 = vrcp.f32 %v9794_v55  ;;  %v9797_v18 = vadd.f32 1.0, %v11503_v7  ;;  %v11096_v6 = vpop.f32.mrf.mxu0 }
 0x515   : > { %v11507_v29 = vpop.eup %11506  ;;  %v9883_v21 = vsel %vm9689_vm6, %v11505_v26, %v15643_v31  ;;  %11532 = vpow2.f32 %v10433_v10  ;;  %v10431_v30 = vmul.f32 -1.442695, %v15727_v0  ;;  %v15735_v14 = vadd.f32 %v11096_v6, %v15628_v25 }
 0x516   : > { %v11509_v43 = vpop.eup %11508  ;;  %9915 = vst [vmem:[%s15711_s28 + $0x8] sm:$0xff] %v9883_v21  ;;  %11534 = vrcp.f32 %v9797_v18  ;;  %v9795_v47 = vadd.f32 1.0, %v11507_v29  ;;  %v9640_v48 = vpop.f32.mrf.mxu0 }
 0x517   : > { %v11511_v28 = vpop.eup %11510  ;;  %v9888_v42 = vsel %vm9689_vm6, %v11509_v43, %v15647_v35  ;;  %11536 = vpow2.f32 %v10431_v30  ;;  %v10436_v31 = vmul.f32 -1.442695, %v15735_v14  ;;  %v15743_v24 = vadd.f32 %v15628_v25, %v9640_v48 }
 0x518   : > { %v11513_v17 = vpop.eup %11512  ;;  %9920 = vst [vmem:[%s15711_s28 + $0x30] sm:$0xff] %v9888_v42  ;;  %11538 = vrcp.f32 %v9795_v47  ;;  %v9800_v11 = vadd.f32 1.0, %v11511_v28  ;;  %v11097_v27 = vpop.f32.mrf.mxu0 }
 0x519   : > { %v11515_v13 = vpop.eup %11514  ;;  %v9886_v15 = vsel %vm9689_vm6, %v11513_v17, %v15651_v5  ;;  %11540 = vpow2.f32 %v10436_v31  ;;  %v10434_v35 = vmul.f32 -1.442695, %v15743_v24  ;;  %v15751_v54 = vadd.f32 %v11097_v27, %v15628_v25 }
 0x51a   : > { %v11517_v9 = vpop.eup %11516  ;;  %9918 = vst [vmem:[%s15711_s28 + $0x20] sm:$0xff] %v9886_v15  ;;  %11542 = vrcp.f32 %v9800_v11  ;;  %v9798_v58 = vadd.f32 1.0, %v11515_v13  ;;  %v9643_v59 = vpop.f32.mrf.mxu0 }
 0x51b   : > { %v11519_v36 = vpop.eup %11518  ;;  %v9889_v40 = vsel %vm9689_vm6, %v11517_v9, %v15655_v38  ;;  %11544 = vpow2.f32 %v10434_v35  ;;  %v10437_v5 = vmul.f32 -1.442695, %v15751_v54  ;;  %v15759_v4 = vadd.f32 %v15628_v25, %v9643_v59 }
 0x51c   : > { %v11521_v34 = vpop.eup %11520  ;;  %9921 = vst [vmem:[%s15711_s28 + $0x38] sm:$0xff] %v9889_v40  ;;  %11546 = vrcp.f32 %v9798_v58  ;;  %v9801_v20 = vadd.f32 1.0, %v11519_v36  ;;  %v11100_v49 = vpop.f32.mrf.mxu0 }
 0x51d   : > { %v11523_v16 = vpop.eup %11522  ;;  %v9887_v45 = vsel %vm9689_vm6, %v11521_v34, %v15659_v37  ;;  %11548 = vpow2.f32 %v10437_v5  ;;  %v10435_v3 = vmul.f32 -1.442695, %v15759_v4  ;;  %v15767_v38 = vadd.f32 %v11100_v49, %v15628_v25 }
 0x51e   : > { %v11525_v19 = vpop.eup %11524  ;;  %9919 = vst [vmem:[%s15711_s28 + $0x28] sm:$0xff] %v9887_v45  ;;  %11550 = vrcp.f32 %v9801_v20  ;;  %v9799_v53 = vadd.f32 1.0, %v11523_v16  ;;  %v9656_v57 = vpop.f32.mrf.mxu0 }
 0x51f   : > { %v11527_v22 = vpop.eup %11526  ;;  %v9804_v39 = vadd.f32 1.0, %v11525_v19  ;;  %11552 = vpow2.f32 %v10435_v3  ;;  %v10440_v51 = vmul.f32 -1.442695, %v15767_v38  ;;  %v15772_v23 = vadd.f32 %v15628_v25, %v9656_v57 }
 0x520   : > { %v11529_v37 = vpop.eup %11528  ;;  %v9892_v1 = vsel %vm9689_vm6, %v11527_v22, %v15663_v44  ;;  %11554 = vrcp.f32 %v9799_v53  ;;  %v11101_v33 = vpop.f32.mrf.mxu0 }
 0x521   : > { %v11531_v55 = vpop.eup %11530  ;;  %9924 = vst [vmem:[%s15711_s28 + $0x50] sm:$0xff] %v9892_v1  ;;  %11556 = vrcp.f32 %v9804_v39  ;;  %v9802_v61 = vadd.f32 1.0, %v11529_v37  ;;  %v10438_v7 = vmul.f32 -1.442695, %v15772_v23  ;;  %v15780_v52 = vadd.f32 %v11101_v33, %v15628_v25 }
 0x522   : > { %v11533_v10 = vpop.eup %11532  ;;  %v9890_v26 = vsel %vm9689_vm6, %v11531_v55, %v15667_v63  ;;  %11558 = vpow2.f32 %v10440_v51  ;;  %v9659_v18 = vpop.f32.mrf.mxu0 }
 0x523   : > { %v11535_v44 = vpop.eup %11534  ;;  %9922 = vst [vmem:[%s15711_s28 + $0x40] sm:$0xff] %v9890_v26  ;;  %11560 = vrcp.f32 %v9802_v61  ;;  %v9805_v6 = vadd.f32 1.0, %v11533_v10  ;;  %v10441_v29 = vmul.f32 -1.442695, %v15780_v52  ;;  %v15788_v21 = vadd.f32 %v15628_v25, %v9659_v18 }
 0x524   : > { %v11537_v30 = vpop.eup %11536  ;;  %v9893_v43 = vsel %vm9689_vm6, %v11535_v44, %v15671_v8  ;;  %11562 = vpow2.f32 %v10438_v7  ;;  %v11104_v47 = vpop.f32.mrf.mxu0 }
 0x525   : > { %v11539_v63 = vpop.eup %11538  ;;  %9925 = vst [vmem:[%s15711_s28 + $0x58] sm:$0xff] %v9893_v43  ;;  %11564 = vrcp.f32 %v9805_v6  ;;  %v9803_v48 = vadd.f32 1.0, %v11537_v30  ;;  %v10439_v28 = vmul.f32 -1.442695, %v15788_v21  ;;  %v15796_v42 = vadd.f32 %v11104_v47, %v15628_v25 }
 0x526   : > { %v11541_v31 = vpop.eup %11540  ;;  %v9891_v17 = vsel %vm9689_vm6, %v11539_v63, %v15675_v62  ;;  %11566 = vpow2.f32 %v10441_v29  ;;  %v9672_v11 = vpop.f32.mrf.mxu0 }
 0x527   : > { %v11543_v8 = vpop.eup %11542  ;;  %9923 = vst [vmem:[%s15711_s28 + $0x48] sm:$0xff] %v9891_v17  ;;  %11568 = vrcp.f32 %v9803_v48  ;;  %v9808_v27 = vadd.f32 1.0, %v11541_v31  ;;  %v10444_v13 = vmul.f32 -1.442695, %v15796_v42  ;;  %v15804_v15 = vadd.f32 %v15628_v25, %v9672_v11 }
 0x528   : > { %v11545_v35 = vpop.eup %11544  ;;  %v9896_v9 = vsel %vm9689_vm6, %v11543_v8, %v15679_v32  ;;  %11570 = vpow2.f32 %v10439_v28  ;;  %v11105_v58 = vpop.f32.mrf.mxu0 }
 0x529   : > { %v11547_v62 = vpop.eup %11546  ;;  %9928 = vst [vmem:[%s15711_s28 + $0x70] sm:$0xff] %v9896_v9  ;;  %11572 = vrcp.f32 %v9808_v27  ;;  %v9806_v59 = vadd.f32 1.0, %v11545_v35  ;;  %v10442_v36 = vmul.f32 -1.442695, %v15804_v15  ;;  %v15812_v40 = vadd.f32 %v11105_v58, %v15628_v25 }
 0x52a   : > { %v11549_v5 = vpop.eup %11548  ;;  %v9894_v34 = vsel %vm9689_vm6, %v11547_v62, %v15684_v12  ;;  %11574 = vpow2.f32 %v10444_v13  ;;  %v9675_v20 = vpop.f32.mrf.mxu0 }
 0x52b   : > { %v11551_v32 = vpop.eup %11550  ;;  %9926 = vst [vmem:[%s15711_s28 + $0x60] sm:$0xff] %v9894_v34  ;;  %11576 = vrcp.f32 %v9806_v59  ;;  %v9809_v49 = vadd.f32 1.0, %v11549_v5  ;;  %v10445_v16 = vmul.f32 -1.442695, %v15812_v40  ;;  %v15820_v45 = vadd.f32 %v15628_v25, %v9675_v20 }
 0x52c   : > { %v11553_v3 = vpop.eup %11552  ;;  %v9897_v19 = vsel %vm9689_vm6, %v11551_v32, %v15691_v50  ;;  %11578 = vpow2.f32 %v10442_v36 }
 0x52d   : > { %v11555_v12 = vpop.eup %11554  ;;  %9929 = vst [vmem:[%s15711_s28 + $0x78] sm:$0xff] %v9897_v19  ;;  %11580 = vrcp.f32 %v9809_v49  ;;  %v9807_v53 = vadd.f32 1.0, %v11553_v3  ;;  %v10443_v57 = vmul.f32 -1.442695, %v15820_v45 }
 0x52e   : > { %v11557_v22 = vpop.eup %11556  ;;  %v9895_v25 = vsel %vm9689_vm6, %v11555_v12, %v15697_v2  ;;  %11582 = vpow2.f32 %v10445_v16 }
 0x52f   : > { %v11559_v39 = vpop.eup %11558  ;;  %9927 = vst [vmem:[%s15711_s28 + $0x68] sm:$0xff] %v9895_v25  ;;  %v9900_v50 = vsel %vm9689_vm6, %v11557_v22, %v15702_v60  ;;  %11584 = vrcp.f32 %v9807_v53 }
 0x530   : > { %v11561_v51 = vpop.eup %11560  ;;  %9932 = vst [vmem:[%s15711_s28 + $0x90] sm:$0xff] %v9900_v50  ;;  %v9812_v37 = vadd.f32 1.0, %v11559_v39  ;;  %11586 = vpow2.f32 %v10443_v57 }
 0x531   : > { %v11563_v1 = vpop.eup %11562  ;;  %v9898_v33 = vsel %vm9689_vm6, %v11561_v51, %v15709_v46 }
 0x532   : > { %v11565_v2 = vpop.eup %11564  ;;  %9930 = vst [vmem:[%s15711_s28 + $0x80] sm:$0xff] %v9898_v33  ;;  %11588 = vrcp.f32 %v9812_v37  ;;  %v9810_v55 = vadd.f32 1.0, %v11563_v1 }
 0x533   : > { %v11567_v61 = vpop.eup %11566  ;;  %v9901_v60 = vsel %vm9689_vm6, %v11565_v2, %v15719_v56 }
 0x534   : > { %v11569_v7 = vpop.eup %11568  ;;  %9933 = vst [vmem:[%s15711_s28 + $0x98] sm:$0xff] %v9901_v60  ;;  %11590 = vrcp.f32 %v9810_v55  ;;  %v9813_v10 = vadd.f32 1.0, %v11567_v61 }
 0x535   : > { %v11571_v26 = vpop.eup %11570  ;;  %v9899_v46 = vsel %vm9689_vm6, %v11569_v7, %v15727_v0 }
 0x536   : > { %v11573_v18 = vpop.eup %11572  ;;  %9931 = vst [vmem:[%s15711_s28 + $0x88] sm:$0xff] %v9899_v46  ;;  %11592 = vrcp.f32 %v9813_v10  ;;  %v9811_v44 = vadd.f32 1.0, %v11571_v26 }
 0x537   : > { %v11575_v6 = vpop.eup %11574  ;;  %v9904_v56 = vsel %vm9689_vm6, %v11573_v18, %v15735_v14 }
 0x538   : > { %v11577_v29 = vpop.eup %11576  ;;  %9936 = vst [vmem:[%s15711_s28 + $0xb0] sm:$0xff] %v9904_v56  ;;  %11594 = vrcp.f32 %v9811_v44  ;;  %v9816_v30 = vadd.f32 1.0, %v11575_v6 }
 0x539   : > { %v11579_v43 = vpop.eup %11578  ;;  %v9902_v0 = vsel %vm9689_vm6, %v11577_v29, %v15743_v24 }
 0x53a   : > { %v11581_v47 = vpop.eup %11580  ;;  %9934 = vst [vmem:[%s15711_s28 + $0xa0] sm:$0xff] %v9902_v0  ;;  %11596 = vrcp.f32 %v9816_v30  ;;  %v9814_v63 = vadd.f32 1.0, %v11579_v43 }
 0x53b   : > { %v11583_v48 = vpop.eup %11582  ;;  %v9905_v14 = vsel %vm9689_vm6, %v11581_v47, %v15751_v54 }
 0x53c   : > { %v11585_v28 = vpop.eup %11584  ;;  %9937 = vst [vmem:[%s15711_s28 + $0xb8] sm:$0xff] %v9905_v14  ;;  %11598 = vrcp.f32 %v9814_v63  ;;  %v9817_v31 = vadd.f32 1.0, %v11583_v48 }
 0x53d   : > { %v11587_v17 = vpop.eup %11586  ;;  %v9903_v24 = vsel %vm9689_vm6, %v11585_v28, %v15759_v4 }
 0x53e   : > { %9935 = vst [vmem:[%s15711_s28 + $0xa8] sm:$0xff] %v9903_v24  ;;  %11600 = vrcp.f32 %v9817_v31  ;;  %v9815_v11 = vadd.f32 1.0, %v11587_v17 }
 0x53f   : > { %v11589_v8 = vpop.eup %11588 }
 0x540   : > { %v9908_v54 = vsel %vm9689_vm6, %v11589_v8, %v15767_v38  ;;  %11602 = vrcp.f32 %v9815_v11 }
 0x541   : > { %v11591_v27 = vpop.eup %11590  ;;  %9940 = vst [vmem:[%s15711_s28 + $0xd0] sm:$0xff] %v9908_v54 }
 0x542   : > { %v9906_v13 = vsel %vm9689_vm6, %v11591_v27, %v15772_v23 }
 0x543   : > { %v11593_v4 = vpop.eup %11592  ;;  %9938 = vst [vmem:[%s15711_s28 + $0xc0] sm:$0xff] %v9906_v13 }
 0x544   : > { %v9909_v35 = vsel %vm9689_vm6, %v11593_v4, %v15780_v52 }
 0x545   : > { %v11595_v9 = vpop.eup %11594  ;;  %9941 = vst [vmem:[%s15711_s28 + $0xd8] sm:$0xff] %v9909_v35 }
 0x546   : > { %v9907_v38 = vsel %vm9689_vm6, %v11595_v9, %v15788_v21 }
 0x547   : > { %v11597_v58 = vpop.eup %11596  ;;  %9939 = vst [vmem:[%s15711_s28 + $0xc8] sm:$0xff] %v9907_v38 }
 0x548   : > { %v9912_v23 = vsel %vm9689_vm6, %v11597_v58, %v15796_v42 }
 0x549   : > { %v11599_v62 = vpop.eup %11598  ;;  %9944 = vst [vmem:[%s15711_s28 + $0xf0] sm:$0xff] %v9912_v23 }
 0x54a   : > { %v9910_v52 = vsel %vm9689_vm6, %v11599_v62, %v15804_v15 }
 0x54b   : > { %v11601_v59 = vpop.eup %11600  ;;  %9942 = vst [vmem:[%s15711_s28 + $0xe0] sm:$0xff] %v9910_v52 }
 0x54c   : > { %v9913_v21 = vsel %vm9689_vm6, %v11601_v59, %v15812_v40 }
 0x54d   : > { %v11603_v42 = vpop.eup %11602  ;;  %9945 = vst [vmem:[%s15711_s28 + $0xf8] sm:$0xff] %v9913_v21 }
 0x54e   : > { %v9911_v15 = vsel %vm9689_vm6, %v11603_v42, %v15820_v45 }
 0x54f   : > { %9943 = vst [vmem:[%s15711_s28 + $0xe8] sm:$0xff] %v9911_v15 }
 0x550   : > { %11622 = shalt.err (!%p11619_p3)
}
 0x551   : > { %s11623_s26 = scalar_lea.hbm %s15895_s18, 4096  ;;  %s11627_s11 = scalar_lea.hbm %s15956_s10, 8192 }
 0x552   : > { %p11624_p4 = scmp.ne.s32.totalorder %s15895_s18, %s11623_s26  ;;  %p11628_p9 = scmp.lt.s32.totalorder %s15895_s18, %s15956_s10 }
 0x553   : > { %p11629_p10 = scmp.lt.s32.totalorder %s11627_s11, %s11623_s26 }
 0x554   : > { %p11625_p7 = pnand %p11624_p4, %p11776_p5 }
 0x555   : > { %p11630_p11 = por %p11629_p10, %p11628_p9 }
 0x556   : > { %p11626_p8 = pneg %p11625_p7 }
 0x558   : > { %p11631_p12 = pnand %p11630_p11, %p11626_p8 }
 0x55a   : > { %11634 = shalt.err (!%p11631_p12)
}
 0x55b   : > { %s11681_s20 = smov 128   ;;  %s11682_s25 = smov 8  }
 0x55c   : > { %11109 = dma.vmem_to_hbm [thread:$0]  (%p11776_p5), %s15897_s30, 4096, %s15895_s18, %s15906_s17, %s11681_s20, %s11681_s20, %s11682_s25  }
 0x55d PF: > { %p11115_p13 = scmp.ge.s32.totalorder %s11669_s16, 2  ;;  %s9975_s27 = sand.u32 1, %s11657_s13  }
 0x55e   : > { %s9976_s26 = scalar_lea.sflag [#allocation3], %s9975_s27 }
 0x55f   : > { %p11112_p0 = pnand %p11115_p13, %p11780_p6 }
 0x561   : > { %p11113_p1 = pneg %p11112_p0 }
 0x563   : > { %11652 = dma.done.wait (%p11113_p1), %s9976_s26, 4096  }
 0x564   : > { %11654 = vsyncadd (%p11113_p1), %s9976_s26, 4294963200  ;;  %p20_p2 = scmp.ge.s32.totalorder %s11763_s19, 4   ;;  %s16498_s13 = smov %s11661_s14 }
 0x565   : > { %s16499_s14 = smov %s11665_s15  ;;  %s16500_s15 = smov %s11774_s22 }
 0x566   : > { %s16501_s16 = smov %s11763_s19  ;;  %22 = sbr.rel (!%p20_p2) target bundleno = 3 (0x3), region = 103 }
 0x56b   :  { %9981 = vsyncpa [#allocation3], 1 }
 0x56c   :  { %9983 = vsyncpa [#allocation3 + $0x1], 1 }

</bundles_post_ra>
